<compile_context>
chip_gen: v6e
topology: v6e:2x2x1
jax: 0.10.0
libtpu: 0.0.40
codegen_flags: <defaults>
</compile_context>

<pallas_src>
import jax
import jax.numpy as jnp
from jax import lax
from jax.experimental import pallas as pl
from jax.experimental.pallas import tpu as pltpu

H = 128          # hidden size
LAST = 7         # number of trailing timesteps fed to the output Linear


def _round_up(x, m):
    return -(-x // m) * m


def lstm_kernel(x_ref, wih_ref, whh_ref, b_ref, h_out_ref, xwb_ref):
    """One batch-block of the LSTM recurrence.

    x_ref    : (T, B_blk, 1)    time-major input slice
    wih_ref  : (1, 4H)          W_ih^T, gate order (i, f, o, g)
    whh_ref  : (H, 4H)          W_hh^T, gate order (i, f, o, g)
    b_ref    : (1, 4H)          b_ih + b_hh, gate order (i, f, o, g)
    h_out_ref: (LAST, B_blk, H) last-7 hidden states (lane-dense output)
    xwb_ref  : (T, B_blk, 4H)   VMEM scratch for the hoisted input projection
    """
    T = x_ref.shape[0]
    B = x_ref.shape[1]

    # W_hh^T cast to bf16 once; single-pass bf16 MXU operand, f32 accumulation.
    whh_b = whh_ref[...].astype(jnp.bfloat16)                   # (H, 4H)

    # Hoisted input projection + bias: pure VPU broadcast, done once before the loop.
    xwb_ref[...] = x_ref[...] * wih_ref[...] + b_ref[...]       # (T, B, 4H)

    h = jnp.zeros((B, H), jnp.float32)
    c = jnp.zeros((B, H), jnp.float32)

    # T is a small static trip count: fully unrolled straight-line recurrence
    # (static slices / stores, maximal scheduler visibility).
    for t in range(T):
        # 2-pass split-bf16 recurrent matmul (h recovered to ~f32, W_hh in bf16).
        hi = h.astype(jnp.bfloat16)
        lo = (h - hi.astype(jnp.float32)).astype(jnp.bfloat16)
        gates = (xwb_ref[t]
                 + jnp.dot(hi, whh_b, preferred_element_type=jnp.float32)
                 + jnp.dot(lo, whh_b, preferred_element_type=jnp.float32))   # (B, 4H)

        # sigmoid(x) = 0.5*tanh(0.5*x) + 0.5 -> one EUP op covering i | f | o.
        sig = 0.5 * jnp.tanh(0.5 * gates[:, :3 * H]) + 0.5
        i_g = sig[:, 0 * H:1 * H]
        f_g = sig[:, 1 * H:2 * H]
        o_g = sig[:, 2 * H:3 * H]
        g_g = jnp.tanh(gates[:, 3 * H:4 * H])

        c = f_g * c + i_g * g_g
        h = o_g * jnp.tanh(c)
        if t >= T - LAST:
            h_out_ref[t - (T - LAST)] = h                       # (B, H) lane-dense store


def lstm_forward(x, kparams):
    """x: (B, T, 1) float32. Returns (B, 7, 1) — Linear applied to last 7 hidden states."""
    B, T, _ = x.shape
    assert T >= LAST

    # --- batch blocking ---------------------------------------------------
    # Pad B to a multiple of 8 (sublane), aim for >=2 blocks when B >= 16 (so the
    # parallel axis can use both TensorCores on v7x), cap at 256, and shrink if the
    # per-block VMEM footprint (dominated by the f32 xwb scratch) would exceed ~12 MiB.
    b_padded8 = _round_up(B, 8)
    if b_padded8 <= 8:
        b_blk = b_padded8
    else:
        b_blk = min(256, _round_up(max(b_padded8 // 2, 8), 8))

    def _vmem_bytes(bb):
        return (T * bb * 4 * H * 4            # xwb scratch (f32)
                + 2 * LAST * bb * H * 4       # double-buffered output block
                + 2 * T * bb * 1 * 4          # double-buffered x block
                + 2 * (H + 2) * 4 * H * 4)    # double-buffered weights/bias

    while b_blk > 8 and _vmem_bytes(b_blk) > 12 * 1024 * 1024:
        b_blk = _round_up(b_blk // 2, 8)

    b_pad = _round_up(b_padded8, b_blk)
    grid = (b_pad // b_blk,)

    x_tm = jnp.transpose(x, (1, 0, 2)).astype(jnp.float32)      # (T, B, 1) time-major
    if b_pad != B:
        x_tm = jnp.pad(x_tm, ((0, 0), (0, b_pad - B), (0, 0)))  # zero rows are harmless

    h_last = pl.pallas_call(
        lstm_kernel,
        out_shape=jax.ShapeDtypeStruct((LAST, b_pad, H), jnp.float32),
        grid_spec=pltpu.PrefetchScalarGridSpec(
            num_scalar_prefetch=0,
            grid=grid,
            in_specs=[
                pl.BlockSpec((T, b_blk, 1), lambda i: (0, i, 0)),
                pl.BlockSpec((1, 4 * H), lambda i: (0, 0)),
                pl.BlockSpec((H, 4 * H), lambda i: (0, 0)),
                pl.BlockSpec((1, 4 * H), lambda i: (0, 0)),
            ],
            out_specs=pl.BlockSpec((LAST, b_blk, H), lambda i: (0, i, 0)),
            scratch_shapes=[pltpu.VMEM((T, b_blk, 4 * H), jnp.float32)],
        ),
        compiler_params=pltpu.CompilerParams(
            dimension_semantics=("parallel",)),
    )(x_tm, kparams["wih_t"], kparams["whh_t"], kparams["b"])

    h_last = h_last[:, :B, :]                                    # drop batch padding

    # Output Linear(128 -> 1): tiny contraction, done once at full f32 precision.
    y = jnp.einsum("tbh,ho->tbo", h_last, kparams["wout_t"],
                   precision=lax.Precision.HIGHEST) + kparams["bout"]   # (LAST, B, 1)
    return jnp.transpose(y, (1, 0, 2))                                   # (B, LAST, 1)


def init_params(key):
    """PyTorch-layout parameters, uniform(-1/sqrt(H), 1/sqrt(H)), gate order (i, f, g, o)."""
    k = 1.0 / jnp.sqrt(jnp.float32(H))
    ks = jax.random.split(key, 6)
    return {
        "w_ih": jax.random.uniform(ks[0], (4 * H, 1), jnp.float32, -k, k),
        "w_hh": jax.random.uniform(ks[1], (4 * H, H), jnp.float32, -k, k),
        "b_ih": jax.random.uniform(ks[2], (4 * H,), jnp.float32, -k, k),
        "b_hh": jax.random.uniform(ks[3], (4 * H,), jnp.float32, -k, k),
        "w_out": jax.random.uniform(ks[4], (1, H), jnp.float32, -k, k),
        "b_out": jax.random.uniform(ks[5], (1,), jnp.float32, -k, k),
    }


def prepare_kernel_params(p):
    """PyTorch gate order (i, f, g, o) -> kernel order (i, f, o, g); transpose & fold biases."""
    perm = jnp.concatenate([
        jnp.arange(0 * H, 1 * H),   # i
        jnp.arange(1 * H, 2 * H),   # f
        jnp.arange(3 * H, 4 * H),   # o
        jnp.arange(2 * H, 3 * H),   # g
    ])
    w_ih = p["w_ih"][perm]                       # (4H, 1)
    w_hh = p["w_hh"][perm]                       # (4H, H)
    b = (p["b_ih"] + p["b_hh"])[perm]            # (4H,)
    return {
        "wih_t": w_ih.T,                         # (1, 4H)
        "whh_t": w_hh.T,                         # (H, 4H)
        "b": b.reshape(1, 4 * H),                # (1, 4H)
        "wout_t": p["w_out"].T,                  # (H, 1)
        "bout": p["b_out"].reshape(1, 1),        # (1, 1)
    }


def lstm_forward_ref(x, p):
    """Pure-JAX reference in PyTorch layout / gate order (lax.scan, f32 'highest' matmuls)."""
    B, T, _ = x.shape
    w_ih, w_hh = p["w_ih"], p["w_hh"]
    b = p["b_ih"] + p["b_hh"]
    w_out, b_out = p["w_out"], p["b_out"]

    def step(carry, x_t):
        h, c = carry
        gates = (jnp.dot(x_t, w_ih.T, precision=lax.Precision.HIGHEST)
                 + jnp.dot(h, w_hh.T, precision=lax.Precision.HIGHEST)
                 + b)                                           # (B, 4H), order (i, f, g, o)
        i = jax.nn.sigmoid(gates[:, 0 * H:1 * H])
        f = jax.nn.sigmoid(gates[:, 1 * H:2 * H])
        g = jnp.tanh(gates[:, 2 * H:3 * H])
        o = jax.nn.sigmoid(gates[:, 3 * H:4 * H])
        c = f * c + i * g
        h = o * jnp.tanh(c)
        return (h, c), h

    h0 = jnp.zeros((B, H), jnp.float32)
    c0 = jnp.zeros((B, H), jnp.float32)
    _, hs = lax.scan(step, (h0, c0), jnp.transpose(x, (1, 0, 2)))   # (T, B, H)
    hs = hs[-LAST:]                                                  # (LAST, B, H)
    y = jnp.einsum("tbh,oh->tbo", hs, w_out,
                   precision=lax.Precision.HIGHEST) + b_out          # (LAST, B, 1)
    return jnp.transpose(y, (1, 0, 2))                               # (B, LAST, 1)


if __name__ == "__main__":
    key = jax.random.PRNGKey(0)
    pkey, xkey = jax.random.split(key)

    B, T = 2, 16
    torch_params = init_params(pkey)
    kernel_params = prepare_kernel_params(torch_params)
    x = jax.random.normal(xkey, (B, T, 1), jnp.float32)

    out = jax.block_until_ready(lstm_forward(x, kernel_params))
    ref = jax.block_until_ready(lstm_forward_ref(x, torch_params))

    assert out.shape == (B, LAST, 1), out.shape
    assert jnp.allclose(out, ref, atol=1e-3, rtol=1e-3), float(jnp.max(jnp.abs(out - ref)))
    print("KERNEL_OK")
</pallas_src>

<mosaic_0001>
module attributes {stable_mosaic.version = 11 : i64} {
  func.func @lstm_kernel(%arg0: i32, %arg1: memref<16x8x1xf32, #tpu.memory_space<vmem>>, %arg2: memref<1x512xf32, #tpu.memory_space<vmem>>, %arg3: memref<128x512xf32, #tpu.memory_space<vmem>>, %arg4: memref<1x512xf32, #tpu.memory_space<vmem>>, %arg5: memref<7x8x128xf32, #tpu.memory_space<vmem>>, %arg6: memref<16x8x512xf32, #tpu.memory_space<vmem>>) attributes {dimension_semantics = [#tpu.dimension_semantics<parallel>], iteration_bounds = array<i64: 1>, scalar_prefetch = 0 : i64, scratch_operands = 1 : i64, tpu.core_type = #tpu.core_type<tc>, window_params = [{transform_indices = @transform_0, window_bounds = array<i64: 16, 8, 1>}, {pipeline_mode = #tpu.pipeline_mode<synchronous>, transform_indices = @transform_1, window_bounds = array<i64: 1, 512>}, {pipeline_mode = #tpu.pipeline_mode<synchronous>, transform_indices = @transform_2, window_bounds = array<i64: 128, 512>}, {pipeline_mode = #tpu.pipeline_mode<synchronous>, transform_indices = @transform_3, window_bounds = array<i64: 1, 512>}, {transform_indices = @transform_4, window_bounds = array<i64: 7, 8, 128>}]} {
    %c0 = arith.constant 0 : index
    %c0_0 = arith.constant 0 : index
    %0 = vector.load %arg3[%c0, %c0_0] : memref<128x512xf32, #tpu.memory_space<vmem>>, vector<128x512xf32>
    %1 = arith.truncf %0 : vector<128x512xf32> to vector<128x512xbf16>
    %c0_1 = arith.constant 0 : index
    %c0_2 = arith.constant 0 : index
    %c0_3 = arith.constant 0 : index
    %2 = vector.load %arg1[%c0_1, %c0_2, %c0_3] : memref<16x8x1xf32, #tpu.memory_space<vmem>>, vector<16x8x1xf32>
    %c0_4 = arith.constant 0 : index
    %c0_5 = arith.constant 0 : index
    %3 = vector.load %arg2[%c0_4, %c0_5] : memref<1x512xf32, #tpu.memory_space<vmem>>, vector<1x512xf32>
    %4 = vector.shape_cast %3 : vector<1x512xf32> to vector<1x1x512xf32>
    %5 = vector.broadcast %2 : vector<16x8x1xf32> to vector<16x8x512xf32>
    %6 = vector.broadcast %4 : vector<1x1x512xf32> to vector<16x8x512xf32>
    %7 = arith.mulf %5, %6 : vector<16x8x512xf32>
    %c0_6 = arith.constant 0 : index
    %c0_7 = arith.constant 0 : index
    %8 = vector.load %arg4[%c0_6, %c0_7] : memref<1x512xf32, #tpu.memory_space<vmem>>, vector<1x512xf32>
    %9 = vector.shape_cast %8 : vector<1x512xf32> to vector<1x1x512xf32>
    %10 = vector.broadcast %9 : vector<1x1x512xf32> to vector<16x8x512xf32>
    %11 = arith.addf %7, %10 : vector<16x8x512xf32>
    %c0_8 = arith.constant 0 : index
    %c0_9 = arith.constant 0 : index
    %c0_10 = arith.constant 0 : index
    %12 = vector.load %arg6[%c0_8, %c0_9, %c0_10] : memref<16x8x512xf32, #tpu.memory_space<vmem>>, vector<16x8x512xf32>
    tpu.vector_store %arg6[%c0_8, %c0_9, %c0_10], %11 {strides = array<i32>} : memref<16x8x512xf32, #tpu.memory_space<vmem>>, vector<16x8x512xf32>,
    %cst = arith.constant 0.000000e+00 : f32
    %13 = vector.broadcast %cst : f32 to vector<8x128xf32>
    %cst_11 = arith.constant 0.000000e+00 : f32
    %14 = vector.broadcast %cst_11 : f32 to vector<8x128xf32>
    %15 = arith.truncf %13 : vector<8x128xf32> to vector<8x128xbf16>
    %16 = arith.extf %15 : vector<8x128xbf16> to vector<8x128xf32>
    %17 = arith.subf %13, %16 : vector<8x128xf32>
    %18 = arith.truncf %17 : vector<8x128xf32> to vector<8x128xbf16>
    %c0_12 = arith.constant 0 : index
    %c0_13 = arith.constant 0 : index
    %c0_14 = arith.constant 0 : index
    %19 = vector.load %arg6[%c0_12, %c0_13, %c0_14] : memref<16x8x512xf32, #tpu.memory_space<vmem>>, vector<1x8x512xf32>
    %20 = vector.shape_cast %19 : vector<1x8x512xf32> to vector<8x512xf32>
    %cst_15 = arith.constant dense<0.000000e+00> : vector<8x512xf32>
    %21 = tpu.matmul %15, %1, %cst_15 {dimension_numbers = #tpu.dot_dimension_numbers<[1], [0], [0], [1], [0, 0, 1, 1], [], []>} : vector<8x128xbf16>, vector<128x512xbf16>, vector<8x512xf32> -> vector<8x512xf32>
    %22 = arith.addf %20, %21 : vector<8x512xf32>
    %cst_16 = arith.constant dense<0.000000e+00> : vector<8x512xf32>
    %23 = tpu.matmul %18, %1, %cst_16 {dimension_numbers = #tpu.dot_dimension_numbers<[1], [0], [0], [1], [0, 0, 1, 1], [], []>} : vector<8x128xbf16>, vector<128x512xbf16>, vector<8x512xf32> -> vector<8x512xf32>
    %24 = arith.addf %22, %23 : vector<8x512xf32>
    %25 = vector.extract_strided_slice %24 {offsets = [0, 0], sizes = [8, 384], strides = [1, 1]} : vector<8x512xf32> to vector<8x384xf32>
    %cst_17 = arith.constant 5.000000e-01 : f32
    %26 = vector.broadcast %cst_17 : f32 to vector<8x384xf32>
    %27 = arith.mulf %26, %25 : vector<8x384xf32>
    %28 = math.tanh %27 : vector<8x384xf32>
    %cst_18 = arith.constant 5.000000e-01 : f32
    %29 = vector.broadcast %cst_18 : f32 to vector<8x384xf32>
    %30 = arith.mulf %29, %28 : vector<8x384xf32>
    %cst_19 = arith.constant 5.000000e-01 : f32
    %31 = vector.broadcast %cst_19 : f32 to vector<8x384xf32>
    %32 = arith.addf %30, %31 : vector<8x384xf32>
    %33 = vector.extract_strided_slice %32 {offsets = [0, 0], sizes = [8, 128], strides = [1, 1]} : vector<8x384xf32> to vector<8x128xf32>
    %34 = vector.extract_strided_slice %32 {offsets = [0, 128], sizes = [8, 128], strides = [1, 1]} : vector<8x384xf32> to vector<8x128xf32>
    %35 = vector.extract_strided_slice %32 {offsets = [0, 256], sizes = [8, 128], strides = [1, 1]} : vector<8x384xf32> to vector<8x128xf32>
    %36 = vector.extract_strided_slice %24 {offsets = [0, 384], sizes = [8, 128], strides = [1, 1]} : vector<8x512xf32> to vector<8x128xf32>
    %37 = math.tanh %36 : vector<8x128xf32>
    %38 = arith.mulf %34, %14 : vector<8x128xf32>
    %39 = arith.mulf %33, %37 : vector<8x128xf32>
    %40 = arith.addf %38, %39 : vector<8x128xf32>
    %41 = math.tanh %40 : vector<8x128xf32>
    %42 = arith.mulf %35, %41 : vector<8x128xf32>
    %43 = arith.truncf %42 : vector<8x128xf32> to vector<8x128xbf16>
    %44 = arith.extf %43 : vector<8x128xbf16> to vector<8x128xf32>
    %45 = arith.subf %42, %44 : vector<8x128xf32>
    %46 = arith.truncf %45 : vector<8x128xf32> to vector<8x128xbf16>
    %c1 = arith.constant 1 : index
    %c0_20 = arith.constant 0 : index
    %c0_21 = arith.constant 0 : index
    %47 = vector.load %arg6[%c1, %c0_20, %c0_21] : memref<16x8x512xf32, #tpu.memory_space<vmem>>, vector<1x8x512xf32>
    %48 = vector.shape_cast %47 : vector<1x8x512xf32> to vector<8x512xf32>
    %cst_22 = arith.constant dense<0.000000e+00> : vector<8x512xf32>
    %49 = tpu.matmul %43, %1, %cst_22 {dimension_numbers = #tpu.dot_dimension_numbers<[1], [0], [0], [1], [0, 0, 1, 1], [], []>} : vector<8x128xbf16>, vector<128x512xbf16>, vector<8x512xf32> -> vector<8x512xf32>
    %50 = arith.addf %48, %49 : vector<8x512xf32>
    %cst_23 = arith.constant dense<0.000000e+00> : vector<8x512xf32>
    %51 = tpu.matmul %46, %1, %cst_23 {dimension_numbers = #tpu.dot_dimension_numbers<[1], [0], [0], [1], [0, 0, 1, 1], [], []>} : vector<8x128xbf16>, vector<128x512xbf16>, vector<8x512xf32> -> vector<8x512xf32>
    %52 = arith.addf %50, %51 : vector<8x512xf32>
    %53 = vector.extract_strided_slice %52 {offsets = [0, 0], sizes = [8, 384], strides = [1, 1]} : vector<8x512xf32> to vector<8x384xf32>
    %cst_24 = arith.constant 5.000000e-01 : f32
    %54 = vector.broadcast %cst_24 : f32 to vector<8x384xf32>
    %55 = arith.mulf %54, %53 : vector<8x384xf32>
    %56 = math.tanh %55 : vector<8x384xf32>
    %cst_25 = arith.constant 5.000000e-01 : f32
    %57 = vector.broadcast %cst_25 : f32 to vector<8x384xf32>
    %58 = arith.mulf %57, %56 : vector<8x384xf32>
    %cst_26 = arith.constant 5.000000e-01 : f32
    %59 = vector.broadcast %cst_26 : f32 to vector<8x384xf32>
    %60 = arith.addf %58, %59 : vector<8x384xf32>
    %61 = vector.extract_strided_slice %60 {offsets = [0, 0], sizes = [8, 128], strides = [1, 1]} : vector<8x384xf32> to vector<8x128xf32>
    %62 = vector.extract_strided_slice %60 {offsets = [0, 128], sizes = [8, 128], strides = [1, 1]} : vector<8x384xf32> to vector<8x128xf32>
    %63 = vector.extract_strided_slice %60 {offsets = [0, 256], sizes = [8, 128], strides = [1, 1]} : vector<8x384xf32> to vector<8x128xf32>
    %64 = vector.extract_strided_slice %52 {offsets = [0, 384], sizes = [8, 128], strides = [1, 1]} : vector<8x512xf32> to vector<8x128xf32>
    %65 = math.tanh %64 : vector<8x128xf32>
    %66 = arith.mulf %62, %40 : vector<8x128xf32>
    %67 = arith.mulf %61, %65 : vector<8x128xf32>
    %68 = arith.addf %66, %67 : vector<8x128xf32>
    %69 = math.tanh %68 : vector<8x128xf32>
    %70 = arith.mulf %63, %69 : vector<8x128xf32>
    %71 = arith.truncf %70 : vector<8x128xf32> to vector<8x128xbf16>
    %72 = arith.extf %71 : vector<8x128xbf16> to vector<8x128xf32>
    %73 = arith.subf %70, %72 : vector<8x128xf32>
    %74 = arith.truncf %73 : vector<8x128xf32> to vector<8x128xbf16>
    %c2 = arith.constant 2 : index
    %c0_27 = arith.constant 0 : index
    %c0_28 = arith.constant 0 : index
    %75 = vector.load %arg6[%c2, %c0_27, %c0_28] : memref<16x8x512xf32, #tpu.memory_space<vmem>>, vector<1x8x512xf32>
    %76 = vector.shape_cast %75 : vector<1x8x512xf32> to vector<8x512xf32>
    %cst_29 = arith.constant dense<0.000000e+00> : vector<8x512xf32>
    %77 = tpu.matmul %71, %1, %cst_29 {dimension_numbers = #tpu.dot_dimension_numbers<[1], [0], [0], [1], [0, 0, 1, 1], [], []>} : vector<8x128xbf16>, vector<128x512xbf16>, vector<8x512xf32> -> vector<8x512xf32>
    %78 = arith.addf %76, %77 : vector<8x512xf32>
    %cst_30 = arith.constant dense<0.000000e+00> : vector<8x512xf32>
    %79 = tpu.matmul %74, %1, %cst_30 {dimension_numbers = #tpu.dot_dimension_numbers<[1], [0], [0], [1], [0, 0, 1, 1], [], []>} : vector<8x128xbf16>, vector<128x512xbf16>, vector<8x512xf32> -> vector<8x512xf32>
    %80 = arith.addf %78, %79 : vector<8x512xf32>
    %81 = vector.extract_strided_slice %80 {offsets = [0, 0], sizes = [8, 384], strides = [1, 1]} : vector<8x512xf32> to vector<8x384xf32>
    %cst_31 = arith.constant 5.000000e-01 : f32
    %82 = vector.broadcast %cst_31 : f32 to vector<8x384xf32>
    %83 = arith.mulf %82, %81 : vector<8x384xf32>
    %84 = math.tanh %83 : vector<8x384xf32>
    %cst_32 = arith.constant 5.000000e-01 : f32
    %85 = vector.broadcast %cst_32 : f32 to vector<8x384xf32>
    %86 = arith.mulf %85, %84 : vector<8x384xf32>
    %cst_33 = arith.constant 5.000000e-01 : f32
    %87 = vector.broadcast %cst_33 : f32 to vector<8x384xf32>
    %88 = arith.addf %86, %87 : vector<8x384xf32>
    %89 = vector.extract_strided_slice %88 {offsets = [0, 0], sizes = [8, 128], strides = [1, 1]} : vector<8x384xf32> to vector<8x128xf32>
    %90 = vector.extract_strided_slice %88 {offsets = [0, 128], sizes = [8, 128], strides = [1, 1]} : vector<8x384xf32> to vector<8x128xf32>
    %91 = vector.extract_strided_slice %88 {offsets = [0, 256], sizes = [8, 128], strides = [1, 1]} : vector<8x384xf32> to vector<8x128xf32>
    %92 = vector.extract_strided_slice %80 {offsets = [0, 384], sizes = [8, 128], strides = [1, 1]} : vector<8x512xf32> to vector<8x128xf32>
    %93 = math.tanh %92 : vector<8x128xf32>
    %94 = arith.mulf %90, %68 : vector<8x128xf32>
    %95 = arith.mulf %89, %93 : vector<8x128xf32>
    %96 = arith.addf %94, %95 : vector<8x128xf32>
    %97 = math.tanh %96 : vector<8x128xf32>
    %98 = arith.mulf %91, %97 : vector<8x128xf32>
    %99 = arith.truncf %98 : vector<8x128xf32> to vector<8x128xbf16>
    %100 = arith.extf %99 : vector<8x128xbf16> to vector<8x128xf32>
    %101 = arith.subf %98, %100 : vector<8x128xf32>
    %102 = arith.truncf %101 : vector<8x128xf32> to vector<8x128xbf16>
    %c3 = arith.constant 3 : index
    %c0_34 = arith.constant 0 : index
    %c0_35 = arith.constant 0 : index
    %103 = vector.load %arg6[%c3, %c0_34, %c0_35] : memref<16x8x512xf32, #tpu.memory_space<vmem>>, vector<1x8x512xf32>
    %104 = vector.shape_cast %103 : vector<1x8x512xf32> to vector<8x512xf32>
    %cst_36 = arith.constant dense<0.000000e+00> : vector<8x512xf32>
    %105 = tpu.matmul %99, %1, %cst_36 {dimension_numbers = #tpu.dot_dimension_numbers<[1], [0], [0], [1], [0, 0, 1, 1], [], []>} : vector<8x128xbf16>, vector<128x512xbf16>, vector<8x512xf32> -> vector<8x512xf32>
    %106 = arith.addf %104, %105 : vector<8x512xf32>
    %cst_37 = arith.constant dense<0.000000e+00> : vector<8x512xf32>
    %107 = tpu.matmul %102, %1, %cst_37 {dimension_numbers = #tpu.dot_dimension_numbers<[1], [0], [0], [1], [0, 0, 1, 1], [], []>} : vector<8x128xbf16>, vector<128x512xbf16>, vector<8x512xf32> -> vector<8x512xf32>
    %108 = arith.addf %106, %107 : vector<8x512xf32>
    %109 = vector.extract_strided_slice %108 {offsets = [0, 0], sizes = [8, 384], strides = [1, 1]} : vector<8x512xf32> to vector<8x384xf32>
    %cst_38 = arith.constant 5.000000e-01 : f32
    %110 = vector.broadcast %cst_38 : f32 to vector<8x384xf32>
    %111 = arith.mulf %110, %109 : vector<8x384xf32>
    %112 = math.tanh %111 : vector<8x384xf32>
    %cst_39 = arith.constant 5.000000e-01 : f32
    %113 = vector.broadcast %cst_39 : f32 to vector<8x384xf32>
    %114 = arith.mulf %113, %112 : vector<8x384xf32>
    %cst_40 = arith.constant 5.000000e-01 : f32
    %115 = vector.broadcast %cst_40 : f32 to vector<8x384xf32>
    %116 = arith.addf %114, %115 : vector<8x384xf32>
    %117 = vector.extract_strided_slice %116 {offsets = [0, 0], sizes = [8, 128], strides = [1, 1]} : vector<8x384xf32> to vector<8x128xf32>
    %118 = vector.extract_strided_slice %116 {offsets = [0, 128], sizes = [8, 128], strides = [1, 1]} : vector<8x384xf32> to vector<8x128xf32>
    %119 = vector.extract_strided_slice %116 {offsets = [0, 256], sizes = [8, 128], strides = [1, 1]} : vector<8x384xf32> to vector<8x128xf32>
    %120 = vector.extract_strided_slice %108 {offsets = [0, 384], sizes = [8, 128], strides = [1, 1]} : vector<8x512xf32> to vector<8x128xf32>
    %121 = math.tanh %120 : vector<8x128xf32>
    %122 = arith.mulf %118, %96 : vector<8x128xf32>
    %123 = arith.mulf %117, %121 : vector<8x128xf32>
    %124 = arith.addf %122, %123 : vector<8x128xf32>
    %125 = math.tanh %124 : vector<8x128xf32>
    %126 = arith.mulf %119, %125 : vector<8x128xf32>
    %127 = arith.truncf %126 : vector<8x128xf32> to vector<8x128xbf16>
    %128 = arith.extf %127 : vector<8x128xbf16> to vector<8x128xf32>
    %129 = arith.subf %126, %128 : vector<8x128xf32>
    %130 = arith.truncf %129 : vector<8x128xf32> to vector<8x128xbf16>
    %c4 = arith.constant 4 : index
    %c0_41 = arith.constant 0 : index
    %c0_42 = arith.constant 0 : index
    %131 = vector.load %arg6[%c4, %c0_41, %c0_42] : memref<16x8x512xf32, #tpu.memory_space<vmem>>, vector<1x8x512xf32>
    %132 = vector.shape_cast %131 : vector<1x8x512xf32> to vector<8x512xf32>
    %cst_43 = arith.constant dense<0.000000e+00> : vector<8x512xf32>
    %133 = tpu.matmul %127, %1, %cst_43 {dimension_numbers = #tpu.dot_dimension_numbers<[1], [0], [0], [1], [0, 0, 1, 1], [], []>} : vector<8x128xbf16>, vector<128x512xbf16>, vector<8x512xf32> -> vector<8x512xf32>
    %134 = arith.addf %132, %133 : vector<8x512xf32>
    %cst_44 = arith.constant dense<0.000000e+00> : vector<8x512xf32>
    %135 = tpu.matmul %130, %1, %cst_44 {dimension_numbers = #tpu.dot_dimension_numbers<[1], [0], [0], [1], [0, 0, 1, 1], [], []>} : vector<8x128xbf16>, vector<128x512xbf16>, vector<8x512xf32> -> vector<8x512xf32>
    %136 = arith.addf %134, %135 : vector<8x512xf32>
    %137 = vector.extract_strided_slice %136 {offsets = [0, 0], sizes = [8, 384], strides = [1, 1]} : vector<8x512xf32> to vector<8x384xf32>
    %cst_45 = arith.constant 5.000000e-01 : f32
    %138 = vector.broadcast %cst_45 : f32 to vector<8x384xf32>
    %139 = arith.mulf %138, %137 : vector<8x384xf32>
    %140 = math.tanh %139 : vector<8x384xf32>
    %cst_46 = arith.constant 5.000000e-01 : f32
    %141 = vector.broadcast %cst_46 : f32 to vector<8x384xf32>
    %142 = arith.mulf %141, %140 : vector<8x384xf32>
    %cst_47 = arith.constant 5.000000e-01 : f32
    %143 = vector.broadcast %cst_47 : f32 to vector<8x384xf32>
    %144 = arith.addf %142, %143 : vector<8x384xf32>
    %145 = vector.extract_strided_slice %144 {offsets = [0, 0], sizes = [8, 128], strides = [1, 1]} : vector<8x384xf32> to vector<8x128xf32>
    %146 = vector.extract_strided_slice %144 {offsets = [0, 128], sizes = [8, 128], strides = [1, 1]} : vector<8x384xf32> to vector<8x128xf32>
    %147 = vector.extract_strided_slice %144 {offsets = [0, 256], sizes = [8, 128], strides = [1, 1]} : vector<8x384xf32> to vector<8x128xf32>
    %148 = vector.extract_strided_slice %136 {offsets = [0, 384], sizes = [8, 128], strides = [1, 1]} : vector<8x512xf32> to vector<8x128xf32>
    %149 = math.tanh %148 : vector<8x128xf32>
    %150 = arith.mulf %146, %124 : vector<8x128xf32>
    %151 = arith.mulf %145, %149 : vector<8x128xf32>
    %152 = arith.addf %150, %151 : vector<8x128xf32>
    %153 = math.tanh %152 : vector<8x128xf32>
    %154 = arith.mulf %147, %153 : vector<8x128xf32>
    %155 = arith.truncf %154 : vector<8x128xf32> to vector<8x128xbf16>
    %156 = arith.extf %155 : vector<8x128xbf16> to vector<8x128xf32>
    %157 = arith.subf %154, %156 : vector<8x128xf32>
    %158 = arith.truncf %157 : vector<8x128xf32> to vector<8x128xbf16>
    %c5 = arith.constant 5 : index
    %c0_48 = arith.constant 0 : index
    %c0_49 = arith.constant 0 : index
    %159 = vector.load %arg6[%c5, %c0_48, %c0_49] : memref<16x8x512xf32, #tpu.memory_space<vmem>>, vector<1x8x512xf32>
    %160 = vector.shape_cast %159 : vector<1x8x512xf32> to vector<8x512xf32>
    %cst_50 = arith.constant dense<0.000000e+00> : vector<8x512xf32>
    %161 = tpu.matmul %155, %1, %cst_50 {dimension_numbers = #tpu.dot_dimension_numbers<[1], [0], [0], [1], [0, 0, 1, 1], [], []>} : vector<8x128xbf16>, vector<128x512xbf16>, vector<8x512xf32> -> vector<8x512xf32>
    %162 = arith.addf %160, %161 : vector<8x512xf32>
    %cst_51 = arith.constant dense<0.000000e+00> : vector<8x512xf32>
    %163 = tpu.matmul %158, %1, %cst_51 {dimension_numbers = #tpu.dot_dimension_numbers<[1], [0], [0], [1], [0, 0, 1, 1], [], []>} : vector<8x128xbf16>, vector<128x512xbf16>, vector<8x512xf32> -> vector<8x512xf32>
    %164 = arith.addf %162, %163 : vector<8x512xf32>
    %165 = vector.extract_strided_slice %164 {offsets = [0, 0], sizes = [8, 384], strides = [1, 1]} : vector<8x512xf32> to vector<8x384xf32>
    %cst_52 = arith.constant 5.000000e-01 : f32
    %166 = vector.broadcast %cst_52 : f32 to vector<8x384xf32>
    %167 = arith.mulf %166, %165 : vector<8x384xf32>
    %168 = math.tanh %167 : vector<8x384xf32>
    %cst_53 = arith.constant 5.000000e-01 : f32
    %169 = vector.broadcast %cst_53 : f32 to vector<8x384xf32>
    %170 = arith.mulf %169, %168 : vector<8x384xf32>
    %cst_54 = arith.constant 5.000000e-01 : f32
    %171 = vector.broadcast %cst_54 : f32 to vector<8x384xf32>
    %172 = arith.addf %170, %171 : vector<8x384xf32>
    %173 = vector.extract_strided_slice %172 {offsets = [0, 0], sizes = [8, 128], strides = [1, 1]} : vector<8x384xf32> to vector<8x128xf32>
    %174 = vector.extract_strided_slice %172 {offsets = [0, 128], sizes = [8, 128], strides = [1, 1]} : vector<8x384xf32> to vector<8x128xf32>
    %175 = vector.extract_strided_slice %172 {offsets = [0, 256], sizes = [8, 128], strides = [1, 1]} : vector<8x384xf32> to vector<8x128xf32>
    %176 = vector.extract_strided_slice %164 {offsets = [0, 384], sizes = [8, 128], strides = [1, 1]} : vector<8x512xf32> to vector<8x128xf32>
    %177 = math.tanh %176 : vector<8x128xf32>
    %178 = arith.mulf %174, %152 : vector<8x128xf32>
    %179 = arith.mulf %173, %177 : vector<8x128xf32>
    %180 = arith.addf %178, %179 : vector<8x128xf32>
    %181 = math.tanh %180 : vector<8x128xf32>
    %182 = arith.mulf %175, %181 : vector<8x128xf32>
    %183 = arith.truncf %182 : vector<8x128xf32> to vector<8x128xbf16>
    %184 = arith.extf %183 : vector<8x128xbf16> to vector<8x128xf32>
    %185 = arith.subf %182, %184 : vector<8x128xf32>
    %186 = arith.truncf %185 : vector<8x128xf32> to vector<8x128xbf16>
    %c6 = arith.constant 6 : index
    %c0_55 = arith.constant 0 : index
    %c0_56 = arith.constant 0 : index
    %187 = vector.load %arg6[%c6, %c0_55, %c0_56] : memref<16x8x512xf32, #tpu.memory_space<vmem>>, vector<1x8x512xf32>
    %188 = vector.shape_cast %187 : vector<1x8x512xf32> to vector<8x512xf32>
    %cst_57 = arith.constant dense<0.000000e+00> : vector<8x512xf32>
    %189 = tpu.matmul %183, %1, %cst_57 {dimension_numbers = #tpu.dot_dimension_numbers<[1], [0], [0], [1], [0, 0, 1, 1], [], []>} : vector<8x128xbf16>, vector<128x512xbf16>, vector<8x512xf32> -> vector<8x512xf32>
    %190 = arith.addf %188, %189 : vector<8x512xf32>
    %cst_58 = arith.constant dense<0.000000e+00> : vector<8x512xf32>
    %191 = tpu.matmul %186, %1, %cst_58 {dimension_numbers = #tpu.dot_dimension_numbers<[1], [0], [0], [1], [0, 0, 1, 1], [], []>} : vector<8x128xbf16>, vector<128x512xbf16>, vector<8x512xf32> -> vector<8x512xf32>
    %192 = arith.addf %190, %191 : vector<8x512xf32>
    %193 = vector.extract_strided_slice %192 {offsets = [0, 0], sizes = [8, 384], strides = [1, 1]} : vector<8x512xf32> to vector<8x384xf32>
    %cst_59 = arith.constant 5.000000e-01 : f32
    %194 = vector.broadcast %cst_59 : f32 to vector<8x384xf32>
    %195 = arith.mulf %194, %193 : vector<8x384xf32>
    %196 = math.tanh %195 : vector<8x384xf32>
    %cst_60 = arith.constant 5.000000e-01 : f32
    %197 = vector.broadcast %cst_60 : f32 to vector<8x384xf32>
    %198 = arith.mulf %197, %196 : vector<8x384xf32>
    %cst_61 = arith.constant 5.000000e-01 : f32
    %199 = vector.broadcast %cst_61 : f32 to vector<8x384xf32>
    %200 = arith.addf %198, %199 : vector<8x384xf32>
    %201 = vector.extract_strided_slice %200 {offsets = [0, 0], sizes = [8, 128], strides = [1, 1]} : vector<8x384xf32> to vector<8x128xf32>
    %202 = vector.extract_strided_slice %200 {offsets = [0, 128], sizes = [8, 128], strides = [1, 1]} : vector<8x384xf32> to vector<8x128xf32>
    %203 = vector.extract_strided_slice %200 {offsets = [0, 256], sizes = [8, 128], strides = [1, 1]} : vector<8x384xf32> to vector<8x128xf32>
    %204 = vector.extract_strided_slice %192 {offsets = [0, 384], sizes = [8, 128], strides = [1, 1]} : vector<8x512xf32> to vector<8x128xf32>
    %205 = math.tanh %204 : vector<8x128xf32>
    %206 = arith.mulf %202, %180 : vector<8x128xf32>
    %207 = arith.mulf %201, %205 : vector<8x128xf32>
    %208 = arith.addf %206, %207 : vector<8x128xf32>
    %209 = math.tanh %208 : vector<8x128xf32>
    %210 = arith.mulf %203, %209 : vector<8x128xf32>
    %211 = arith.truncf %210 : vector<8x128xf32> to vector<8x128xbf16>
    %212 = arith.extf %211 : vector<8x128xbf16> to vector<8x128xf32>
    %213 = arith.subf %210, %212 : vector<8x128xf32>
    %214 = arith.truncf %213 : vector<8x128xf32> to vector<8x128xbf16>
    %c7 = arith.constant 7 : index
    %c0_62 = arith.constant 0 : index
    %c0_63 = arith.constant 0 : index
    %215 = vector.load %arg6[%c7, %c0_62, %c0_63] : memref<16x8x512xf32, #tpu.memory_space<vmem>>, vector<1x8x512xf32>
    %216 = vector.shape_cast %215 : vector<1x8x512xf32> to vector<8x512xf32>
    %cst_64 = arith.constant dense<0.000000e+00> : vector<8x512xf32>
    %217 = tpu.matmul %211, %1, %cst_64 {dimension_numbers = #tpu.dot_dimension_numbers<[1], [0], [0], [1], [0, 0, 1, 1], [], []>} : vector<8x128xbf16>, vector<128x512xbf16>, vector<8x512xf32> -> vector<8x512xf32>
    %218 = arith.addf %216, %217 : vector<8x512xf32>
    %cst_65 = arith.constant dense<0.000000e+00> : vector<8x512xf32>
    %219 = tpu.matmul %214, %1, %cst_65 {dimension_numbers = #tpu.dot_dimension_numbers<[1], [0], [0], [1], [0, 0, 1, 1], [], []>} : vector<8x128xbf16>, vector<128x512xbf16>, vector<8x512xf32> -> vector<8x512xf32>
    %220 = arith.addf %218, %219 : vector<8x512xf32>
    %221 = vector.extract_strided_slice %220 {offsets = [0, 0], sizes = [8, 384], strides = [1, 1]} : vector<8x512xf32> to vector<8x384xf32>
    %cst_66 = arith.constant 5.000000e-01 : f32
    %222 = vector.broadcast %cst_66 : f32 to vector<8x384xf32>
    %223 = arith.mulf %222, %221 : vector<8x384xf32>
    %224 = math.tanh %223 : vector<8x384xf32>
    %cst_67 = arith.constant 5.000000e-01 : f32
    %225 = vector.broadcast %cst_67 : f32 to vector<8x384xf32>
    %226 = arith.mulf %225, %224 : vector<8x384xf32>
    %cst_68 = arith.constant 5.000000e-01 : f32
    %227 = vector.broadcast %cst_68 : f32 to vector<8x384xf32>
    %228 = arith.addf %226, %227 : vector<8x384xf32>
    %229 = vector.extract_strided_slice %228 {offsets = [0, 0], sizes = [8, 128], strides = [1, 1]} : vector<8x384xf32> to vector<8x128xf32>
    %230 = vector.extract_strided_slice %228 {offsets = [0, 128], sizes = [8, 128], strides = [1, 1]} : vector<8x384xf32> to vector<8x128xf32>
    %231 = vector.extract_strided_slice %228 {offsets = [0, 256], sizes = [8, 128], strides = [1, 1]} : vector<8x384xf32> to vector<8x128xf32>
    %232 = vector.extract_strided_slice %220 {offsets = [0, 384], sizes = [8, 128], strides = [1, 1]} : vector<8x512xf32> to vector<8x128xf32>
    %233 = math.tanh %232 : vector<8x128xf32>
    %234 = arith.mulf %230, %208 : vector<8x128xf32>
    %235 = arith.mulf %229, %233 : vector<8x128xf32>
    %236 = arith.addf %234, %235 : vector<8x128xf32>
    %237 = math.tanh %236 : vector<8x128xf32>
    %238 = arith.mulf %231, %237 : vector<8x128xf32>
    %239 = arith.truncf %238 : vector<8x128xf32> to vector<8x128xbf16>
    %240 = arith.extf %239 : vector<8x128xbf16> to vector<8x128xf32>
    %241 = arith.subf %238, %240 : vector<8x128xf32>
    %242 = arith.truncf %241 : vector<8x128xf32> to vector<8x128xbf16>
    %c8 = arith.constant 8 : index
    %c0_69 = arith.constant 0 : index
    %c0_70 = arith.constant 0 : index
    %243 = vector.load %arg6[%c8, %c0_69, %c0_70] : memref<16x8x512xf32, #tpu.memory_space<vmem>>, vector<1x8x512xf32>
    %244 = vector.shape_cast %243 : vector<1x8x512xf32> to vector<8x512xf32>
    %cst_71 = arith.constant dense<0.000000e+00> : vector<8x512xf32>
    %245 = tpu.matmul %239, %1, %cst_71 {dimension_numbers = #tpu.dot_dimension_numbers<[1], [0], [0], [1], [0, 0, 1, 1], [], []>} : vector<8x128xbf16>, vector<128x512xbf16>, vector<8x512xf32> -> vector<8x512xf32>
    %246 = arith.addf %244, %245 : vector<8x512xf32>
    %cst_72 = arith.constant dense<0.000000e+00> : vector<8x512xf32>
    %247 = tpu.matmul %242, %1, %cst_72 {dimension_numbers = #tpu.dot_dimension_numbers<[1], [0], [0], [1], [0, 0, 1, 1], [], []>} : vector<8x128xbf16>, vector<128x512xbf16>, vector<8x512xf32> -> vector<8x512xf32>
    %248 = arith.addf %246, %247 : vector<8x512xf32>
    %249 = vector.extract_strided_slice %248 {offsets = [0, 0], sizes = [8, 384], strides = [1, 1]} : vector<8x512xf32> to vector<8x384xf32>
    %cst_73 = arith.constant 5.000000e-01 : f32
    %250 = vector.broadcast %cst_73 : f32 to vector<8x384xf32>
    %251 = arith.mulf %250, %249 : vector<8x384xf32>
    %252 = math.tanh %251 : vector<8x384xf32>
    %cst_74 = arith.constant 5.000000e-01 : f32
    %253 = vector.broadcast %cst_74 : f32 to vector<8x384xf32>
    %254 = arith.mulf %253, %252 : vector<8x384xf32>
    %cst_75 = arith.constant 5.000000e-01 : f32
    %255 = vector.broadcast %cst_75 : f32 to vector<8x384xf32>
    %256 = arith.addf %254, %255 : vector<8x384xf32>
    %257 = vector.extract_strided_slice %256 {offsets = [0, 0], sizes = [8, 128], strides = [1, 1]} : vector<8x384xf32> to vector<8x128xf32>
    %258 = vector.extract_strided_slice %256 {offsets = [0, 128], sizes = [8, 128], strides = [1, 1]} : vector<8x384xf32> to vector<8x128xf32>
    %259 = vector.extract_strided_slice %256 {offsets = [0, 256], sizes = [8, 128], strides = [1, 1]} : vector<8x384xf32> to vector<8x128xf32>
    %260 = vector.extract_strided_slice %248 {offsets = [0, 384], sizes = [8, 128], strides = [1, 1]} : vector<8x512xf32> to vector<8x128xf32>
    %261 = math.tanh %260 : vector<8x128xf32>
    %262 = arith.mulf %258, %236 : vector<8x128xf32>
    %263 = arith.mulf %257, %261 : vector<8x128xf32>
    %264 = arith.addf %262, %263 : vector<8x128xf32>
    %265 = math.tanh %264 : vector<8x128xf32>
    %266 = arith.mulf %259, %265 : vector<8x128xf32>
    %267 = arith.truncf %266 : vector<8x128xf32> to vector<8x128xbf16>
    %268 = arith.extf %267 : vector<8x128xbf16> to vector<8x128xf32>
    %269 = arith.subf %266, %268 : vector<8x128xf32>
    %270 = arith.truncf %269 : vector<8x128xf32> to vector<8x128xbf16>
    %c9 = arith.constant 9 : index
    %c0_76 = arith.constant 0 : index
    %c0_77 = arith.constant 0 : index
    %271 = vector.load %arg6[%c9, %c0_76, %c0_77] : memref<16x8x512xf32, #tpu.memory_space<vmem>>, vector<1x8x512xf32>
    %272 = vector.shape_cast %271 : vector<1x8x512xf32> to vector<8x512xf32>
    %cst_78 = arith.constant dense<0.000000e+00> : vector<8x512xf32>
    %273 = tpu.matmul %267, %1, %cst_78 {dimension_numbers = #tpu.dot_dimension_numbers<[1], [0], [0], [1], [0, 0, 1, 1], [], []>} : vector<8x128xbf16>, vector<128x512xbf16>, vector<8x512xf32> -> vector<8x512xf32>
    %274 = arith.addf %272, %273 : vector<8x512xf32>
    %cst_79 = arith.constant dense<0.000000e+00> : vector<8x512xf32>
    %275 = tpu.matmul %270, %1, %cst_79 {dimension_numbers = #tpu.dot_dimension_numbers<[1], [0], [0], [1], [0, 0, 1, 1], [], []>} : vector<8x128xbf16>, vector<128x512xbf16>, vector<8x512xf32> -> vector<8x512xf32>
    %276 = arith.addf %274, %275 : vector<8x512xf32>
    %277 = vector.extract_strided_slice %276 {offsets = [0, 0], sizes = [8, 384], strides = [1, 1]} : vector<8x512xf32> to vector<8x384xf32>
    %cst_80 = arith.constant 5.000000e-01 : f32
    %278 = vector.broadcast %cst_80 : f32 to vector<8x384xf32>
    %279 = arith.mulf %278, %277 : vector<8x384xf32>
    %280 = math.tanh %279 : vector<8x384xf32>
    %cst_81 = arith.constant 5.000000e-01 : f32
    %281 = vector.broadcast %cst_81 : f32 to vector<8x384xf32>
    %282 = arith.mulf %281, %280 : vector<8x384xf32>
    %cst_82 = arith.constant 5.000000e-01 : f32
    %283 = vector.broadcast %cst_82 : f32 to vector<8x384xf32>
    %284 = arith.addf %282, %283 : vector<8x384xf32>
    %285 = vector.extract_strided_slice %284 {offsets = [0, 0], sizes = [8, 128], strides = [1, 1]} : vector<8x384xf32> to vector<8x128xf32>
    %286 = vector.extract_strided_slice %284 {offsets = [0, 128], sizes = [8, 128], strides = [1, 1]} : vector<8x384xf32> to vector<8x128xf32>
    %287 = vector.extract_strided_slice %284 {offsets = [0, 256], sizes = [8, 128], strides = [1, 1]} : vector<8x384xf32> to vector<8x128xf32>
    %288 = vector.extract_strided_slice %276 {offsets = [0, 384], sizes = [8, 128], strides = [1, 1]} : vector<8x512xf32> to vector<8x128xf32>
    %289 = math.tanh %288 : vector<8x128xf32>
    %290 = arith.mulf %286, %264 : vector<8x128xf32>
    %291 = arith.mulf %285, %289 : vector<8x128xf32>
    %292 = arith.addf %290, %291 : vector<8x128xf32>
    %293 = math.tanh %292 : vector<8x128xf32>
    %294 = arith.mulf %287, %293 : vector<8x128xf32>
    %c0_83 = arith.constant 0 : index
    %c0_84 = arith.constant 0 : index
    %c0_85 = arith.constant 0 : index
    %295 = vector.load %arg5[%c0_83, %c0_84, %c0_85] : memref<7x8x128xf32, #tpu.memory_space<vmem>>, vector<1x8x128xf32>
    %296 = vector.shape_cast %295 : vector<1x8x128xf32> to vector<8x128xf32>
    %297 = vector.shape_cast %294 : vector<8x128xf32> to vector<1x8x128xf32>
    tpu.vector_store %arg5[%c0_83, %c0_84, %c0_85], %297 {strides = array<i32>} : memref<7x8x128xf32, #tpu.memory_space<vmem>>, vector<1x8x128xf32>,
    %298 = arith.truncf %294 : vector<8x128xf32> to vector<8x128xbf16>
    %299 = arith.extf %298 : vector<8x128xbf16> to vector<8x128xf32>
    %300 = arith.subf %294, %299 : vector<8x128xf32>
    %301 = arith.truncf %300 : vector<8x128xf32> to vector<8x128xbf16>
    %c10 = arith.constant 10 : index
    %c0_86 = arith.constant 0 : index
    %c0_87 = arith.constant 0 : index
    %302 = vector.load %arg6[%c10, %c0_86, %c0_87] : memref<16x8x512xf32, #tpu.memory_space<vmem>>, vector<1x8x512xf32>
    %303 = vector.shape_cast %302 : vector<1x8x512xf32> to vector<8x512xf32>
    %cst_88 = arith.constant dense<0.000000e+00> : vector<8x512xf32>
    %304 = tpu.matmul %298, %1, %cst_88 {dimension_numbers = #tpu.dot_dimension_numbers<[1], [0], [0], [1], [0, 0, 1, 1], [], []>} : vector<8x128xbf16>, vector<128x512xbf16>, vector<8x512xf32> -> vector<8x512xf32>
    %305 = arith.addf %303, %304 : vector<8x512xf32>
    %cst_89 = arith.constant dense<0.000000e+00> : vector<8x512xf32>
    %306 = tpu.matmul %301, %1, %cst_89 {dimension_numbers = #tpu.dot_dimension_numbers<[1], [0], [0], [1], [0, 0, 1, 1], [], []>} : vector<8x128xbf16>, vector<128x512xbf16>, vector<8x512xf32> -> vector<8x512xf32>
    %307 = arith.addf %305, %306 : vector<8x512xf32>
    %308 = vector.extract_strided_slice %307 {offsets = [0, 0], sizes = [8, 384], strides = [1, 1]} : vector<8x512xf32> to vector<8x384xf32>
    %cst_90 = arith.constant 5.000000e-01 : f32
    %309 = vector.broadcast %cst_90 : f32 to vector<8x384xf32>
    %310 = arith.mulf %309, %308 : vector<8x384xf32>
    %311 = math.tanh %310 : vector<8x384xf32>
    %cst_91 = arith.constant 5.000000e-01 : f32
    %312 = vector.broadcast %cst_91 : f32 to vector<8x384xf32>
    %313 = arith.mulf %312, %311 : vector<8x384xf32>
    %cst_92 = arith.constant 5.000000e-01 : f32
    %314 = vector.broadcast %cst_92 : f32 to vector<8x384xf32>
    %315 = arith.addf %313, %314 : vector<8x384xf32>
    %316 = vector.extract_strided_slice %315 {offsets = [0, 0], sizes = [8, 128], strides = [1, 1]} : vector<8x384xf32> to vector<8x128xf32>
    %317 = vector.extract_strided_slice %315 {offsets = [0, 128], sizes = [8, 128], strides = [1, 1]} : vector<8x384xf32> to vector<8x128xf32>
    %318 = vector.extract_strided_slice %315 {offsets = [0, 256], sizes = [8, 128], strides = [1, 1]} : vector<8x384xf32> to vector<8x128xf32>
    %319 = vector.extract_strided_slice %307 {offsets = [0, 384], sizes = [8, 128], strides = [1, 1]} : vector<8x512xf32> to vector<8x128xf32>
    %320 = math.tanh %319 : vector<8x128xf32>
    %321 = arith.mulf %317, %292 : vector<8x128xf32>
    %322 = arith.mulf %316, %320 : vector<8x128xf32>
    %323 = arith.addf %321, %322 : vector<8x128xf32>
    %324 = math.tanh %323 : vector<8x128xf32>
    %325 = arith.mulf %318, %324 : vector<8x128xf32>
    %c1_93 = arith.constant 1 : index
    %c0_94 = arith.constant 0 : index
    %c0_95 = arith.constant 0 : index
    %326 = vector.load %arg5[%c1_93, %c0_94, %c0_95] : memref<7x8x128xf32, #tpu.memory_space<vmem>>, vector<1x8x128xf32>
    %327 = vector.shape_cast %326 : vector<1x8x128xf32> to vector<8x128xf32>
    %328 = vector.shape_cast %325 : vector<8x128xf32> to vector<1x8x128xf32>
    tpu.vector_store %arg5[%c1_93, %c0_94, %c0_95], %328 {strides = array<i32>} : memref<7x8x128xf32, #tpu.memory_space<vmem>>, vector<1x8x128xf32>,
    %329 = arith.truncf %325 : vector<8x128xf32> to vector<8x128xbf16>
    %330 = arith.extf %329 : vector<8x128xbf16> to vector<8x128xf32>
    %331 = arith.subf %325, %330 : vector<8x128xf32>
    %332 = arith.truncf %331 : vector<8x128xf32> to vector<8x128xbf16>
    %c11 = arith.constant 11 : index
    %c0_96 = arith.constant 0 : index
    %c0_97 = arith.constant 0 : index
    %333 = vector.load %arg6[%c11, %c0_96, %c0_97] : memref<16x8x512xf32, #tpu.memory_space<vmem>>, vector<1x8x512xf32>
    %334 = vector.shape_cast %333 : vector<1x8x512xf32> to vector<8x512xf32>
    %cst_98 = arith.constant dense<0.000000e+00> : vector<8x512xf32>
    %335 = tpu.matmul %329, %1, %cst_98 {dimension_numbers = #tpu.dot_dimension_numbers<[1], [0], [0], [1], [0, 0, 1, 1], [], []>} : vector<8x128xbf16>, vector<128x512xbf16>, vector<8x512xf32> -> vector<8x512xf32>
    %336 = arith.addf %334, %335 : vector<8x512xf32>
    %cst_99 = arith.constant dense<0.000000e+00> : vector<8x512xf32>
    %337 = tpu.matmul %332, %1, %cst_99 {dimension_numbers = #tpu.dot_dimension_numbers<[1], [0], [0], [1], [0, 0, 1, 1], [], []>} : vector<8x128xbf16>, vector<128x512xbf16>, vector<8x512xf32> -> vector<8x512xf32>
    %338 = arith.addf %336, %337 : vector<8x512xf32>
    %339 = vector.extract_strided_slice %338 {offsets = [0, 0], sizes = [8, 384], strides = [1, 1]} : vector<8x512xf32> to vector<8x384xf32>
    %cst_100 = arith.constant 5.000000e-01 : f32
    %340 = vector.broadcast %cst_100 : f32 to vector<8x384xf32>
    %341 = arith.mulf %340, %339 : vector<8x384xf32>
    %342 = math.tanh %341 : vector<8x384xf32>
    %cst_101 = arith.constant 5.000000e-01 : f32
    %343 = vector.broadcast %cst_101 : f32 to vector<8x384xf32>
    %344 = arith.mulf %343, %342 : vector<8x384xf32>
    %cst_102 = arith.constant 5.000000e-01 : f32
    %345 = vector.broadcast %cst_102 : f32 to vector<8x384xf32>
    %346 = arith.addf %344, %345 : vector<8x384xf32>
    %347 = vector.extract_strided_slice %346 {offsets = [0, 0], sizes = [8, 128], strides = [1, 1]} : vector<8x384xf32> to vector<8x128xf32>
    %348 = vector.extract_strided_slice %346 {offsets = [0, 128], sizes = [8, 128], strides = [1, 1]} : vector<8x384xf32> to vector<8x128xf32>
    %349 = vector.extract_strided_slice %346 {offsets = [0, 256], sizes = [8, 128], strides = [1, 1]} : vector<8x384xf32> to vector<8x128xf32>
    %350 = vector.extract_strided_slice %338 {offsets = [0, 384], sizes = [8, 128], strides = [1, 1]} : vector<8x512xf32> to vector<8x128xf32>
    %351 = math.tanh %350 : vector<8x128xf32>
    %352 = arith.mulf %348, %323 : vector<8x128xf32>
    %353 = arith.mulf %347, %351 : vector<8x128xf32>
    %354 = arith.addf %352, %353 : vector<8x128xf32>
    %355 = math.tanh %354 : vector<8x128xf32>
    %356 = arith.mulf %349, %355 : vector<8x128xf32>
    %c2_103 = arith.constant 2 : index
    %c0_104 = arith.constant 0 : index
    %c0_105 = arith.constant 0 : index
    %357 = vector.load %arg5[%c2_103, %c0_104, %c0_105] : memref<7x8x128xf32, #tpu.memory_space<vmem>>, vector<1x8x128xf32>
    %358 = vector.shape_cast %357 : vector<1x8x128xf32> to vector<8x128xf32>
    %359 = vector.shape_cast %356 : vector<8x128xf32> to vector<1x8x128xf32>
    tpu.vector_store %arg5[%c2_103, %c0_104, %c0_105], %359 {strides = array<i32>} : memref<7x8x128xf32, #tpu.memory_space<vmem>>, vector<1x8x128xf32>,
    %360 = arith.truncf %356 : vector<8x128xf32> to vector<8x128xbf16>
    %361 = arith.extf %360 : vector<8x128xbf16> to vector<8x128xf32>
    %362 = arith.subf %356, %361 : vector<8x128xf32>
    %363 = arith.truncf %362 : vector<8x128xf32> to vector<8x128xbf16>
    %c12 = arith.constant 12 : index
    %c0_106 = arith.constant 0 : index
    %c0_107 = arith.constant 0 : index
    %364 = vector.load %arg6[%c12, %c0_106, %c0_107] : memref<16x8x512xf32, #tpu.memory_space<vmem>>, vector<1x8x512xf32>
    %365 = vector.shape_cast %364 : vector<1x8x512xf32> to vector<8x512xf32>
    %cst_108 = arith.constant dense<0.000000e+00> : vector<8x512xf32>
    %366 = tpu.matmul %360, %1, %cst_108 {dimension_numbers = #tpu.dot_dimension_numbers<[1], [0], [0], [1], [0, 0, 1, 1], [], []>} : vector<8x128xbf16>, vector<128x512xbf16>, vector<8x512xf32> -> vector<8x512xf32>
    %367 = arith.addf %365, %366 : vector<8x512xf32>
    %cst_109 = arith.constant dense<0.000000e+00> : vector<8x512xf32>
    %368 = tpu.matmul %363, %1, %cst_109 {dimension_numbers = #tpu.dot_dimension_numbers<[1], [0], [0], [1], [0, 0, 1, 1], [], []>} : vector<8x128xbf16>, vector<128x512xbf16>, vector<8x512xf32> -> vector<8x512xf32>
    %369 = arith.addf %367, %368 : vector<8x512xf32>
    %370 = vector.extract_strided_slice %369 {offsets = [0, 0], sizes = [8, 384], strides = [1, 1]} : vector<8x512xf32> to vector<8x384xf32>
    %cst_110 = arith.constant 5.000000e-01 : f32
    %371 = vector.broadcast %cst_110 : f32 to vector<8x384xf32>
    %372 = arith.mulf %371, %370 : vector<8x384xf32>
    %373 = math.tanh %372 : vector<8x384xf32>
    %cst_111 = arith.constant 5.000000e-01 : f32
    %374 = vector.broadcast %cst_111 : f32 to vector<8x384xf32>
    %375 = arith.mulf %374, %373 : vector<8x384xf32>
    %cst_112 = arith.constant 5.000000e-01 : f32
    %376 = vector.broadcast %cst_112 : f32 to vector<8x384xf32>
    %377 = arith.addf %375, %376 : vector<8x384xf32>
    %378 = vector.extract_strided_slice %377 {offsets = [0, 0], sizes = [8, 128], strides = [1, 1]} : vector<8x384xf32> to vector<8x128xf32>
    %379 = vector.extract_strided_slice %377 {offsets = [0, 128], sizes = [8, 128], strides = [1, 1]} : vector<8x384xf32> to vector<8x128xf32>
    %380 = vector.extract_strided_slice %377 {offsets = [0, 256], sizes = [8, 128], strides = [1, 1]} : vector<8x384xf32> to vector<8x128xf32>
    %381 = vector.extract_strided_slice %369 {offsets = [0, 384], sizes = [8, 128], strides = [1, 1]} : vector<8x512xf32> to vector<8x128xf32>
    %382 = math.tanh %381 : vector<8x128xf32>
    %383 = arith.mulf %379, %354 : vector<8x128xf32>
    %384 = arith.mulf %378, %382 : vector<8x128xf32>
    %385 = arith.addf %383, %384 : vector<8x128xf32>
    %386 = math.tanh %385 : vector<8x128xf32>
    %387 = arith.mulf %380, %386 : vector<8x128xf32>
    %c3_113 = arith.constant 3 : index
    %c0_114 = arith.constant 0 : index
    %c0_115 = arith.constant 0 : index
    %388 = vector.load %arg5[%c3_113, %c0_114, %c0_115] : memref<7x8x128xf32, #tpu.memory_space<vmem>>, vector<1x8x128xf32>
    %389 = vector.shape_cast %388 : vector<1x8x128xf32> to vector<8x128xf32>
    %390 = vector.shape_cast %387 : vector<8x128xf32> to vector<1x8x128xf32>
    tpu.vector_store %arg5[%c3_113, %c0_114, %c0_115], %390 {strides = array<i32>} : memref<7x8x128xf32, #tpu.memory_space<vmem>>, vector<1x8x128xf32>,
    %391 = arith.truncf %387 : vector<8x128xf32> to vector<8x128xbf16>
    %392 = arith.extf %391 : vector<8x128xbf16> to vector<8x128xf32>
    %393 = arith.subf %387, %392 : vector<8x128xf32>
    %394 = arith.truncf %393 : vector<8x128xf32> to vector<8x128xbf16>
    %c13 = arith.constant 13 : index
    %c0_116 = arith.constant 0 : index
    %c0_117 = arith.constant 0 : index
    %395 = vector.load %arg6[%c13, %c0_116, %c0_117] : memref<16x8x512xf32, #tpu.memory_space<vmem>>, vector<1x8x512xf32>
    %396 = vector.shape_cast %395 : vector<1x8x512xf32> to vector<8x512xf32>
    %cst_118 = arith.constant dense<0.000000e+00> : vector<8x512xf32>
    %397 = tpu.matmul %391, %1, %cst_118 {dimension_numbers = #tpu.dot_dimension_numbers<[1], [0], [0], [1], [0, 0, 1, 1], [], []>} : vector<8x128xbf16>, vector<128x512xbf16>, vector<8x512xf32> -> vector<8x512xf32>
    %398 = arith.addf %396, %397 : vector<8x512xf32>
    %cst_119 = arith.constant dense<0.000000e+00> : vector<8x512xf32>
    %399 = tpu.matmul %394, %1, %cst_119 {dimension_numbers = #tpu.dot_dimension_numbers<[1], [0], [0], [1], [0, 0, 1, 1], [], []>} : vector<8x128xbf16>, vector<128x512xbf16>, vector<8x512xf32> -> vector<8x512xf32>
    %400 = arith.addf %398, %399 : vector<8x512xf32>
    %401 = vector.extract_strided_slice %400 {offsets = [0, 0], sizes = [8, 384], strides = [1, 1]} : vector<8x512xf32> to vector<8x384xf32>
    %cst_120 = arith.constant 5.000000e-01 : f32
    %402 = vector.broadcast %cst_120 : f32 to vector<8x384xf32>
    %403 = arith.mulf %402, %401 : vector<8x384xf32>
    %404 = math.tanh %403 : vector<8x384xf32>
    %cst_121 = arith.constant 5.000000e-01 : f32
    %405 = vector.broadcast %cst_121 : f32 to vector<8x384xf32>
    %406 = arith.mulf %405, %404 : vector<8x384xf32>
    %cst_122 = arith.constant 5.000000e-01 : f32
    %407 = vector.broadcast %cst_122 : f32 to vector<8x384xf32>
    %408 = arith.addf %406, %407 : vector<8x384xf32>
    %409 = vector.extract_strided_slice %408 {offsets = [0, 0], sizes = [8, 128], strides = [1, 1]} : vector<8x384xf32> to vector<8x128xf32>
    %410 = vector.extract_strided_slice %408 {offsets = [0, 128], sizes = [8, 128], strides = [1, 1]} : vector<8x384xf32> to vector<8x128xf32>
    %411 = vector.extract_strided_slice %408 {offsets = [0, 256], sizes = [8, 128], strides = [1, 1]} : vector<8x384xf32> to vector<8x128xf32>
    %412 = vector.extract_strided_slice %400 {offsets = [0, 384], sizes = [8, 128], strides = [1, 1]} : vector<8x512xf32> to vector<8x128xf32>
    %413 = math.tanh %412 : vector<8x128xf32>
    %414 = arith.mulf %410, %385 : vector<8x128xf32>
    %415 = arith.mulf %409, %413 : vector<8x128xf32>
    %416 = arith.addf %414, %415 : vector<8x128xf32>
    %417 = math.tanh %416 : vector<8x128xf32>
    %418 = arith.mulf %411, %417 : vector<8x128xf32>
    %c4_123 = arith.constant 4 : index
    %c0_124 = arith.constant 0 : index
    %c0_125 = arith.constant 0 : index
    %419 = vector.load %arg5[%c4_123, %c0_124, %c0_125] : memref<7x8x128xf32, #tpu.memory_space<vmem>>, vector<1x8x128xf32>
    %420 = vector.shape_cast %419 : vector<1x8x128xf32> to vector<8x128xf32>
    %421 = vector.shape_cast %418 : vector<8x128xf32> to vector<1x8x128xf32>
    tpu.vector_store %arg5[%c4_123, %c0_124, %c0_125], %421 {strides = array<i32>} : memref<7x8x128xf32, #tpu.memory_space<vmem>>, vector<1x8x128xf32>,
    %422 = arith.truncf %418 : vector<8x128xf32> to vector<8x128xbf16>
    %423 = arith.extf %422 : vector<8x128xbf16> to vector<8x128xf32>
    %424 = arith.subf %418, %423 : vector<8x128xf32>
    %425 = arith.truncf %424 : vector<8x128xf32> to vector<8x128xbf16>
    %c14 = arith.constant 14 : index
    %c0_126 = arith.constant 0 : index
    %c0_127 = arith.constant 0 : index
    %426 = vector.load %arg6[%c14, %c0_126, %c0_127] : memref<16x8x512xf32, #tpu.memory_space<vmem>>, vector<1x8x512xf32>
    %427 = vector.shape_cast %426 : vector<1x8x512xf32> to vector<8x512xf32>
    %cst_128 = arith.constant dense<0.000000e+00> : vector<8x512xf32>
    %428 = tpu.matmul %422, %1, %cst_128 {dimension_numbers = #tpu.dot_dimension_numbers<[1], [0], [0], [1], [0, 0, 1, 1], [], []>} : vector<8x128xbf16>, vector<128x512xbf16>, vector<8x512xf32> -> vector<8x512xf32>
    %429 = arith.addf %427, %428 : vector<8x512xf32>
    %cst_129 = arith.constant dense<0.000000e+00> : vector<8x512xf32>
    %430 = tpu.matmul %425, %1, %cst_129 {dimension_numbers = #tpu.dot_dimension_numbers<[1], [0], [0], [1], [0, 0, 1, 1], [], []>} : vector<8x128xbf16>, vector<128x512xbf16>, vector<8x512xf32> -> vector<8x512xf32>
    %431 = arith.addf %429, %430 : vector<8x512xf32>
    %432 = vector.extract_strided_slice %431 {offsets = [0, 0], sizes = [8, 384], strides = [1, 1]} : vector<8x512xf32> to vector<8x384xf32>
    %cst_130 = arith.constant 5.000000e-01 : f32
    %433 = vector.broadcast %cst_130 : f32 to vector<8x384xf32>
    %434 = arith.mulf %433, %432 : vector<8x384xf32>
    %435 = math.tanh %434 : vector<8x384xf32>
    %cst_131 = arith.constant 5.000000e-01 : f32
    %436 = vector.broadcast %cst_131 : f32 to vector<8x384xf32>
    %437 = arith.mulf %436, %435 : vector<8x384xf32>
    %cst_132 = arith.constant 5.000000e-01 : f32
    %438 = vector.broadcast %cst_132 : f32 to vector<8x384xf32>
    %439 = arith.addf %437, %438 : vector<8x384xf32>
    %440 = vector.extract_strided_slice %439 {offsets = [0, 0], sizes = [8, 128], strides = [1, 1]} : vector<8x384xf32> to vector<8x128xf32>
    %441 = vector.extract_strided_slice %439 {offsets = [0, 128], sizes = [8, 128], strides = [1, 1]} : vector<8x384xf32> to vector<8x128xf32>
    %442 = vector.extract_strided_slice %439 {offsets = [0, 256], sizes = [8, 128], strides = [1, 1]} : vector<8x384xf32> to vector<8x128xf32>
    %443 = vector.extract_strided_slice %431 {offsets = [0, 384], sizes = [8, 128], strides = [1, 1]} : vector<8x512xf32> to vector<8x128xf32>
    %444 = math.tanh %443 : vector<8x128xf32>
    %445 = arith.mulf %441, %416 : vector<8x128xf32>
    %446 = arith.mulf %440, %444 : vector<8x128xf32>
    %447 = arith.addf %445, %446 : vector<8x128xf32>
    %448 = math.tanh %447 : vector<8x128xf32>
    %449 = arith.mulf %442, %448 : vector<8x128xf32>
    %c5_133 = arith.constant 5 : index
    %c0_134 = arith.constant 0 : index
    %c0_135 = arith.constant 0 : index
    %450 = vector.load %arg5[%c5_133, %c0_134, %c0_135] : memref<7x8x128xf32, #tpu.memory_space<vmem>>, vector<1x8x128xf32>
    %451 = vector.shape_cast %450 : vector<1x8x128xf32> to vector<8x128xf32>
    %452 = vector.shape_cast %449 : vector<8x128xf32> to vector<1x8x128xf32>
    tpu.vector_store %arg5[%c5_133, %c0_134, %c0_135], %452 {strides = array<i32>} : memref<7x8x128xf32, #tpu.memory_space<vmem>>, vector<1x8x128xf32>,
    %453 = arith.truncf %449 : vector<8x128xf32> to vector<8x128xbf16>
    %454 = arith.extf %453 : vector<8x128xbf16> to vector<8x128xf32>
    %455 = arith.subf %449, %454 : vector<8x128xf32>
    %456 = arith.truncf %455 : vector<8x128xf32> to vector<8x128xbf16>
    %c15 = arith.constant 15 : index
    %c0_136 = arith.constant 0 : index
    %c0_137 = arith.constant 0 : index
    %457 = vector.load %arg6[%c15, %c0_136, %c0_137] : memref<16x8x512xf32, #tpu.memory_space<vmem>>, vector<1x8x512xf32>
    %458 = vector.shape_cast %457 : vector<1x8x512xf32> to vector<8x512xf32>
    %cst_138 = arith.constant dense<0.000000e+00> : vector<8x512xf32>
    %459 = tpu.matmul %453, %1, %cst_138 {dimension_numbers = #tpu.dot_dimension_numbers<[1], [0], [0], [1], [0, 0, 1, 1], [], []>} : vector<8x128xbf16>, vector<128x512xbf16>, vector<8x512xf32> -> vector<8x512xf32>
    %460 = arith.addf %458, %459 : vector<8x512xf32>
    %cst_139 = arith.constant dense<0.000000e+00> : vector<8x512xf32>
    %461 = tpu.matmul %456, %1, %cst_139 {dimension_numbers = #tpu.dot_dimension_numbers<[1], [0], [0], [1], [0, 0, 1, 1], [], []>} : vector<8x128xbf16>, vector<128x512xbf16>, vector<8x512xf32> -> vector<8x512xf32>
    %462 = arith.addf %460, %461 : vector<8x512xf32>
    %463 = vector.extract_strided_slice %462 {offsets = [0, 0], sizes = [8, 384], strides = [1, 1]} : vector<8x512xf32> to vector<8x384xf32>
    %cst_140 = arith.constant 5.000000e-01 : f32
    %464 = vector.broadcast %cst_140 : f32 to vector<8x384xf32>
    %465 = arith.mulf %464, %463 : vector<8x384xf32>
    %466 = math.tanh %465 : vector<8x384xf32>
    %cst_141 = arith.constant 5.000000e-01 : f32
    %467 = vector.broadcast %cst_141 : f32 to vector<8x384xf32>
    %468 = arith.mulf %467, %466 : vector<8x384xf32>
    %cst_142 = arith.constant 5.000000e-01 : f32
    %469 = vector.broadcast %cst_142 : f32 to vector<8x384xf32>
    %470 = arith.addf %468, %469 : vector<8x384xf32>
    %471 = vector.extract_strided_slice %470 {offsets = [0, 0], sizes = [8, 128], strides = [1, 1]} : vector<8x384xf32> to vector<8x128xf32>
    %472 = vector.extract_strided_slice %470 {offsets = [0, 128], sizes = [8, 128], strides = [1, 1]} : vector<8x384xf32> to vector<8x128xf32>
    %473 = vector.extract_strided_slice %470 {offsets = [0, 256], sizes = [8, 128], strides = [1, 1]} : vector<8x384xf32> to vector<8x128xf32>
    %474 = vector.extract_strided_slice %462 {offsets = [0, 384], sizes = [8, 128], strides = [1, 1]} : vector<8x512xf32> to vector<8x128xf32>
    %475 = math.tanh %474 : vector<8x128xf32>
    %476 = arith.mulf %472, %447 : vector<8x128xf32>
    %477 = arith.mulf %471, %475 : vector<8x128xf32>
    %478 = arith.addf %476, %477 : vector<8x128xf32>
    %479 = math.tanh %478 : vector<8x128xf32>
    %480 = arith.mulf %473, %479 : vector<8x128xf32>
    %c6_143 = arith.constant 6 : index
    %c0_144 = arith.constant 0 : index
    %c0_145 = arith.constant 0 : index
    %481 = vector.load %arg5[%c6_143, %c0_144, %c0_145] : memref<7x8x128xf32, #tpu.memory_space<vmem>>, vector<1x8x128xf32>
    %482 = vector.shape_cast %481 : vector<1x8x128xf32> to vector<8x128xf32>
    %483 = vector.shape_cast %480 : vector<8x128xf32> to vector<1x8x128xf32>
    tpu.vector_store %arg5[%c6_143, %c0_144, %c0_145], %483 {strides = array<i32>} : memref<7x8x128xf32, #tpu.memory_space<vmem>>, vector<1x8x128xf32>,
    return
  }
  func.func @transform_0(%arg0: i32) -> (i32, i32, i32) {
    %c0_i32 = arith.constant 0 : i32
    %c0_i32_0 = arith.constant 0 : i32
    %c0_i32_1 = arith.constant 0 : i32
    return %c0_i32, %arg0, %c0_i32_0 : i32, i32, i32
  }
  func.func @transform_1(%arg0: i32) -> (i32, i32) {
    %c0_i32 = arith.constant 0 : i32
    %c0_i32_0 = arith.constant 0 : i32
    %c0_i32_1 = arith.constant 0 : i32
    return %c0_i32, %c0_i32_0 : i32, i32
  }
  func.func @transform_2(%arg0: i32) -> (i32, i32) {
    %c0_i32 = arith.constant 0 : i32
    %c0_i32_0 = arith.constant 0 : i32
    %c0_i32_1 = arith.constant 0 : i32
    return %c0_i32, %c0_i32_0 : i32, i32
  }
  func.func @transform_3(%arg0: i32) -> (i32, i32) {
    %c0_i32 = arith.constant 0 : i32
    %c0_i32_0 = arith.constant 0 : i32
    %c0_i32_1 = arith.constant 0 : i32
    return %c0_i32, %c0_i32_0 : i32, i32
  }
  func.func @transform_4(%arg0: i32) -> (i32, i32, i32) {
    %c0_i32 = arith.constant 0 : i32
    %c0_i32_0 = arith.constant 0 : i32
    %c0_i32_1 = arith.constant 0 : i32
    return %c0_i32, %arg0, %c0_i32_0 : i32, i32, i32
  }
}

</mosaic_0001>

<bundles_post_ra>
// kernel: tpu_custom_call.1
= control target key start
LH: loop header
LB: loop body
LE: loop exit
PB: predicated region body
PF: predicated region fallthrough
CT: control target
= control target key end

     0   :  { %9 = vsyncpa [#allocation4], 0  ;;  %s5219_s0 = inlined_call_operand.vmem [shape: f32[16,8,1], index: 0, kind: input, shape index: {}]   ;;  %s5220_s1 = inlined_call_operand.vmem [shape: f32[1,512], index: 1, kind: input, shape index: {}]   ;;  %s5221_s2 = inlined_call_operand.hbm [shape: f32[128,512], index: 2, kind: input, shape index: {}]   ;;  %s5222_s3 = inlined_call_operand.vmem [shape: f32[1,512], index: 3, kind: input, shape index: {}]   ;;  %s5223_s4 = inlined_call_operand.hbm [shape: f32[7,8,128], index: 4, kind: output, shape index: {}]  }
   0x1   :  { %10 = vsyncpa [#allocation5], 0  ;;  %s3801_s15 = smov [#allocation3]  }
   0x2   :  { %s20_s16 = sshll.u32 %s3801_s15, 4  ;;  %s21_s16 = int_to_ptr.vmem [resolvable:$true] %s20_s16 }
   0x3   :  { %s3765_s17 = scalar_lea.vmem %s21_s16, 8192  ;;  %p3770_p1 = scmp.lt.s32.totalorder %s21_s16, %s21_s16 }
   0x4   :  { %p3766_p0 = scmp.ne.s32.totalorder %s21_s16, %s3765_s17  ;;  %p3771_p2 = scmp.lt.s32.totalorder %s3765_s17, %s3765_s17 }
   0x6   :  { %p3772_p3 = por %p3771_p2, %p3770_p1 }
   0x8   :  { %p3773_p4 = pnand %p3772_p3, %p3766_p0 }
   0xa   :  { %3776 = shalt.err (!%p3773_p4)
}
   0xb   :  { %s3802_s18 = smov 512   ;;  %s3803_s19 = smov 32  }
   0xc   :  { %26 = dma.hbm_to_vmem [thread:$0]  %s5221_s2, 8192, %s21_s16, [#allocation4], %s3802_s18, %s3802_s18, %s3803_s19  }
   0xd   :  { %3797 = dma.done.wait [#allocation4], 8192  }
   0xe   :  { %3798 = vsyncadd [#allocation4], 4294959104  ;;  %v5224_v0 = vmov 0   ;;  %v90_v1 = vld [vmem:[#allocation3 + $0x1c8] sm:$0xff]  ;;  %v92_v3 = vld [vmem:[#allocation3 + $0x1d8] sm:$0xff] }
   0xf   :  { %497 = vmatprep.mubr.bf16.mxu0 %v5224_v0  ;;  %538 = vmatprep.mubr.bf16.mxu1 %v5224_v0  ;;  %v94_v2 = vld [vmem:[#allocation3 + $0x1e8] sm:$0xff]  ;;  %v96_v5 = vld [vmem:[#allocation3 + $0x1f8] sm:$0xff]  ;;  %v89_v6 = vld [vmem:[#allocation3 + $0x1c0] sm:$0xff] }
  0x10   :  { %3595 = vset.pattern.permute.xlu0 %v5224_v0  ;;  %3596 = vset.pattern.permute.xlu1 %v5224_v0  ;;  %v3840_v4 = vpack.c.bf16 %v94_v2, %v90_v1  ;;  %v93_v7 = vld [vmem:[#allocation3 + $0x1e0] sm:$0xff]  ;;  %v3842_v8 = vpack.c.bf16 %v96_v5, %v92_v3  ;;  %v91_v10 = vld [vmem:[#allocation3 + $0x1d0] sm:$0xff]  ;;  %v82_v12 = vld [vmem:[#allocation3 + $0x188] sm:$0xff] }
  0x11   :  { %v3844_v9 = vpack.c.bf16 %v93_v7, %v89_v6  ;;  %v95_v11 = vld [vmem:[#allocation3 + $0x1f0] sm:$0xff]  ;;  %v86_v14 = vld [vmem:[#allocation3 + $0x1a8] sm:$0xff]  ;;  %v84_v15 = vld [vmem:[#allocation3 + $0x198] sm:$0xff] }
  0x12   :  { %465 = vmatprep.subr.bf16.mxu0 %v3840_v4  ;;  %v3847_v13 = vpack.c.bf16 %v95_v11, %v91_v10  ;;  %v88_v16 = vld [vmem:[#allocation3 + $0x1b8] sm:$0xff]  ;;  %506 = vmatprep.subr.bf16.mxu1 %v3842_v8  ;;  %v3851_v17 = vpack.c.bf16 %v86_v14, %v82_v12  ;;  %v81_v19 = vld [vmem:[#allocation3 + $0x180] sm:$0xff]  ;;  %v83_v21 = vld [vmem:[#allocation3 + $0x190] sm:$0xff] }
  0x13   :  { %466 = vmatpush1.bf16.msra.mxu0 %v3844_v9  ;;  %v3853_v18 = vpack.c.bf16 %v88_v16, %v84_v15  ;;  %v85_v20 = vld [vmem:[#allocation3 + $0x1a0] sm:$0xff]  ;;  %v87_v23 = vld [vmem:[#allocation3 + $0x1b0] sm:$0xff]  ;;  %v74_v24 = vld [vmem:[#allocation3 + $0x148] sm:$0xff] }
  0x14   :  { %507 = vmatpush1.bf16.msra.mxu1 %v3847_v13  ;;  %v3856_v22 = vpack.c.bf16 %v85_v20, %v81_v19  ;;  %v78_v25 = vld [vmem:[#allocation3 + $0x168] sm:$0xff]  ;;  %467 = vmatprep.subr.bf16.mxu0 %v3851_v17  ;;  %v3860_v26 = vpack.c.bf16 %v87_v23, %v83_v21  ;;  %v76_v28 = vld [vmem:[#allocation3 + $0x158] sm:$0xff]  ;;  %v73_v30 = vld [vmem:[#allocation3 + $0x140] sm:$0xff] }
  0x15   :  { %508 = vmatprep.subr.bf16.mxu1 %v3853_v18  ;;  %v3862_v27 = vpack.c.bf16 %v78_v25, %v74_v24  ;;  %v80_v29 = vld [vmem:[#allocation3 + $0x178] sm:$0xff]  ;;  %v77_v32 = vld [vmem:[#allocation3 + $0x160] sm:$0xff]  ;;  %v75_v33 = vld [vmem:[#allocation3 + $0x150] sm:$0xff] }
  0x16   :  { %v3864_v31 = vpack.c.bf16 %v80_v29, %v76_v28  ;;  %v79_v34 = vld [vmem:[#allocation3 + $0x170] sm:$0xff]  ;;  %v3867_v35 = vpack.c.bf16 %v77_v32, %v73_v30  ;;  %v66_v36 = vld [vmem:[#allocation3 + $0x108] sm:$0xff]  ;;  %v68_v38 = vld [vmem:[#allocation3 + $0x118] sm:$0xff] }
  0x17   :  { %468 = vmatpush1.bf16.msra.mxu0 %v3856_v22  ;;  %v70_v37 = vld [vmem:[#allocation3 + $0x128] sm:$0xff]  ;;  %v3871_v39 = vpack.c.bf16 %v79_v34, %v75_v33  ;;  %v72_v41 = vld [vmem:[#allocation3 + $0x138] sm:$0xff]  ;;  %v65_v42 = vld [vmem:[#allocation3 + $0x100] sm:$0xff] }
  0x18   :  { %509 = vmatpush1.bf16.msra.mxu1 %v3860_v26  ;;  %469 = vmatprep.subr.bf16.mxu0 %v3862_v27  ;;  %v3873_v40 = vpack.c.bf16 %v70_v37, %v66_v36  ;;  %v69_v43 = vld [vmem:[#allocation3 + $0x120] sm:$0xff]  ;;  %v3876_v44 = vpack.c.bf16 %v72_v41, %v68_v38  ;;  %v67_v45 = vld [vmem:[#allocation3 + $0x110] sm:$0xff]  ;;  %v58_v47 = vld [vmem:[#allocation3 + $0xc8] sm:$0xff] }
  0x19   :  { %510 = vmatprep.subr.bf16.mxu1 %v3864_v31  ;;  %v71_v46 = vld [vmem:[#allocation3 + $0x130] sm:$0xff]  ;;  %v62_v48 = vld [vmem:[#allocation3 + $0xe8] sm:$0xff]  ;;  %v60_v49 = vld [vmem:[#allocation3 + $0xd8] sm:$0xff]  ;;  %v3879_v51 = vpack.c.bf16 %v69_v43, %v65_v42 }
  0x1a   :  { %v64_v50 = vld [vmem:[#allocation3 + $0xf8] sm:$0xff]  ;;  %v3883_v52 = vpack.c.bf16 %v71_v46, %v67_v45  ;;  %v3885_v53 = vpack.c.bf16 %v62_v48, %v58_v47  ;;  %v57_v54 = vld [vmem:[#allocation3 + $0xc0] sm:$0xff]  ;;  %v59_v56 = vld [vmem:[#allocation3 + $0xd0] sm:$0xff] }
  0x1b   :  { %470 = vmatpush1.bf16.msra.mxu0 %v3867_v35  ;;  %v61_v55 = vld [vmem:[#allocation3 + $0xe0] sm:$0xff]  ;;  %v3888_v57 = vpack.c.bf16 %v64_v50, %v60_v49  ;;  %v63_v58 = vld [vmem:[#allocation3 + $0xf0] sm:$0xff]  ;;  %v50_v59 = vld [vmem:[#allocation3 + $0x88] sm:$0xff] }
  0x1c   :  { %511 = vmatpush1.bf16.msra.mxu1 %v3871_v39  ;;  %471 = vmatprep.subr.bf16.mxu0 %v3873_v40  ;;  %v54_v60 = vld [vmem:[#allocation3 + $0xa8] sm:$0xff]  ;;  %v52_v61 = vld [vmem:[#allocation3 + $0x98] sm:$0xff]  ;;  %v3891_v63 = vpack.c.bf16 %v61_v55, %v57_v54  ;;  %v3895_v1 = vpack.c.bf16 %v63_v58, %v59_v56  ;;  %v49_v3 = vld [vmem:[#allocation3 + $0x80] sm:$0xff] }
  0x1d   :  { %512 = vmatprep.subr.bf16.mxu1 %v3876_v44  ;;  %v56_v62 = vld [vmem:[#allocation3 + $0xb8] sm:$0xff]  ;;  %v3897_v2 = vpack.c.bf16 %v54_v60, %v50_v59  ;;  %v53_v5 = vld [vmem:[#allocation3 + $0xa0] sm:$0xff]  ;;  %v51_v6 = vld [vmem:[#allocation3 + $0x90] sm:$0xff]  ;;  %v227_v60 = vlaneseq }
  0x1e   :  { %v3900_v7 = vpack.c.bf16 %v56_v62, %v52_v61  ;;  %v55_v10 = vld [vmem:[#allocation3 + $0xb0] sm:$0xff]  ;;  %v42_v11 = vld [vmem:[#allocation3 + $0x48] sm:$0xff]  ;;  %v44_v14 = vld [vmem:[#allocation3 + $0x58] sm:$0xff]  ;;  %v3903_v16 = vpack.c.bf16 %v53_v5, %v49_v3 }
  0x1f   :  { %472 = vmatpush1.bf16.msra.mxu0 %v3879_v51  ;;  %v46_v12 = vld [vmem:[#allocation3 + $0x68] sm:$0xff]  ;;  %v48_v15 = vld [vmem:[#allocation3 + $0x78] sm:$0xff]  ;;  %v41_v19 = vld [vmem:[#allocation3 + $0x40] sm:$0xff]  ;;  %v3907_v20 = vpack.c.bf16 %v55_v10, %v51_v6  ;;  %v228_v61 = vshrl.u32 %v227_v60, 7 }
  0x20   :  { %513 = vmatpush1.bf16.msra.mxu1 %v3883_v52  ;;  %473 = vmatprep.subr.bf16.mxu0 %v3885_v53  ;;  %v3909_v21 = vpack.c.bf16 %v46_v12, %v42_v11  ;;  %v45_v23 = vld [vmem:[#allocation3 + $0x60] sm:$0xff]  ;;  %v43_v24 = vld [vmem:[#allocation3 + $0x50] sm:$0xff]  ;;  %v3915_v28 = vpack.c.bf16 %v48_v15, %v44_v14  ;;  %v34_v30 = vld [vmem:[#allocation3 + $0x8] sm:$0xff] }
  0x21   :  { %514 = vmatprep.subr.bf16.mxu1 %v3888_v57  ;;  %v129_v25 = vld [vmem:[%s5219_s0] sm:$0xff]  ;;  %v47_v29 = vld [vmem:[#allocation3 + $0x70] sm:$0xff]  ;;  %v38_v32 = vld [vmem:[#allocation3 + $0x28] sm:$0xff]  ;;  %v3921_v37 = vpack.c.bf16 %v45_v23, %v41_v19  ;;  %v229_v62 = vsub.s32 0, %v228_v61  ;;  %v233_v5 = vsub.s32 1, %v228_v61  ;;  %v241_v10 = vsub.s32 3, %v228_v61 }
  0x22   :  { %148 = vperm.xlu0 %3595, %v129_v25   ;;  %v36_v33 = vld [vmem:[#allocation3 + $0x18] sm:$0xff]  ;;  %v130_v36 = vld [vmem:[%s5219_s0 + $0x8] sm:$0xff]  ;;  %v3925_v38 = vpack.c.bf16 %v47_v29, %v43_v24  ;;  %v3927_v41 = vpack.c.bf16 %v38_v32, %v34_v30  ;;  %v33_v42 = vld [vmem:[#allocation3] sm:$0xff]  ;;  %v237_v24 = vsub.s32 2, %v228_v61 }
  0x23   :  { %474 = vmatpush1.bf16.msra.mxu0 %v3891_v63  ;;  %v40_v34 = vld [vmem:[#allocation3 + $0x38] sm:$0xff]  ;;  %v37_v43 = vld [vmem:[#allocation3 + $0x20] sm:$0xff]  ;;  %v35_v46 = vld [vmem:[#allocation3 + $0x10] sm:$0xff] }
  0x24   :  { %515 = vmatpush1.bf16.msra.mxu1 %v3895_v1  ;;  %475 = vmatprep.subr.bf16.mxu0 %v3897_v2  ;;  %v3930_v45 = vpack.c.bf16 %v40_v34, %v36_v33  ;;  %v39_v47 = vld [vmem:[#allocation3 + $0x30] sm:$0xff]  ;;  %v133_v48 = vld [vmem:[%s5219_s0 + $0x20] sm:$0xff]  ;;  %v3936_v49 = vpack.c.bf16 %v37_v43, %v33_v42 }
  0x25   :  { %516 = vmatprep.subr.bf16.mxu1 %v3900_v7  ;;  %v3940_v50 = vpack.c.bf16 %v39_v47, %v35_v46  ;;  %v135_v54 = vld [vmem:[%s5219_s0 + $0x30] sm:$0xff]  ;;  %v137_v55 = vld [vmem:[%s5219_s0 + $0x40] sm:$0xff] }
  0x26   :  { %153 = vperm.xlu0 %3595, %v130_v36   ;;  %v139_v56 = vld [vmem:[%s5219_s0 + $0x50] sm:$0xff]  ;;  %v141_v58 = vld [vmem:[%s5219_s0 + $0x60] sm:$0xff] }
  0x27   :  { %476 = vmatpush1.bf16.msra.mxu0 %v3903_v16  ;;  %v143_v59 = vld [vmem:[%s5219_s0 + $0x70] sm:$0xff]  ;;  %v145_v3 = vld [vmem:[%s5220_s1] sm:$0xf] }
  0x28   :  { %517 = vmatpush1.bf16.msra.mxu1 %v3907_v20  ;;  %477 = vmatprep.subr.bf16.mxu0 %v3909_v21  ;;  %v4001_v6 = vrot.slane %v145_v3, %v229_v62  ;;  %v311_v11 = vld [vmem:[%s5222_s3] sm:$0xf]  ;;  %v4006_v12 = vrot.slane %v145_v3, %v233_v5  ;;  %v4008_v15 = vrot.slane %v145_v3, %v241_v10 }
  0x29   :  { %518 = vmatprep.subr.bf16.mxu1 %v3915_v28  ;;  %v4011_v23 = vrot.slane %v311_v11, %v229_v62  ;;  %v4014_v29 = vrot.slane %v311_v11, %v233_v5  ;;  %v4018_v33 = vrot.slane %v311_v11, %v241_v10  ;;  %v4020_v34 = vrot.slane %v145_v3, %v237_v24 }
  0x2a   :  { %168 = vperm.xlu0 %3595, %v133_v48   ;;  %5233 = vst [vmem:[#allocation9_spill] sm:$0xff] %v4006_v12  ;;  %5234 = vst [vmem:[#allocation10_spill] sm:$0xff] %v4008_v15 }
  0x2b   :  { %478 = vmatpush1.bf16.msra.mxu0 %v3921_v37  ;;  %5235 = vst [vmem:[#allocation11_spill] sm:$0xff] %v4014_v29 }
  0x2c   :  { %519 = vmatpush1.bf16.msra.mxu1 %v3925_v38  ;;  %479 = vmatprep.subr.bf16.mxu0 %v3927_v41 }
  0x2d   :  { %520 = vmatprep.subr.bf16.mxu1 %v3930_v45 }
  0x2e   :  { %178 = vperm.xlu0 %3595, %v135_v54  }
  0x2f   :  { %480 = vmatpush1.bf16.msra.mxu0 %v3936_v49 }
  0x30   :  { %521 = vmatpush1.bf16.msra.mxu1 %v3940_v50  ;;  %582 = vmatprep.subr.bf16.mxu0 %v3840_v4 }
  0x31   :  { %623 = vmatprep.subr.bf16.mxu1 %v3842_v8 }
  0x32   :  { %498 = vmatmul.mubr.bf16.vlgmr.msra.gmra.mxu0 %v5224_v0  ;;  %188 = vperm.xlu0 %3595, %v137_v55  }
  0x33   :  { %539 = vmatmul.mubr.bf16.vlgmr.msra.gmra.mxu1 %v5224_v0  ;;  %583 = vmatpush1.bf16.msra.mxu0 %v3844_v9 }
  0x34   :  { %624 = vmatpush1.bf16.msra.mxu1 %v3847_v13  ;;  %584 = vmatprep.subr.bf16.mxu0 %v3851_v17 }
  0x35   :  { %625 = vmatprep.subr.bf16.mxu1 %v3853_v18  ;;  %614 = vmatprep.mubr.bf16.mxu0 %v5224_v0 }
  0x36   :  { %655 = vmatprep.mubr.bf16.mxu1 %v5224_v0  ;;  %198 = vperm.xlu0 %3595, %v139_v56   ;;  %v4025_v56 = vrot.slane %v311_v11, %v237_v24 }
  0x37   :  { %585 = vmatpush1.bf16.msra.mxu0 %v3856_v22 }
  0x38   :  { %626 = vmatpush1.bf16.msra.mxu1 %v3860_v26  ;;  %586 = vmatprep.subr.bf16.mxu0 %v3862_v27 }
  0x39   :  { %627 = vmatprep.subr.bf16.mxu1 %v3864_v31 }
  0x3a   :  { %208 = vperm.xlu0 %3595, %v141_v58  }
  0x3b   :  { %587 = vmatpush1.bf16.msra.mxu0 %v3867_v35 }
  0x3c   :  { %628 = vmatpush1.bf16.msra.mxu1 %v3871_v39  ;;  %588 = vmatprep.subr.bf16.mxu0 %v3873_v40 }
  0x3d   :  { %629 = vmatprep.subr.bf16.mxu1 %v3876_v44 }
  0x3e   :  { %218 = vperm.xlu0 %3595, %v143_v59  }
  0x3f   :  { %589 = vmatpush1.bf16.msra.mxu0 %v3879_v51 }
  0x40   :  { %630 = vmatpush1.bf16.msra.mxu1 %v3883_v52  ;;  %590 = vmatprep.subr.bf16.mxu0 %v3885_v53 }
  0x41   :  { %631 = vmatprep.subr.bf16.mxu1 %v3888_v57 }
  0x43   :  { %591 = vmatpush1.bf16.msra.mxu0 %v3891_v63 }
  0x44   :  { %632 = vmatpush1.bf16.msra.mxu1 %v3895_v1  ;;  %592 = vmatprep.subr.bf16.mxu0 %v3897_v2 }
  0x45   :  { %633 = vmatprep.subr.bf16.mxu1 %v3900_v7 }
  0x47   :  { %593 = vmatpush1.bf16.msra.mxu0 %v3903_v16 }
  0x48   :  { %634 = vmatpush1.bf16.msra.mxu1 %v3907_v20  ;;  %594 = vmatprep.subr.bf16.mxu0 %v3909_v21 }
  0x49   :  { %635 = vmatprep.subr.bf16.mxu1 %v3915_v28 }
  0x4b   :  { %595 = vmatpush1.bf16.msra.mxu0 %v3921_v37 }
  0x4c   :  { %636 = vmatpush1.bf16.msra.mxu1 %v3925_v38  ;;  %596 = vmatprep.subr.bf16.mxu0 %v3927_v41 }
  0x4d   :  { %637 = vmatprep.subr.bf16.mxu1 %v3930_v45 }
  0x4f   :  { %597 = vmatpush1.bf16.msra.mxu0 %v3936_v49 }
  0x50   :  { %638 = vmatpush1.bf16.msra.mxu1 %v3940_v50  ;;  %668 = vmatprep.subr.bf16.mxu0 %v3840_v4 }
  0x51   :  { %709 = vmatprep.subr.bf16.mxu1 %v3842_v8 }
  0x9d   :  { %v149_v14 = vpop.permute.xlu0 %148 }
  0x9e   :  { %v247_v19 = vmul.f32 %v4001_v6, %v149_v14  ;;  %v248_v25 = vmul.f32 %v4006_v12, %v149_v14  ;;  %v250_v32 = vmul.f32 %v4008_v15, %v149_v14  ;;  %v249_v55 = vmul.f32 %v4020_v34, %v149_v14 }
  0xa0   :  { %v333_v30 = vadd.f32 %v4011_v23, %v247_v19  ;;  %v334_v36 = vadd.f32 %v4014_v29, %v248_v25  ;;  %v336_v47 = vadd.f32 %v4018_v33, %v250_v32  ;;  %v335_v19 = vadd.f32 %v4025_v56, %v249_v55 }
  0xf2   :  { %v499_v42 = vpop.f32.mrf.mxu0 }
  0xf3   :  { %v547_v43 = vadd.f32 %v499_v42, %v333_v30  ;;  %v540_v46 = vpop.f32.mrf.mxu1 }
  0xf4   :  { %v501_v48 = vpop.f32.mrf.mxu0 }
  0xf5   :  { %v551_v54 = vadd.f32 %v547_v43, %v499_v42  ;;  %v548_v58 = vadd.f32 %v501_v48, %v334_v36  ;;  %v542_v59 = vpop.f32.mrf.mxu1  ;;  %v549_v42 = vadd.f32 %v540_v46, %v335_v19 }
  0xf6   :  { %v503_v60 = vpop.f32.mrf.mxu0  ;;  %v550_v3 = vadd.f32 %v542_v59, %v336_v47 }
  0xf7   :  { %v555_v61 = vmul.f32 0.5, %v551_v54  ;;  %v552_v62 = vadd.f32 %v548_v58, %v501_v48  ;;  %v544_v5 = vpop.f32.mrf.mxu1  ;;  %v553_v14 = vadd.f32 %v549_v42, %v540_v46  ;;  %v132_v42 = vld [vmem:[%s5219_s0 + $0x18] sm:$0xff] }
  0xf8   :  { %v504_v10 = vpop.f32.mrf.mxu0  ;;  %v554_v32 = vadd.f32 %v550_v3, %v542_v59 }
  0xf9   :  { %3597 = vtanh.f32 %v555_v61  ;;  %v556_v25 = vmul.f32 0.5, %v552_v62  ;;  %v545_v30 = vpop.f32.mrf.mxu1  ;;  %v557_v11 = vmul.f32 0.5, %v553_v14  ;;  %v134_v14 = vld [vmem:[%s5219_s0 + $0x28] sm:$0xff] }
  0xfb   :  { %3599 = vtanh.f32 %v556_v25 }
  0xfc   :  { %3601 = vtanh.f32 %v554_v32  ;;  %v131_v32 = vld [vmem:[%s5219_s0 + $0x10] sm:$0xff] }
  0xfd   :  { %3603 = vtanh.f32 %v557_v11  ;;  %158 = vperm.xlu1 %3596, %v131_v32   ;;  %v136_v11 = vld [vmem:[%s5219_s0 + $0x38] sm:$0xff] }
 0x101   :  { %163 = vperm.xlu1 %3596, %v132_v42  }
 0x105   :  { %173 = vperm.xlu1 %3596, %v134_v14  }
 0x106   :  { %v3598_v24 = vpop.eup %3597 }
 0x107   :  { %v561_v36 = vmul.f32 0.5, %v3598_v24  ;;  %v138_v24 = vld [vmem:[%s5219_s0 + $0x48] sm:$0xff] }
 0x108   :  { %v3600_v43 = vpop.eup %3599 }
 0x109   :  { %v564_v60 = vadd.f32 0.5, %v561_v36  ;;  %v562_v48 = vmul.f32 0.5, %v3600_v43  ;;  %v3602_v54 = vpop.eup %3601  ;;  %183 = vperm.xlu1 %3596, %v136_v11  }
 0x10a   :  { %v3604_v55 = vpop.eup %3603 }
 0x10b   :  { %v565_v47 = vadd.f32 0.5, %v562_v48  ;;  %v569_v61 = vmul.f32 %v3602_v54, %v564_v60  ;;  %v563_v59 = vmul.f32 0.5, %v3604_v55  ;;  %v140_v60 = vld [vmem:[%s5219_s0 + $0x58] sm:$0xff] }
 0x10d   :  { %v568_v58 = vmul.f32 0.0, %v565_v47  ;;  %v566_v62 = vadd.f32 0.5, %v563_v59  ;;  %193 = vperm.xlu1 %3596, %v138_v24  }
 0x10f   :  { %v4028_v5 = vadd.f32 %v569_v61, %v568_v58  ;;  %v142_v61 = vld [vmem:[%s5219_s0 + $0x68] sm:$0xff] }
 0x111   :  { %3605 = vtanh.f32 %v4028_v5  ;;  %203 = vperm.xlu1 %3596, %v140_v60  }
 0x115   :  { %213 = vperm.xlu1 %3596, %v142_v61  }
 0x11e   :  { %v3606_v3 = vpop.eup %3605 }
 0x11f   :  { %v572_v46 = vmul.f32 %v3606_v3, %v566_v62  ;;  %v144_v62 = vld [vmem:[%s5219_s0 + $0x78] sm:$0xff]  ;;  %v154_v3 = vpop.permute.xlu0 %153  ;;  %s3805_s0 = smov [#allocation6]  }
 0x120   :  { %223 = vperm.xlu1 %3596, %v144_v62   ;;  %v254_v32 = vmul.f32 %v4008_v15, %v154_v3  ;;  %s3576_s28 = sshll.u32 %s3805_s0, 4  ;;  %s3577_s28 = int_to_ptr.vmem [resolvable:$true] %s3576_s28 }
 0x121   :  { %v573_v10 = vpack.c.bf16 %v572_v46, %v572_v46  ;;  %s3777_s29 = scalar_lea.vmem %s3577_s28, 896  ;;  %p3782_p6 = scmp.lt.s32.totalorder %s3577_s28, %s3577_s28 }
 0x122   :  { %p3778_p5 = scmp.ne.s32.totalorder %s3577_s28, %s3777_s29  ;;  %p3783_p7 = scmp.lt.s32.totalorder %s3777_s29, %s3777_s29 }
 0x123   :  { %615 = vmatmul.mubr.bf16.vlgmr.msra.gmra.mxu0 %v573_v10  ;;  %656 = vmatmul.mubr.bf16.vlgmr.msra.gmra.mxu1 %v573_v10  ;;  %v574_v19 = vunpack.c.l.bf16 %v573_v10  ;;  %v252_v10 = vmul.f32 %v4006_v12, %v154_v3 }
 0x124   :  { %669 = vmatpush1.bf16.msra.mxu0 %v3844_v9  ;;  %710 = vmatpush1.bf16.msra.mxu1 %v3847_v13  ;;  %p3784_p8 = por %p3783_p7, %p3782_p6 }
 0x125   :  { %670 = vmatprep.subr.bf16.mxu0 %v3851_v17  ;;  %711 = vmatprep.subr.bf16.mxu1 %v3853_v18  ;;  %v575_v25 = vsub.f32 %v572_v46, %v574_v19  ;;  %v251_v46 = vmul.f32 %v4001_v6, %v154_v3 }
 0x126   :  { %700 = vmatprep.mubr.bf16.mxu0 %v5224_v0  ;;  %741 = vmatprep.mubr.bf16.mxu1 %v5224_v0  ;;  %p3785_p9 = pnand %p3784_p8, %p3778_p5 }
 0x127   :  { %v576_v30 = vpack.c.bf16 %v575_v25, %v575_v25  ;;  %v337_v19 = vadd.f32 %v4011_v23, %v251_v46 }
 0x128   :  { %671 = vmatpush1.bf16.msra.mxu0 %v3856_v22  ;;  %712 = vmatpush1.bf16.msra.mxu1 %v3860_v26 }
 0x129   :  { %672 = vmatprep.subr.bf16.mxu0 %v3862_v27  ;;  %713 = vmatprep.subr.bf16.mxu1 %v3864_v31 }
 0x12c   :  { %673 = vmatpush1.bf16.msra.mxu0 %v3867_v35  ;;  %714 = vmatpush1.bf16.msra.mxu1 %v3871_v39 }
 0x12d   :  { %674 = vmatprep.subr.bf16.mxu0 %v3873_v40  ;;  %715 = vmatprep.subr.bf16.mxu1 %v3876_v44 }
 0x130   :  { %675 = vmatpush1.bf16.msra.mxu0 %v3879_v51  ;;  %716 = vmatpush1.bf16.msra.mxu1 %v3883_v52 }
 0x131   :  { %676 = vmatprep.subr.bf16.mxu0 %v3885_v53  ;;  %717 = vmatprep.subr.bf16.mxu1 %v3888_v57 }
 0x134   :  { %677 = vmatpush1.bf16.msra.mxu0 %v3891_v63  ;;  %718 = vmatpush1.bf16.msra.mxu1 %v3895_v1 }
 0x135   :  { %678 = vmatprep.subr.bf16.mxu0 %v3897_v2  ;;  %719 = vmatprep.subr.bf16.mxu1 %v3900_v7 }
 0x138   :  { %679 = vmatpush1.bf16.msra.mxu0 %v3903_v16  ;;  %720 = vmatpush1.bf16.msra.mxu1 %v3907_v20 }
 0x139   :  { %680 = vmatprep.subr.bf16.mxu0 %v3909_v21  ;;  %721 = vmatprep.subr.bf16.mxu1 %v3915_v28 }
 0x13c   :  { %681 = vmatpush1.bf16.msra.mxu0 %v3921_v37  ;;  %722 = vmatpush1.bf16.msra.mxu1 %v3925_v38 }
 0x13d   :  { %682 = vmatprep.subr.bf16.mxu0 %v3927_v41  ;;  %723 = vmatprep.subr.bf16.mxu1 %v3930_v45 }
 0x140   :  { %683 = vmatpush1.bf16.msra.mxu0 %v3936_v49  ;;  %724 = vmatpush1.bf16.msra.mxu1 %v3940_v50 }
 0x141   :  { %781 = vmatprep.subr.bf16.mxu0 %v3840_v4  ;;  %822 = vmatprep.subr.bf16.mxu1 %v3842_v8 }
 0x143   :  { %701 = vmatmul.mubr.bf16.vlgmr.msra.gmra.mxu0 %v576_v30  ;;  %742 = vmatmul.mubr.bf16.vlgmr.msra.gmra.mxu1 %v576_v30  ;;  %v338_v30 = vadd.f32 %v4014_v29, %v252_v10 }
 0x144   :  { %782 = vmatpush1.bf16.msra.mxu0 %v3844_v9  ;;  %823 = vmatpush1.bf16.msra.mxu1 %v3847_v13 }
 0x145   :  { %783 = vmatprep.subr.bf16.mxu0 %v3851_v17  ;;  %824 = vmatprep.subr.bf16.mxu1 %v3853_v18 }
 0x146   :  { %813 = vmatprep.mubr.bf16.mxu0 %v5224_v0  ;;  %854 = vmatprep.mubr.bf16.mxu1 %v5224_v0  ;;  %v253_v0 = vmul.f32 %v4020_v34, %v154_v3 }
 0x148   :  { %784 = vmatpush1.bf16.msra.mxu0 %v3856_v22  ;;  %825 = vmatpush1.bf16.msra.mxu1 %v3860_v26 }
 0x149   :  { %785 = vmatprep.subr.bf16.mxu0 %v3862_v27  ;;  %826 = vmatprep.subr.bf16.mxu1 %v3864_v31 }
 0x14c   :  { %786 = vmatpush1.bf16.msra.mxu0 %v3867_v35  ;;  %827 = vmatpush1.bf16.msra.mxu1 %v3871_v39 }
 0x14d   :  { %787 = vmatprep.subr.bf16.mxu0 %v3873_v40  ;;  %828 = vmatprep.subr.bf16.mxu1 %v3876_v44 }
 0x150   :  { %788 = vmatpush1.bf16.msra.mxu0 %v3879_v51  ;;  %829 = vmatpush1.bf16.msra.mxu1 %v3883_v52 }
 0x151   :  { %789 = vmatprep.subr.bf16.mxu0 %v3885_v53  ;;  %830 = vmatprep.subr.bf16.mxu1 %v3888_v57 }
 0x154   :  { %790 = vmatpush1.bf16.msra.mxu0 %v3891_v63  ;;  %831 = vmatpush1.bf16.msra.mxu1 %v3895_v1 }
 0x155   :  { %791 = vmatprep.subr.bf16.mxu0 %v3897_v2  ;;  %832 = vmatprep.subr.bf16.mxu1 %v3900_v7 }
 0x158   :  { %792 = vmatpush1.bf16.msra.mxu0 %v3903_v16  ;;  %833 = vmatpush1.bf16.msra.mxu1 %v3907_v20 }
 0x159   :  { %793 = vmatprep.subr.bf16.mxu0 %v3909_v21  ;;  %834 = vmatprep.subr.bf16.mxu1 %v3915_v28 }
 0x15c   :  { %794 = vmatpush1.bf16.msra.mxu0 %v3921_v37  ;;  %835 = vmatpush1.bf16.msra.mxu1 %v3925_v38 }
 0x15d   :  { %795 = vmatprep.subr.bf16.mxu0 %v3927_v41  ;;  %836 = vmatprep.subr.bf16.mxu1 %v3930_v45 }
 0x160   :  { %796 = vmatpush1.bf16.msra.mxu0 %v3936_v49  ;;  %837 = vmatpush1.bf16.msra.mxu1 %v3940_v50 }
 0x161   :  { %867 = vmatprep.subr.bf16.mxu0 %v3840_v4  ;;  %908 = vmatprep.subr.bf16.mxu1 %v3842_v8 }
 0x1e3   :  { %v616_v36 = vpop.f32.mrf.mxu0  ;;  %v657_v43 = vpop.f32.mrf.mxu1 }
 0x1e4   :  { %v664_v25 = vadd.f32 %v616_v36, %v337_v19 }
 0x1e5   :  { %v618_v48 = vpop.f32.mrf.mxu0  ;;  %v659_v47 = vpop.f32.mrf.mxu1 }
 0x1e6   :  { %v665_v11 = vadd.f32 %v618_v48, %v338_v30  ;;  %v339_v48 = vadd.f32 %v4025_v56, %v253_v0 }
 0x1e7   :  { %v620_v54 = vpop.f32.mrf.mxu0  ;;  %v661_v58 = vpop.f32.mrf.mxu1 }
 0x1e8   :  { %v340_v58 = vadd.f32 %v4018_v33, %v254_v32 }
 0x1e9   :  { %v621_v55 = vpop.f32.mrf.mxu0  ;;  %v662_v59 = vpop.f32.mrf.mxu1 }
 0x1ea   :  { %v667_v46 = vadd.f32 %v659_v47, %v340_v58 }
 0x203   :  { %v702_v42 = vpop.f32.mrf.mxu0  ;;  %v743_v14 = vpop.f32.mrf.mxu1 }
 0x204   :  { %v750_v24 = vadd.f32 %v702_v42, %v664_v25  ;;  %v666_v25 = vadd.f32 %v657_v43, %v339_v48 }
 0x205   :  { %v704_v60 = vpop.f32.mrf.mxu0  ;;  %v745_v54 = vpop.f32.mrf.mxu1 }
 0x206   :  { %v754_v61 = vmul.f32 0.5, %v750_v24  ;;  %v751_v55 = vadd.f32 %v704_v60, %v665_v11  ;;  %v753_v15 = vadd.f32 %v745_v54, %v667_v46  ;;  %v752_v30 = vadd.f32 %v743_v14, %v666_v25 }
 0x207   :  { %v706_v59 = vpop.f32.mrf.mxu0  ;;  %v747_v62 = vpop.f32.mrf.mxu1 }
 0x208   :  { %3607 = vtanh.f32 %v754_v61  ;;  %v755_v36 = vmul.f32 0.5, %v751_v55  ;;  %v756_v42 = vmul.f32 0.5, %v752_v30 }
 0x209   :  { %v707_v10 = vpop.f32.mrf.mxu0  ;;  %v748_v19 = vpop.f32.mrf.mxu1 }
 0x20a   :  { %3609 = vtanh.f32 %v755_v36 }
 0x20b   :  { %3611 = vtanh.f32 %v753_v15 }
 0x20c   :  { %3613 = vtanh.f32 %v756_v42 }
 0x215   :  { %v3608_v32 = vpop.eup %3607 }
 0x216   :  { %v760_v24 = vmul.f32 0.5, %v3608_v32 }
 0x217   :  { %v3610_v11 = vpop.eup %3609 }
 0x218   :  { %v763_v60 = vadd.f32 0.5, %v760_v24  ;;  %v761_v59 = vmul.f32 0.5, %v3610_v11  ;;  %v3612_v47 = vpop.eup %3611 }
 0x219   :  { %v3614_v0 = vpop.eup %3613 }
 0x21a   :  { %v764_v3 = vadd.f32 0.5, %v761_v59  ;;  %v768_v61 = vmul.f32 %v3612_v47, %v763_v60  ;;  %v762_v43 = vmul.f32 0.5, %v3614_v0  ;;  %v159_v60 = vpop.permute.xlu1 %158 }
 0x21b   :  { %v255_v59 = vmul.f32 %v4001_v6, %v159_v60 }
 0x21c   :  { %v767_v58 = vmul.f32 %v764_v3, %v4028_v5  ;;  %v765_v15 = vadd.f32 0.5, %v762_v43  ;;  %v5236_v5 = vmov 0   ;;  %v256_v3 = vmul.f32 %v4006_v12, %v159_v60 }
 0x21d   :  { %v341_v47 = vadd.f32 %v4011_v23, %v255_v59 }
 0x21e   :  { %v4132_v55 = vadd.f32 %v768_v61, %v767_v58  ;;  %v342_v58 = vadd.f32 %v4014_v29, %v256_v3  ;;  %v5237_v61 = vld [vmem:[#allocation10_spill] sm:$0xff] }
 0x21f   :  { %v258_v0 = vmul.f32 %v5237_v61, %v159_v60 }
 0x220   :  { %3615 = vtanh.f32 %v4132_v55 }
 0x22d   :  { %v3616_v14 = vpop.eup %3615 }
 0x22e   :  { %v771_v54 = vmul.f32 %v3616_v14, %v765_v15 }
 0x230   :  { %v772_v62 = vpack.c.bf16 %v771_v54, %v771_v54 }
 0x232   :  { %814 = vmatmul.mubr.bf16.vlgmr.msra.gmra.mxu0 %v772_v62  ;;  %855 = vmatmul.mubr.bf16.vlgmr.msra.gmra.mxu1 %v772_v62  ;;  %v773_v46 = vunpack.c.l.bf16 %v772_v62  ;;  %v344_v62 = vadd.f32 %v4018_v33, %v258_v0 }
 0x233   :  { %868 = vmatpush1.bf16.msra.mxu0 %v3844_v9  ;;  %909 = vmatpush1.bf16.msra.mxu1 %v3847_v13 }
 0x234   :  { %869 = vmatprep.subr.bf16.mxu0 %v3851_v17  ;;  %910 = vmatprep.subr.bf16.mxu1 %v3853_v18  ;;  %v774_v36 = vsub.f32 %v771_v54, %v773_v46 }
 0x235   :  { %899 = vmatprep.mubr.bf16.mxu0 %v5236_v5  ;;  %940 = vmatprep.mubr.bf16.mxu1 %v5236_v5 }
 0x236   :  { %v775_v10 = vpack.c.bf16 %v774_v36, %v774_v36 }
 0x237   :  { %870 = vmatpush1.bf16.msra.mxu0 %v3856_v22  ;;  %911 = vmatpush1.bf16.msra.mxu1 %v3860_v26 }
 0x238   :  { %871 = vmatprep.subr.bf16.mxu0 %v3862_v27  ;;  %912 = vmatprep.subr.bf16.mxu1 %v3864_v31 }
 0x23b   :  { %872 = vmatpush1.bf16.msra.mxu0 %v3867_v35  ;;  %913 = vmatpush1.bf16.msra.mxu1 %v3871_v39 }
 0x23c   :  { %873 = vmatprep.subr.bf16.mxu0 %v3873_v40  ;;  %914 = vmatprep.subr.bf16.mxu1 %v3876_v44 }
 0x23f   :  { %874 = vmatpush1.bf16.msra.mxu0 %v3879_v51  ;;  %915 = vmatpush1.bf16.msra.mxu1 %v3883_v52 }
 0x240   :  { %875 = vmatprep.subr.bf16.mxu0 %v3885_v53  ;;  %916 = vmatprep.subr.bf16.mxu1 %v3888_v57 }
 0x243   :  { %876 = vmatpush1.bf16.msra.mxu0 %v3891_v63  ;;  %917 = vmatpush1.bf16.msra.mxu1 %v3895_v1 }
 0x244   :  { %877 = vmatprep.subr.bf16.mxu0 %v3897_v2  ;;  %918 = vmatprep.subr.bf16.mxu1 %v3900_v7 }
 0x247   :  { %878 = vmatpush1.bf16.msra.mxu0 %v3903_v16  ;;  %919 = vmatpush1.bf16.msra.mxu1 %v3907_v20 }
 0x248   :  { %879 = vmatprep.subr.bf16.mxu0 %v3909_v21  ;;  %920 = vmatprep.subr.bf16.mxu1 %v3915_v28 }
 0x24b   :  { %880 = vmatpush1.bf16.msra.mxu0 %v3921_v37  ;;  %921 = vmatpush1.bf16.msra.mxu1 %v3925_v38 }
 0x24c   :  { %881 = vmatprep.subr.bf16.mxu0 %v3927_v41  ;;  %922 = vmatprep.subr.bf16.mxu1 %v3930_v45 }
 0x24f   :  { %882 = vmatpush1.bf16.msra.mxu0 %v3936_v49  ;;  %923 = vmatpush1.bf16.msra.mxu1 %v3940_v50 }
 0x250   :  { %980 = vmatprep.subr.bf16.mxu0 %v3840_v4  ;;  %1021 = vmatprep.subr.bf16.mxu1 %v3842_v8 }
 0x252   :  { %900 = vmatmul.mubr.bf16.vlgmr.msra.gmra.mxu0 %v775_v10  ;;  %941 = vmatmul.mubr.bf16.vlgmr.msra.gmra.mxu1 %v775_v10 }
 0x253   :  { %981 = vmatpush1.bf16.msra.mxu0 %v3844_v9  ;;  %1022 = vmatpush1.bf16.msra.mxu1 %v3847_v13 }
 0x254   :  { %982 = vmatprep.subr.bf16.mxu0 %v3851_v17  ;;  %1023 = vmatprep.subr.bf16.mxu1 %v3853_v18 }
 0x255   :  { %1012 = vmatprep.mubr.bf16.mxu0 %v5236_v5  ;;  %1053 = vmatprep.mubr.bf16.mxu1 %v5236_v5 }
 0x257   :  { %983 = vmatpush1.bf16.msra.mxu0 %v3856_v22  ;;  %1024 = vmatpush1.bf16.msra.mxu1 %v3860_v26 }
 0x258   :  { %984 = vmatprep.subr.bf16.mxu0 %v3862_v27  ;;  %1025 = vmatprep.subr.bf16.mxu1 %v3864_v31 }
 0x25b   :  { %985 = vmatpush1.bf16.msra.mxu0 %v3867_v35  ;;  %1026 = vmatpush1.bf16.msra.mxu1 %v3871_v39 }
 0x25c   :  { %986 = vmatprep.subr.bf16.mxu0 %v3873_v40  ;;  %1027 = vmatprep.subr.bf16.mxu1 %v3876_v44 }
 0x25f   :  { %987 = vmatpush1.bf16.msra.mxu0 %v3879_v51  ;;  %1028 = vmatpush1.bf16.msra.mxu1 %v3883_v52 }
 0x260   :  { %988 = vmatprep.subr.bf16.mxu0 %v3885_v53  ;;  %1029 = vmatprep.subr.bf16.mxu1 %v3888_v57 }
 0x263   :  { %989 = vmatpush1.bf16.msra.mxu0 %v3891_v63  ;;  %1030 = vmatpush1.bf16.msra.mxu1 %v3895_v1 }
 0x264   :  { %990 = vmatprep.subr.bf16.mxu0 %v3897_v2  ;;  %1031 = vmatprep.subr.bf16.mxu1 %v3900_v7 }
 0x267   :  { %991 = vmatpush1.bf16.msra.mxu0 %v3903_v16  ;;  %1032 = vmatpush1.bf16.msra.mxu1 %v3907_v20 }
 0x268   :  { %992 = vmatprep.subr.bf16.mxu0 %v3909_v21  ;;  %1033 = vmatprep.subr.bf16.mxu1 %v3915_v28 }
 0x26b   :  { %993 = vmatpush1.bf16.msra.mxu0 %v3921_v37  ;;  %1034 = vmatpush1.bf16.msra.mxu1 %v3925_v38 }
 0x26c   :  { %994 = vmatprep.subr.bf16.mxu0 %v3927_v41  ;;  %1035 = vmatprep.subr.bf16.mxu1 %v3930_v45 }
 0x26f   :  { %995 = vmatpush1.bf16.msra.mxu0 %v3936_v49  ;;  %1036 = vmatpush1.bf16.msra.mxu1 %v3940_v50 }
 0x270   :  { %1066 = vmatprep.subr.bf16.mxu0 %v3840_v4  ;;  %1107 = vmatprep.subr.bf16.mxu1 %v3842_v8 }
 0x2f2   :  { %v815_v19 = vpop.f32.mrf.mxu0  ;;  %v856_v48 = vpop.f32.mrf.mxu1 }
 0x2f3   :  { %v863_v43 = vadd.f32 %v815_v19, %v341_v47 }
 0x2f4   :  { %v817_v25 = vpop.f32.mrf.mxu0  ;;  %v858_v30 = vpop.f32.mrf.mxu1 }
 0x2f5   :  { %v864_v54 = vadd.f32 %v817_v25, %v342_v58  ;;  %v866_v59 = vadd.f32 %v858_v30, %v344_v62 }
 0x2f6   :  { %v819_v42 = vpop.f32.mrf.mxu0  ;;  %v860_v32 = vpop.f32.mrf.mxu1 }
 0x2f7   :  { %v257_v42 = vmul.f32 %v4020_v34, %v159_v60 }
 0x2f8   :  { %v820_v24 = vpop.f32.mrf.mxu0  ;;  %v861_v11 = vpop.f32.mrf.mxu1 }
 0x2f9   :  { %v343_v19 = vadd.f32 %v4025_v56, %v257_v42 }
 0x2fb   :  { %v865_v47 = vadd.f32 %v856_v48, %v343_v19 }
 0x312   :  { %v901_v15 = vpop.f32.mrf.mxu0  ;;  %v942_v14 = vpop.f32.mrf.mxu1 }
 0x313   :  { %v949_v46 = vadd.f32 %v901_v15, %v863_v43  ;;  %v951_v58 = vadd.f32 %v942_v14, %v865_v47 }
 0x314   :  { %v903_v36 = vpop.f32.mrf.mxu0  ;;  %v944_v10 = vpop.f32.mrf.mxu1 }
 0x315   :  { %v953_v32 = vmul.f32 0.5, %v949_v46  ;;  %v950_v24 = vadd.f32 %v903_v36, %v864_v54  ;;  %v952_v25 = vadd.f32 %v944_v10, %v866_v59  ;;  %v955_v0 = vmul.f32 0.5, %v951_v58 }
 0x316   :  { %v905_v11 = vpop.f32.mrf.mxu0  ;;  %v946_v12 = vpop.f32.mrf.mxu1 }
 0x317   :  { %3617 = vtanh.f32 %v953_v32  ;;  %v954_v3 = vmul.f32 0.5, %v950_v24 }
 0x318   :  { %v906_v29 = vpop.f32.mrf.mxu0  ;;  %v947_v61 = vpop.f32.mrf.mxu1 }
 0x319   :  { %3619 = vtanh.f32 %v954_v3 }
 0x31a   :  { %3621 = vtanh.f32 %v952_v25 }
 0x31b   :  { %3623 = vtanh.f32 %v955_v0 }
 0x324   :  { %v3618_v43 = vpop.eup %3617 }
 0x325   :  { %v959_v15 = vmul.f32 0.5, %v3618_v43 }
 0x326   :  { %v3620_v60 = vpop.eup %3619 }
 0x327   :  { %v962_v46 = vadd.f32 0.5, %v959_v15  ;;  %v960_v54 = vmul.f32 0.5, %v3620_v60  ;;  %v3622_v30 = vpop.eup %3621  ;;  %v164_v15 = vpop.permute.xlu1 %163 }
 0x328   :  { %v3624_v36 = vpop.eup %3623  ;;  %v259_v60 = vmul.f32 %v4001_v6, %v164_v15 }
 0x329   :  { %v963_v12 = vadd.f32 0.5, %v960_v54  ;;  %v967_v29 = vmul.f32 %v3622_v30, %v962_v46  ;;  %v961_v48 = vmul.f32 0.5, %v3624_v36  ;;  %v5238_v46 = vld [vmem:[#allocation9_spill] sm:$0xff]  ;;  %v5240_v36 = vld [vmem:[#allocation10_spill] sm:$0xff] }
 0x32a   :  { %v260_v54 = vmul.f32 %v5238_v46, %v164_v15  ;;  %v261_v46 = vmul.f32 %v4020_v34, %v164_v15 }
 0x32b   :  { %v966_v62 = vmul.f32 %v963_v12, %v4132_v55  ;;  %v964_v10 = vadd.f32 0.5, %v961_v48  ;;  %v345_v12 = vadd.f32 %v4011_v23, %v259_v60  ;;  %v262_v48 = vmul.f32 %v5240_v36, %v164_v15 }
 0x32d   :  { %v4212_v61 = vadd.f32 %v967_v29, %v966_v62  ;;  %v5239_v62 = vld [vmem:[#allocation11_spill] sm:$0xff] }
 0x32e   :  { %v346_v29 = vadd.f32 %v5239_v62, %v260_v54 }
 0x32f   :  { %3625 = vtanh.f32 %v4212_v61 }
 0x33c   :  { %v3626_v14 = vpop.eup %3625 }
 0x33d   :  { %v970_v42 = vmul.f32 %v3626_v14, %v964_v10 }
 0x33f   :  { %v971_v32 = vpack.c.bf16 %v970_v42, %v970_v42 }
 0x341   :  { %1013 = vmatmul.mubr.bf16.vlgmr.msra.gmra.mxu0 %v971_v32  ;;  %1054 = vmatmul.mubr.bf16.vlgmr.msra.gmra.mxu1 %v971_v32  ;;  %v972_v55 = vunpack.c.l.bf16 %v971_v32 }
 0x342   :  { %1067 = vmatpush1.bf16.msra.mxu0 %v3844_v9  ;;  %1108 = vmatpush1.bf16.msra.mxu1 %v3847_v13 }
 0x343   :  { %1068 = vmatprep.subr.bf16.mxu0 %v3851_v17  ;;  %1109 = vmatprep.subr.bf16.mxu1 %v3853_v18  ;;  %v973_v24 = vsub.f32 %v970_v42, %v972_v55 }
 0x344   :  { %1098 = vmatprep.mubr.bf16.mxu0 %v5236_v5  ;;  %1139 = vmatprep.mubr.bf16.mxu1 %v5236_v5 }
 0x345   :  { %v974_v11 = vpack.c.bf16 %v973_v24, %v973_v24 }
 0x346   :  { %1069 = vmatpush1.bf16.msra.mxu0 %v3856_v22  ;;  %1110 = vmatpush1.bf16.msra.mxu1 %v3860_v26 }
 0x347   :  { %1070 = vmatprep.subr.bf16.mxu0 %v3862_v27  ;;  %1111 = vmatprep.subr.bf16.mxu1 %v3864_v31 }
 0x34a   :  { %1071 = vmatpush1.bf16.msra.mxu0 %v3867_v35  ;;  %1112 = vmatpush1.bf16.msra.mxu1 %v3871_v39 }
 0x34b   :  { %1072 = vmatprep.subr.bf16.mxu0 %v3873_v40  ;;  %1113 = vmatprep.subr.bf16.mxu1 %v3876_v44 }
 0x34e   :  { %1073 = vmatpush1.bf16.msra.mxu0 %v3879_v51  ;;  %1114 = vmatpush1.bf16.msra.mxu1 %v3883_v52 }
 0x34f   :  { %1074 = vmatprep.subr.bf16.mxu0 %v3885_v53  ;;  %1115 = vmatprep.subr.bf16.mxu1 %v3888_v57 }
 0x352   :  { %1075 = vmatpush1.bf16.msra.mxu0 %v3891_v63  ;;  %1116 = vmatpush1.bf16.msra.mxu1 %v3895_v1 }
 0x353   :  { %1076 = vmatprep.subr.bf16.mxu0 %v3897_v2  ;;  %1117 = vmatprep.subr.bf16.mxu1 %v3900_v7 }
 0x356   :  { %1077 = vmatpush1.bf16.msra.mxu0 %v3903_v16  ;;  %1118 = vmatpush1.bf16.msra.mxu1 %v3907_v20 }
 0x357   :  { %1078 = vmatprep.subr.bf16.mxu0 %v3909_v21  ;;  %1119 = vmatprep.subr.bf16.mxu1 %v3915_v28 }
 0x35a   :  { %1079 = vmatpush1.bf16.msra.mxu0 %v3921_v37  ;;  %1120 = vmatpush1.bf16.msra.mxu1 %v3925_v38 }
 0x35b   :  { %1080 = vmatprep.subr.bf16.mxu0 %v3927_v41  ;;  %1121 = vmatprep.subr.bf16.mxu1 %v3930_v45 }
 0x35e   :  { %1081 = vmatpush1.bf16.msra.mxu0 %v3936_v49  ;;  %1122 = vmatpush1.bf16.msra.mxu1 %v3940_v50 }
 0x35f   :  { %1179 = vmatprep.subr.bf16.mxu0 %v3840_v4  ;;  %1220 = vmatprep.subr.bf16.mxu1 %v3842_v8 }
 0x361   :  { %1099 = vmatmul.mubr.bf16.vlgmr.msra.gmra.mxu0 %v974_v11  ;;  %1140 = vmatmul.mubr.bf16.vlgmr.msra.gmra.mxu1 %v974_v11  ;;  %v348_v11 = vadd.f32 %v4018_v33, %v262_v48 }
 0x362   :  { %1180 = vmatpush1.bf16.msra.mxu0 %v3844_v9  ;;  %1221 = vmatpush1.bf16.msra.mxu1 %v3847_v13 }
 0x363   :  { %1181 = vmatprep.subr.bf16.mxu0 %v3851_v17  ;;  %1222 = vmatprep.subr.bf16.mxu1 %v3853_v18 }
 0x364   :  { %1211 = vmatprep.mubr.bf16.mxu0 %v5236_v5  ;;  %1252 = vmatprep.mubr.bf16.mxu1 %v5236_v5 }
 0x366   :  { %1182 = vmatpush1.bf16.msra.mxu0 %v3856_v22  ;;  %1223 = vmatpush1.bf16.msra.mxu1 %v3860_v26 }
 0x367   :  { %1183 = vmatprep.subr.bf16.mxu0 %v3862_v27  ;;  %1224 = vmatprep.subr.bf16.mxu1 %v3864_v31 }
 0x36a   :  { %1184 = vmatpush1.bf16.msra.mxu0 %v3867_v35  ;;  %1225 = vmatpush1.bf16.msra.mxu1 %v3871_v39 }
 0x36b   :  { %1185 = vmatprep.subr.bf16.mxu0 %v3873_v40  ;;  %1226 = vmatprep.subr.bf16.mxu1 %v3876_v44 }
 0x36e   :  { %1186 = vmatpush1.bf16.msra.mxu0 %v3879_v51  ;;  %1227 = vmatpush1.bf16.msra.mxu1 %v3883_v52 }
 0x36f   :  { %1187 = vmatprep.subr.bf16.mxu0 %v3885_v53  ;;  %1228 = vmatprep.subr.bf16.mxu1 %v3888_v57 }
 0x372   :  { %1188 = vmatpush1.bf16.msra.mxu0 %v3891_v63  ;;  %1229 = vmatpush1.bf16.msra.mxu1 %v3895_v1 }
 0x373   :  { %1189 = vmatprep.subr.bf16.mxu0 %v3897_v2  ;;  %1230 = vmatprep.subr.bf16.mxu1 %v3900_v7 }
 0x376   :  { %1190 = vmatpush1.bf16.msra.mxu0 %v3903_v16  ;;  %1231 = vmatpush1.bf16.msra.mxu1 %v3907_v20 }
 0x377   :  { %1191 = vmatprep.subr.bf16.mxu0 %v3909_v21  ;;  %1232 = vmatprep.subr.bf16.mxu1 %v3915_v28 }
 0x37a   :  { %1192 = vmatpush1.bf16.msra.mxu0 %v3921_v37  ;;  %1233 = vmatpush1.bf16.msra.mxu1 %v3925_v38 }
 0x37b   :  { %1193 = vmatprep.subr.bf16.mxu0 %v3927_v41  ;;  %1234 = vmatprep.subr.bf16.mxu1 %v3930_v45 }
 0x37e   :  { %1194 = vmatpush1.bf16.msra.mxu0 %v3936_v49  ;;  %1235 = vmatpush1.bf16.msra.mxu1 %v3940_v50 }
 0x37f   :  { %1265 = vmatprep.subr.bf16.mxu0 %v3840_v4  ;;  %1306 = vmatprep.subr.bf16.mxu1 %v3842_v8 }
 0x401   :  { %v1014_v59 = vpop.f32.mrf.mxu0  ;;  %v1055_v3 = vpop.f32.mrf.mxu1 }
 0x402   :  { %v1062_v30 = vadd.f32 %v1014_v59, %v345_v12 }
 0x403   :  { %v1016_v19 = vpop.f32.mrf.mxu0  ;;  %v1057_v25 = vpop.f32.mrf.mxu1 }
 0x404   :  { %v1063_v42 = vadd.f32 %v1016_v19, %v346_v29  ;;  %v1065_v60 = vadd.f32 %v1057_v25, %v348_v11  ;;  %v347_v19 = vadd.f32 %v4025_v56, %v261_v46 }
 0x405   :  { %v1018_v47 = vpop.f32.mrf.mxu0  ;;  %v1059_v58 = vpop.f32.mrf.mxu1 }
 0x407   :  { %v1019_v0 = vpop.f32.mrf.mxu0  ;;  %v1060_v43 = vpop.f32.mrf.mxu1 }
 0x421   :  { %v1100_v10 = vpop.f32.mrf.mxu0  ;;  %v1141_v14 = vpop.f32.mrf.mxu1 }
 0x422   :  { %v1148_v32 = vadd.f32 %v1100_v10, %v1062_v30  ;;  %v1064_v30 = vadd.f32 %v1055_v3, %v347_v19 }
 0x423   :  { %v1102_v55 = vpop.f32.mrf.mxu0  ;;  %v1143_v24 = vpop.f32.mrf.mxu1 }
 0x424   :  { %v1152_v47 = vmul.f32 0.5, %v1148_v32  ;;  %v1149_v58 = vadd.f32 %v1102_v55, %v1063_v42  ;;  %v1151_v36 = vadd.f32 %v1143_v24, %v1065_v60  ;;  %v1150_v29 = vadd.f32 %v1141_v14, %v1064_v30 }
 0x425   :  { %v1104_v0 = vpop.f32.mrf.mxu0  ;;  %v1145_v43 = vpop.f32.mrf.mxu1 }
 0x426   :  { %3627 = vtanh.f32 %v1152_v47  ;;  %v1153_v59 = vmul.f32 0.5, %v1149_v58  ;;  %v1154_v10 = vmul.f32 0.5, %v1150_v29 }
 0x427   :  { %v1105_v54 = vpop.f32.mrf.mxu0  ;;  %v1146_v12 = vpop.f32.mrf.mxu1 }
 0x428   :  { %3629 = vtanh.f32 %v1153_v59 }
 0x429   :  { %3631 = vtanh.f32 %v1151_v36 }
 0x42a   :  { %3633 = vtanh.f32 %v1154_v10 }
 0x433   :  { %v3628_v48 = vpop.eup %3627 }
 0x434   :  { %v1158_v32 = vmul.f32 0.5, %v3628_v48 }
 0x435   :  { %v3630_v42 = vpop.eup %3629 }
 0x436   :  { %v1161_v55 = vadd.f32 0.5, %v1158_v32  ;;  %v1159_v0 = vmul.f32 0.5, %v3630_v42  ;;  %v3632_v25 = vpop.eup %3631  ;;  %v169_v42 = vpop.permute.xlu0 %168 }
 0x437   :  { %v3634_v46 = vpop.eup %3633 }
 0x438   :  { %v1162_v15 = vadd.f32 0.5, %v1159_v0  ;;  %v1166_v47 = vmul.f32 %v3632_v25, %v1161_v55  ;;  %v1160_v3 = vmul.f32 0.5, %v3634_v46  ;;  %v263_v55 = vmul.f32 %v4001_v6, %v169_v42  ;;  %v5241_v0 = vld [vmem:[#allocation9_spill] sm:$0xff]  ;;  %v5242_v46 = vld [vmem:[#allocation10_spill] sm:$0xff] }
 0x43a   :  { %v1165_v11 = vmul.f32 %v1162_v15, %v4212_v61  ;;  %v1163_v36 = vadd.f32 0.5, %v1160_v3  ;;  %v264_v15 = vmul.f32 %v5241_v0, %v169_v42  ;;  %v349_v25 = vadd.f32 %v4011_v23, %v263_v55 }
 0x43b   :  { %v266_v3 = vmul.f32 %v5242_v46, %v169_v42  ;;  %v265_v0 = vmul.f32 %v4020_v34, %v169_v42 }
 0x43c   :  { %v4292_v58 = vadd.f32 %v1166_v47, %v1165_v11  ;;  %v350_v47 = vadd.f32 %v5239_v62, %v264_v15 }
 0x43e   :  { %3635 = vtanh.f32 %v4292_v58 }
 0x44b   :  { %v3636_v14 = vpop.eup %3635 }
 0x44c   :  { %v1169_v24 = vmul.f32 %v3636_v14, %v1163_v36 }
 0x44e   :  { %v1170_v43 = vpack.c.bf16 %v1169_v24, %v1169_v24 }
 0x450   :  { %1212 = vmatmul.mubr.bf16.vlgmr.msra.gmra.mxu0 %v1170_v43  ;;  %1253 = vmatmul.mubr.bf16.vlgmr.msra.gmra.mxu1 %v1170_v43  ;;  %v1171_v61 = vunpack.c.l.bf16 %v1170_v43 }
 0x451   :  { %1266 = vmatpush1.bf16.msra.mxu0 %v3844_v9  ;;  %1307 = vmatpush1.bf16.msra.mxu1 %v3847_v13 }
 0x452   :  { %1267 = vmatprep.subr.bf16.mxu0 %v3851_v17  ;;  %1308 = vmatprep.subr.bf16.mxu1 %v3853_v18  ;;  %v1172_v60 = vsub.f32 %v1169_v24, %v1171_v61 }
 0x453   :  { %1297 = vmatprep.mubr.bf16.mxu0 %v5236_v5  ;;  %1338 = vmatprep.mubr.bf16.mxu1 %v5236_v5 }
 0x454   :  { %v1173_v59 = vpack.c.bf16 %v1172_v60, %v1172_v60 }
 0x455   :  { %1268 = vmatpush1.bf16.msra.mxu0 %v3856_v22  ;;  %1309 = vmatpush1.bf16.msra.mxu1 %v3860_v26 }
 0x456   :  { %1269 = vmatprep.subr.bf16.mxu0 %v3862_v27  ;;  %1310 = vmatprep.subr.bf16.mxu1 %v3864_v31 }
 0x459   :  { %1270 = vmatpush1.bf16.msra.mxu0 %v3867_v35  ;;  %1311 = vmatpush1.bf16.msra.mxu1 %v3871_v39 }
 0x45a   :  { %1271 = vmatprep.subr.bf16.mxu0 %v3873_v40  ;;  %1312 = vmatprep.subr.bf16.mxu1 %v3876_v44 }
 0x45d   :  { %1272 = vmatpush1.bf16.msra.mxu0 %v3879_v51  ;;  %1313 = vmatpush1.bf16.msra.mxu1 %v3883_v52 }
 0x45e   :  { %1273 = vmatprep.subr.bf16.mxu0 %v3885_v53  ;;  %1314 = vmatprep.subr.bf16.mxu1 %v3888_v57 }
 0x461   :  { %1274 = vmatpush1.bf16.msra.mxu0 %v3891_v63  ;;  %1315 = vmatpush1.bf16.msra.mxu1 %v3895_v1 }
 0x462   :  { %1275 = vmatprep.subr.bf16.mxu0 %v3897_v2  ;;  %1316 = vmatprep.subr.bf16.mxu1 %v3900_v7 }
 0x465   :  { %1276 = vmatpush1.bf16.msra.mxu0 %v3903_v16  ;;  %1317 = vmatpush1.bf16.msra.mxu1 %v3907_v20 }
 0x466   :  { %1277 = vmatprep.subr.bf16.mxu0 %v3909_v21  ;;  %1318 = vmatprep.subr.bf16.mxu1 %v3915_v28 }
 0x469   :  { %1278 = vmatpush1.bf16.msra.mxu0 %v3921_v37  ;;  %1319 = vmatpush1.bf16.msra.mxu1 %v3925_v38 }
 0x46a   :  { %1279 = vmatprep.subr.bf16.mxu0 %v3927_v41  ;;  %1320 = vmatprep.subr.bf16.mxu1 %v3930_v45 }
 0x46d   :  { %1280 = vmatpush1.bf16.msra.mxu0 %v3936_v49  ;;  %1321 = vmatpush1.bf16.msra.mxu1 %v3940_v50 }
 0x46e   :  { %1378 = vmatprep.subr.bf16.mxu0 %v3840_v4  ;;  %1419 = vmatprep.subr.bf16.mxu1 %v3842_v8 }
 0x470   :  { %1298 = vmatmul.mubr.bf16.vlgmr.msra.gmra.mxu0 %v1173_v59  ;;  %1339 = vmatmul.mubr.bf16.vlgmr.msra.gmra.mxu1 %v1173_v59  ;;  %v352_v59 = vadd.f32 %v4018_v33, %v266_v3 }
 0x471   :  { %1379 = vmatpush1.bf16.msra.mxu0 %v3844_v9  ;;  %1420 = vmatpush1.bf16.msra.mxu1 %v3847_v13 }
 0x472   :  { %1380 = vmatprep.subr.bf16.mxu0 %v3851_v17  ;;  %1421 = vmatprep.subr.bf16.mxu1 %v3853_v18 }
 0x473   :  { %1410 = vmatprep.mubr.bf16.mxu0 %v5236_v5  ;;  %1451 = vmatprep.mubr.bf16.mxu1 %v5236_v5 }
 0x475   :  { %1381 = vmatpush1.bf16.msra.mxu0 %v3856_v22  ;;  %1422 = vmatpush1.bf16.msra.mxu1 %v3860_v26 }
 0x476   :  { %1382 = vmatprep.subr.bf16.mxu0 %v3862_v27  ;;  %1423 = vmatprep.subr.bf16.mxu1 %v3864_v31 }
 0x479   :  { %1383 = vmatpush1.bf16.msra.mxu0 %v3867_v35  ;;  %1424 = vmatpush1.bf16.msra.mxu1 %v3871_v39 }
 0x47a   :  { %1384 = vmatprep.subr.bf16.mxu0 %v3873_v40  ;;  %1425 = vmatprep.subr.bf16.mxu1 %v3876_v44 }
 0x47d   :  { %1385 = vmatpush1.bf16.msra.mxu0 %v3879_v51  ;;  %1426 = vmatpush1.bf16.msra.mxu1 %v3883_v52 }
 0x47e   :  { %1386 = vmatprep.subr.bf16.mxu0 %v3885_v53  ;;  %1427 = vmatprep.subr.bf16.mxu1 %v3888_v57 }
 0x481   :  { %1387 = vmatpush1.bf16.msra.mxu0 %v3891_v63  ;;  %1428 = vmatpush1.bf16.msra.mxu1 %v3895_v1 }
 0x482   :  { %1388 = vmatprep.subr.bf16.mxu0 %v3897_v2  ;;  %1429 = vmatprep.subr.bf16.mxu1 %v3900_v7 }
 0x485   :  { %1389 = vmatpush1.bf16.msra.mxu0 %v3903_v16  ;;  %1430 = vmatpush1.bf16.msra.mxu1 %v3907_v20 }
 0x486   :  { %1390 = vmatprep.subr.bf16.mxu0 %v3909_v21  ;;  %1431 = vmatprep.subr.bf16.mxu1 %v3915_v28 }
 0x489   :  { %1391 = vmatpush1.bf16.msra.mxu0 %v3921_v37  ;;  %1432 = vmatpush1.bf16.msra.mxu1 %v3925_v38 }
 0x48a   :  { %1392 = vmatprep.subr.bf16.mxu0 %v3927_v41  ;;  %1433 = vmatprep.subr.bf16.mxu1 %v3930_v45 }
 0x48d   :  { %1393 = vmatpush1.bf16.msra.mxu0 %v3936_v49  ;;  %1434 = vmatpush1.bf16.msra.mxu1 %v3940_v50 }
 0x48e   :  { %1464 = vmatprep.subr.bf16.mxu0 %v3840_v4  ;;  %1505 = vmatprep.subr.bf16.mxu1 %v3842_v8 }
 0x510   :  { %v1213_v54 = vpop.f32.mrf.mxu0  ;;  %v1254_v12 = vpop.f32.mrf.mxu1 }
 0x511   :  { %v1261_v11 = vadd.f32 %v1213_v54, %v349_v25 }
 0x512   :  { %v1215_v19 = vpop.f32.mrf.mxu0  ;;  %v1256_v30 = vpop.f32.mrf.mxu1 }
 0x513   :  { %v1262_v24 = vadd.f32 %v1215_v19, %v350_v47  ;;  %v1264_v55 = vadd.f32 %v1256_v30, %v352_v59  ;;  %v351_v19 = vadd.f32 %v4025_v56, %v265_v0 }
 0x514   :  { %v1217_v29 = vpop.f32.mrf.mxu0  ;;  %v1258_v10 = vpop.f32.mrf.mxu1 }
 0x516   :  { %v1218_v48 = vpop.f32.mrf.mxu0  ;;  %v1259_v32 = vpop.f32.mrf.mxu1 }
 0x530   :  { %v1299_v36 = vpop.f32.mrf.mxu0  ;;  %v1340_v14 = vpop.f32.mrf.mxu1 }
 0x531   :  { %v1347_v43 = vadd.f32 %v1299_v36, %v1261_v11  ;;  %v1263_v11 = vadd.f32 %v1254_v12, %v351_v19 }
 0x532   :  { %v1301_v61 = vpop.f32.mrf.mxu0  ;;  %v1342_v60 = vpop.f32.mrf.mxu1 }
 0x533   :  { %v1351_v29 = vmul.f32 0.5, %v1347_v43  ;;  %v1348_v10 = vadd.f32 %v1301_v61, %v1262_v24  ;;  %v1350_v46 = vadd.f32 %v1342_v60, %v1264_v55  ;;  %v1349_v47 = vadd.f32 %v1340_v14, %v1263_v11 }
 0x534   :  { %v1303_v48 = vpop.f32.mrf.mxu0  ;;  %v1344_v32 = vpop.f32.mrf.mxu1 }
 0x535   :  { %3637 = vtanh.f32 %v1351_v29  ;;  %v1352_v54 = vmul.f32 0.5, %v1348_v10  ;;  %v1353_v36 = vmul.f32 0.5, %v1349_v47 }
 0x536   :  { %v1304_v15 = vpop.f32.mrf.mxu0  ;;  %v1345_v25 = vpop.f32.mrf.mxu1 }
 0x537   :  { %3639 = vtanh.f32 %v1352_v54 }
 0x538   :  { %3641 = vtanh.f32 %v1350_v46 }
 0x539   :  { %3643 = vtanh.f32 %v1353_v36 }
 0x542   :  { %v3638_v3 = vpop.eup %3637 }
 0x543   :  { %v1357_v43 = vmul.f32 0.5, %v3638_v3 }
 0x544   :  { %v3640_v24 = vpop.eup %3639 }
 0x545   :  { %v1360_v61 = vadd.f32 0.5, %v1357_v43  ;;  %v1358_v48 = vmul.f32 0.5, %v3640_v24  ;;  %v3642_v30 = vpop.eup %3641  ;;  %v174_v24 = vpop.permute.xlu1 %173 }
 0x546   :  { %v3644_v0 = vpop.eup %3643 }
 0x547   :  { %v1361_v42 = vadd.f32 0.5, %v1358_v48  ;;  %v1365_v29 = vmul.f32 %v3642_v30, %v1360_v61  ;;  %v1359_v12 = vmul.f32 0.5, %v3644_v0  ;;  %v267_v61 = vmul.f32 %v4001_v6, %v174_v24  ;;  %v5243_v48 = vld [vmem:[#allocation9_spill] sm:$0xff]  ;;  %v5244_v0 = vld [vmem:[#allocation10_spill] sm:$0xff] }
 0x549   :  { %v1364_v59 = vmul.f32 %v1361_v42, %v4292_v58  ;;  %v1362_v46 = vadd.f32 0.5, %v1359_v12  ;;  %v268_v42 = vmul.f32 %v5243_v48, %v174_v24  ;;  %v353_v30 = vadd.f32 %v4011_v23, %v267_v61 }
 0x54a   :  { %v270_v12 = vmul.f32 %v5244_v0, %v174_v24  ;;  %v269_v48 = vmul.f32 %v4020_v34, %v174_v24 }
 0x54b   :  { %v4372_v10 = vadd.f32 %v1365_v29, %v1364_v59  ;;  %v354_v29 = vadd.f32 %v5239_v62, %v268_v42 }
 0x54d   :  { %3645 = vtanh.f32 %v4372_v10 }
 0x55a   :  { %v3646_v14 = vpop.eup %3645 }
 0x55b   :  { %v1368_v60 = vmul.f32 %v3646_v14, %v1362_v46 }
 0x55d   :  { %v1369_v32 = vpack.c.bf16 %v1368_v60, %v1368_v60 }
 0x55f   :  { %1411 = vmatmul.mubr.bf16.vlgmr.msra.gmra.mxu0 %v1369_v32  ;;  %1452 = vmatmul.mubr.bf16.vlgmr.msra.gmra.mxu1 %v1369_v32  ;;  %v1370_v58 = vunpack.c.l.bf16 %v1369_v32 }
 0x560   :  { %1465 = vmatpush1.bf16.msra.mxu0 %v3844_v9  ;;  %1506 = vmatpush1.bf16.msra.mxu1 %v3847_v13 }
 0x561   :  { %1466 = vmatprep.subr.bf16.mxu0 %v3851_v17  ;;  %1507 = vmatprep.subr.bf16.mxu1 %v3853_v18  ;;  %v1371_v55 = vsub.f32 %v1368_v60, %v1370_v58 }
 0x562   :  { %1496 = vmatprep.mubr.bf16.mxu0 %v5236_v5  ;;  %1537 = vmatprep.mubr.bf16.mxu1 %v5236_v5 }
 0x563   :  { %v1372_v54 = vpack.c.bf16 %v1371_v55, %v1371_v55 }
 0x564   :  { %1467 = vmatpush1.bf16.msra.mxu0 %v3856_v22  ;;  %1508 = vmatpush1.bf16.msra.mxu1 %v3860_v26 }
 0x565   :  { %1468 = vmatprep.subr.bf16.mxu0 %v3862_v27  ;;  %1509 = vmatprep.subr.bf16.mxu1 %v3864_v31 }
 0x568   :  { %1469 = vmatpush1.bf16.msra.mxu0 %v3867_v35  ;;  %1510 = vmatpush1.bf16.msra.mxu1 %v3871_v39 }
 0x569   :  { %1470 = vmatprep.subr.bf16.mxu0 %v3873_v40  ;;  %1511 = vmatprep.subr.bf16.mxu1 %v3876_v44 }
 0x56c   :  { %1471 = vmatpush1.bf16.msra.mxu0 %v3879_v51  ;;  %1512 = vmatpush1.bf16.msra.mxu1 %v3883_v52 }
 0x56d   :  { %1472 = vmatprep.subr.bf16.mxu0 %v3885_v53  ;;  %1513 = vmatprep.subr.bf16.mxu1 %v3888_v57 }
 0x570   :  { %1473 = vmatpush1.bf16.msra.mxu0 %v3891_v63  ;;  %1514 = vmatpush1.bf16.msra.mxu1 %v3895_v1 }
 0x571   :  { %1474 = vmatprep.subr.bf16.mxu0 %v3897_v2  ;;  %1515 = vmatprep.subr.bf16.mxu1 %v3900_v7 }
 0x574   :  { %1475 = vmatpush1.bf16.msra.mxu0 %v3903_v16  ;;  %1516 = vmatpush1.bf16.msra.mxu1 %v3907_v20 }
 0x575   :  { %1476 = vmatprep.subr.bf16.mxu0 %v3909_v21  ;;  %1517 = vmatprep.subr.bf16.mxu1 %v3915_v28 }
 0x578   :  { %1477 = vmatpush1.bf16.msra.mxu0 %v3921_v37  ;;  %1518 = vmatpush1.bf16.msra.mxu1 %v3925_v38 }
 0x579   :  { %1478 = vmatprep.subr.bf16.mxu0 %v3927_v41  ;;  %1519 = vmatprep.subr.bf16.mxu1 %v3930_v45 }
 0x57c   :  { %1479 = vmatpush1.bf16.msra.mxu0 %v3936_v49  ;;  %1520 = vmatpush1.bf16.msra.mxu1 %v3940_v50 }
 0x57d   :  { %1577 = vmatprep.subr.bf16.mxu0 %v3840_v4  ;;  %1618 = vmatprep.subr.bf16.mxu1 %v3842_v8 }
 0x57f   :  { %1497 = vmatmul.mubr.bf16.vlgmr.msra.gmra.mxu0 %v1372_v54  ;;  %1538 = vmatmul.mubr.bf16.vlgmr.msra.gmra.mxu1 %v1372_v54  ;;  %v356_v54 = vadd.f32 %v4018_v33, %v270_v12 }
 0x580   :  { %1578 = vmatpush1.bf16.msra.mxu0 %v3844_v9  ;;  %1619 = vmatpush1.bf16.msra.mxu1 %v3847_v13 }
 0x581   :  { %1579 = vmatprep.subr.bf16.mxu0 %v3851_v17  ;;  %1620 = vmatprep.subr.bf16.mxu1 %v3853_v18 }
 0x582   :  { %1609 = vmatprep.mubr.bf16.mxu0 %v5236_v5  ;;  %1650 = vmatprep.mubr.bf16.mxu1 %v5236_v5 }
 0x584   :  { %1580 = vmatpush1.bf16.msra.mxu0 %v3856_v22  ;;  %1621 = vmatpush1.bf16.msra.mxu1 %v3860_v26 }
 0x585   :  { %1581 = vmatprep.subr.bf16.mxu0 %v3862_v27  ;;  %1622 = vmatprep.subr.bf16.mxu1 %v3864_v31 }
 0x588   :  { %1582 = vmatpush1.bf16.msra.mxu0 %v3867_v35  ;;  %1623 = vmatpush1.bf16.msra.mxu1 %v3871_v39 }
 0x589   :  { %1583 = vmatprep.subr.bf16.mxu0 %v3873_v40  ;;  %1624 = vmatprep.subr.bf16.mxu1 %v3876_v44 }
 0x58c   :  { %1584 = vmatpush1.bf16.msra.mxu0 %v3879_v51  ;;  %1625 = vmatpush1.bf16.msra.mxu1 %v3883_v52 }
 0x58d   :  { %1585 = vmatprep.subr.bf16.mxu0 %v3885_v53  ;;  %1626 = vmatprep.subr.bf16.mxu1 %v3888_v57 }
 0x590   :  { %1586 = vmatpush1.bf16.msra.mxu0 %v3891_v63  ;;  %1627 = vmatpush1.bf16.msra.mxu1 %v3895_v1 }
 0x591   :  { %1587 = vmatprep.subr.bf16.mxu0 %v3897_v2  ;;  %1628 = vmatprep.subr.bf16.mxu1 %v3900_v7 }
 0x594   :  { %1588 = vmatpush1.bf16.msra.mxu0 %v3903_v16  ;;  %1629 = vmatpush1.bf16.msra.mxu1 %v3907_v20 }
 0x595   :  { %1589 = vmatprep.subr.bf16.mxu0 %v3909_v21  ;;  %1630 = vmatprep.subr.bf16.mxu1 %v3915_v28 }
 0x598   :  { %1590 = vmatpush1.bf16.msra.mxu0 %v3921_v37  ;;  %1631 = vmatpush1.bf16.msra.mxu1 %v3925_v38 }
 0x599   :  { %1591 = vmatprep.subr.bf16.mxu0 %v3927_v41  ;;  %1632 = vmatprep.subr.bf16.mxu1 %v3930_v45 }
 0x59c   :  { %1592 = vmatpush1.bf16.msra.mxu0 %v3936_v49  ;;  %1633 = vmatpush1.bf16.msra.mxu1 %v3940_v50 }
 0x59d   :  { %1663 = vmatprep.subr.bf16.mxu0 %v3840_v4  ;;  %1704 = vmatprep.subr.bf16.mxu1 %v3842_v8 }
 0x61f   :  { %v1412_v15 = vpop.f32.mrf.mxu0  ;;  %v1453_v25 = vpop.f32.mrf.mxu1 }
 0x620   :  { %v1460_v59 = vadd.f32 %v1412_v15, %v353_v30 }
 0x621   :  { %v1414_v19 = vpop.f32.mrf.mxu0  ;;  %v1455_v11 = vpop.f32.mrf.mxu1 }
 0x622   :  { %v1461_v60 = vadd.f32 %v1414_v19, %v354_v29  ;;  %v1463_v61 = vadd.f32 %v1455_v11, %v356_v54  ;;  %v355_v19 = vadd.f32 %v4025_v56, %v269_v48 }
 0x623   :  { %v1416_v47 = vpop.f32.mrf.mxu0  ;;  %v1457_v36 = vpop.f32.mrf.mxu1 }
 0x625   :  { %v1417_v3 = vpop.f32.mrf.mxu0  ;;  %v1458_v43 = vpop.f32.mrf.mxu1 }
 0x63f   :  { %v1498_v46 = vpop.f32.mrf.mxu0  ;;  %v1539_v14 = vpop.f32.mrf.mxu1 }
 0x640   :  { %v1546_v32 = vadd.f32 %v1498_v46, %v1460_v59  ;;  %v1462_v59 = vadd.f32 %v1453_v25, %v355_v19 }
 0x641   :  { %v1500_v58 = vpop.f32.mrf.mxu0  ;;  %v1541_v55 = vpop.f32.mrf.mxu1 }
 0x642   :  { %v1550_v47 = vmul.f32 0.5, %v1546_v32  ;;  %v1547_v36 = vadd.f32 %v1500_v58, %v1461_v60  ;;  %v1549_v0 = vadd.f32 %v1541_v55, %v1463_v61  ;;  %v1548_v29 = vadd.f32 %v1539_v14, %v1462_v59 }
 0x643   :  { %v1502_v3 = vpop.f32.mrf.mxu0  ;;  %v1543_v43 = vpop.f32.mrf.mxu1 }
 0x644   :  { %3647 = vtanh.f32 %v1550_v47  ;;  %v1551_v15 = vmul.f32 0.5, %v1547_v36  ;;  %v1552_v46 = vmul.f32 0.5, %v1548_v29 }
 0x645   :  { %v1503_v42 = vpop.f32.mrf.mxu0  ;;  %v1544_v30 = vpop.f32.mrf.mxu1 }
 0x646   :  { %3649 = vtanh.f32 %v1551_v15 }
 0x647   :  { %3651 = vtanh.f32 %v1549_v0 }
 0x648   :  { %3653 = vtanh.f32 %v1552_v46 }
 0x651   :  { %v3648_v12 = vpop.eup %3647 }
 0x652   :  { %v1556_v32 = vmul.f32 0.5, %v3648_v12 }
 0x653   :  { %v3650_v60 = vpop.eup %3649 }
 0x654   :  { %v1559_v58 = vadd.f32 0.5, %v1556_v32  ;;  %v1557_v3 = vmul.f32 0.5, %v3650_v60  ;;  %v3652_v11 = vpop.eup %3651  ;;  %v179_v60 = vpop.permute.xlu0 %178 }
 0x655   :  { %v3654_v48 = vpop.eup %3653 }
 0x656   :  { %v1560_v24 = vadd.f32 0.5, %v1557_v3  ;;  %v1564_v47 = vmul.f32 %v3652_v11, %v1559_v58  ;;  %v1558_v25 = vmul.f32 0.5, %v3654_v48  ;;  %v271_v58 = vmul.f32 %v4001_v6, %v179_v60  ;;  %v5245_v3 = vld [vmem:[#allocation9_spill] sm:$0xff]  ;;  %v5246_v48 = vld [vmem:[#allocation10_spill] sm:$0xff] }
 0x658   :  { %v1563_v54 = vmul.f32 %v1560_v24, %v4372_v10  ;;  %v1561_v0 = vadd.f32 0.5, %v1558_v25  ;;  %v272_v24 = vmul.f32 %v5245_v3, %v179_v60  ;;  %v357_v11 = vadd.f32 %v4011_v23, %v271_v58 }
 0x659   :  { %v274_v25 = vmul.f32 %v5246_v48, %v179_v60  ;;  %v273_v3 = vmul.f32 %v4020_v34, %v179_v60 }
 0x65a   :  { %v4452_v36 = vadd.f32 %v1564_v47, %v1563_v54  ;;  %v358_v47 = vadd.f32 %v5239_v62, %v272_v24 }
 0x65c   :  { %3655 = vtanh.f32 %v4452_v36 }
 0x669   :  { %v3656_v14 = vpop.eup %3655 }
 0x66a   :  { %v1567_v55 = vmul.f32 %v3656_v14, %v1561_v0 }
 0x66c   :  { %v1568_v43 = vpack.c.bf16 %v1567_v55, %v1567_v55 }
 0x66e   :  { %1610 = vmatmul.mubr.bf16.vlgmr.msra.gmra.mxu0 %v1568_v43  ;;  %1651 = vmatmul.mubr.bf16.vlgmr.msra.gmra.mxu1 %v1568_v43  ;;  %v1569_v10 = vunpack.c.l.bf16 %v1568_v43 }
 0x66f   :  { %1664 = vmatpush1.bf16.msra.mxu0 %v3844_v9  ;;  %1705 = vmatpush1.bf16.msra.mxu1 %v3847_v13 }
 0x670   :  { %1665 = vmatprep.subr.bf16.mxu0 %v3851_v17  ;;  %1706 = vmatprep.subr.bf16.mxu1 %v3853_v18  ;;  %v1570_v61 = vsub.f32 %v1567_v55, %v1569_v10 }
 0x671   :  { %1695 = vmatprep.mubr.bf16.mxu0 %v5236_v5  ;;  %1736 = vmatprep.mubr.bf16.mxu1 %v5236_v5 }
 0x672   :  { %v1571_v15 = vpack.c.bf16 %v1570_v61, %v1570_v61 }
 0x673   :  { %1666 = vmatpush1.bf16.msra.mxu0 %v3856_v22  ;;  %1707 = vmatpush1.bf16.msra.mxu1 %v3860_v26 }
 0x674   :  { %1667 = vmatprep.subr.bf16.mxu0 %v3862_v27  ;;  %1708 = vmatprep.subr.bf16.mxu1 %v3864_v31 }
 0x677   :  { %1668 = vmatpush1.bf16.msra.mxu0 %v3867_v35  ;;  %1709 = vmatpush1.bf16.msra.mxu1 %v3871_v39 }
 0x678   :  { %1669 = vmatprep.subr.bf16.mxu0 %v3873_v40  ;;  %1710 = vmatprep.subr.bf16.mxu1 %v3876_v44 }
 0x67b   :  { %1670 = vmatpush1.bf16.msra.mxu0 %v3879_v51  ;;  %1711 = vmatpush1.bf16.msra.mxu1 %v3883_v52 }
 0x67c   :  { %1671 = vmatprep.subr.bf16.mxu0 %v3885_v53  ;;  %1712 = vmatprep.subr.bf16.mxu1 %v3888_v57 }
 0x67f   :  { %1672 = vmatpush1.bf16.msra.mxu0 %v3891_v63  ;;  %1713 = vmatpush1.bf16.msra.mxu1 %v3895_v1 }
 0x680   :  { %1673 = vmatprep.subr.bf16.mxu0 %v3897_v2  ;;  %1714 = vmatprep.subr.bf16.mxu1 %v3900_v7 }
 0x683   :  { %1674 = vmatpush1.bf16.msra.mxu0 %v3903_v16  ;;  %1715 = vmatpush1.bf16.msra.mxu1 %v3907_v20 }
 0x684   :  { %1675 = vmatprep.subr.bf16.mxu0 %v3909_v21  ;;  %1716 = vmatprep.subr.bf16.mxu1 %v3915_v28 }
 0x687   :  { %1676 = vmatpush1.bf16.msra.mxu0 %v3921_v37  ;;  %1717 = vmatpush1.bf16.msra.mxu1 %v3925_v38 }
 0x688   :  { %1677 = vmatprep.subr.bf16.mxu0 %v3927_v41  ;;  %1718 = vmatprep.subr.bf16.mxu1 %v3930_v45 }
 0x68b   :  { %1678 = vmatpush1.bf16.msra.mxu0 %v3936_v49  ;;  %1719 = vmatpush1.bf16.msra.mxu1 %v3940_v50 }
 0x68c   :  { %1776 = vmatprep.subr.bf16.mxu0 %v3840_v4  ;;  %1817 = vmatprep.subr.bf16.mxu1 %v3842_v8 }
 0x68e   :  { %1696 = vmatmul.mubr.bf16.vlgmr.msra.gmra.mxu0 %v1571_v15  ;;  %1737 = vmatmul.mubr.bf16.vlgmr.msra.gmra.mxu1 %v1571_v15  ;;  %v360_v15 = vadd.f32 %v4018_v33, %v274_v25 }
 0x68f   :  { %1777 = vmatpush1.bf16.msra.mxu0 %v3844_v9  ;;  %1818 = vmatpush1.bf16.msra.mxu1 %v3847_v13 }
 0x690   :  { %1778 = vmatprep.subr.bf16.mxu0 %v3851_v17  ;;  %1819 = vmatprep.subr.bf16.mxu1 %v3853_v18 }
 0x691   :  { %1808 = vmatprep.mubr.bf16.mxu0 %v5236_v5  ;;  %1849 = vmatprep.mubr.bf16.mxu1 %v5236_v5 }
 0x693   :  { %1779 = vmatpush1.bf16.msra.mxu0 %v3856_v22  ;;  %1820 = vmatpush1.bf16.msra.mxu1 %v3860_v26 }
 0x694   :  { %1780 = vmatprep.subr.bf16.mxu0 %v3862_v27  ;;  %1821 = vmatprep.subr.bf16.mxu1 %v3864_v31 }
 0x697   :  { %1781 = vmatpush1.bf16.msra.mxu0 %v3867_v35  ;;  %1822 = vmatpush1.bf16.msra.mxu1 %v3871_v39 }
 0x698   :  { %1782 = vmatprep.subr.bf16.mxu0 %v3873_v40  ;;  %1823 = vmatprep.subr.bf16.mxu1 %v3876_v44 }
 0x69b   :  { %1783 = vmatpush1.bf16.msra.mxu0 %v3879_v51  ;;  %1824 = vmatpush1.bf16.msra.mxu1 %v3883_v52 }
 0x69c   :  { %1784 = vmatprep.subr.bf16.mxu0 %v3885_v53  ;;  %1825 = vmatprep.subr.bf16.mxu1 %v3888_v57 }
 0x69f   :  { %1785 = vmatpush1.bf16.msra.mxu0 %v3891_v63  ;;  %1826 = vmatpush1.bf16.msra.mxu1 %v3895_v1 }
 0x6a0   :  { %1786 = vmatprep.subr.bf16.mxu0 %v3897_v2  ;;  %1827 = vmatprep.subr.bf16.mxu1 %v3900_v7 }
 0x6a3   :  { %1787 = vmatpush1.bf16.msra.mxu0 %v3903_v16  ;;  %1828 = vmatpush1.bf16.msra.mxu1 %v3907_v20 }
 0x6a4   :  { %1788 = vmatprep.subr.bf16.mxu0 %v3909_v21  ;;  %1829 = vmatprep.subr.bf16.mxu1 %v3915_v28 }
 0x6a7   :  { %1789 = vmatpush1.bf16.msra.mxu0 %v3921_v37  ;;  %1830 = vmatpush1.bf16.msra.mxu1 %v3925_v38 }
 0x6a8   :  { %1790 = vmatprep.subr.bf16.mxu0 %v3927_v41  ;;  %1831 = vmatprep.subr.bf16.mxu1 %v3930_v45 }
 0x6ab   :  { %1791 = vmatpush1.bf16.msra.mxu0 %v3936_v49  ;;  %1832 = vmatpush1.bf16.msra.mxu1 %v3940_v50 }
 0x6ac   :  { %1862 = vmatprep.subr.bf16.mxu0 %v3840_v4  ;;  %1903 = vmatprep.subr.bf16.mxu1 %v3842_v8 }
 0x72e   :  { %v1611_v42 = vpop.f32.mrf.mxu0  ;;  %v1652_v30 = vpop.f32.mrf.mxu1 }
 0x72f   :  { %v1659_v54 = vadd.f32 %v1611_v42, %v357_v11 }
 0x730   :  { %v1613_v19 = vpop.f32.mrf.mxu0  ;;  %v1654_v59 = vpop.f32.mrf.mxu1 }
 0x731   :  { %v1660_v55 = vadd.f32 %v1613_v19, %v358_v47  ;;  %v1662_v58 = vadd.f32 %v1654_v59, %v360_v15  ;;  %v359_v19 = vadd.f32 %v4025_v56, %v273_v3 }
 0x732   :  { %v1615_v29 = vpop.f32.mrf.mxu0  ;;  %v1656_v46 = vpop.f32.mrf.mxu1 }
 0x734   :  { %v1616_v12 = vpop.f32.mrf.mxu0  ;;  %v1657_v32 = vpop.f32.mrf.mxu1 }
 0x74e   :  { %v1697_v0 = vpop.f32.mrf.mxu0  ;;  %v1738_v14 = vpop.f32.mrf.mxu1 }
 0x74f   :  { %v1745_v43 = vadd.f32 %v1697_v0, %v1659_v54  ;;  %v1661_v54 = vadd.f32 %v1652_v30, %v359_v19 }
 0x750   :  { %v1699_v10 = vpop.f32.mrf.mxu0  ;;  %v1740_v61 = vpop.f32.mrf.mxu1 }
 0x751   :  { %v1749_v29 = vmul.f32 0.5, %v1745_v43  ;;  %v1746_v46 = vadd.f32 %v1699_v10, %v1660_v55  ;;  %v1748_v48 = vadd.f32 %v1740_v61, %v1662_v58  ;;  %v1747_v47 = vadd.f32 %v1738_v14, %v1661_v54 }
 0x752   :  { %v1701_v12 = vpop.f32.mrf.mxu0  ;;  %v1742_v32 = vpop.f32.mrf.mxu1 }
 0x753   :  { %3657 = vtanh.f32 %v1749_v29  ;;  %v1750_v42 = vmul.f32 0.5, %v1746_v46  ;;  %v1751_v0 = vmul.f32 0.5, %v1747_v47 }
 0x754   :  { %v1702_v24 = vpop.f32.mrf.mxu0  ;;  %v1743_v11 = vpop.f32.mrf.mxu1 }
 0x755   :  { %3659 = vtanh.f32 %v1750_v42 }
 0x756   :  { %3661 = vtanh.f32 %v1748_v48 }
 0x757   :  { %3663 = vtanh.f32 %v1751_v0 }
 0x760   :  { %v3658_v25 = vpop.eup %3657 }
 0x761   :  { %v1755_v43 = vmul.f32 0.5, %v3658_v25 }
 0x762   :  { %v3660_v55 = vpop.eup %3659 }
 0x763   :  { %v1758_v10 = vadd.f32 0.5, %v1755_v43  ;;  %v1756_v12 = vmul.f32 0.5, %v3660_v55  ;;  %v3662_v59 = vpop.eup %3661  ;;  %v184_v55 = vpop.permute.xlu1 %183 }
 0x764   :  { %v3664_v3 = vpop.eup %3663 }
 0x765   :  { %v1759_v60 = vadd.f32 0.5, %v1756_v12  ;;  %v1763_v29 = vmul.f32 %v3662_v59, %v1758_v10  ;;  %v1757_v30 = vmul.f32 0.5, %v3664_v3  ;;  %v275_v10 = vmul.f32 %v4001_v6, %v184_v55  ;;  %v5247_v12 = vld [vmem:[#allocation9_spill] sm:$0xff]  ;;  %v5248_v3 = vld [vmem:[#allocation10_spill] sm:$0xff] }
 0x767   :  { %v1762_v15 = vmul.f32 %v1759_v60, %v4452_v36  ;;  %v1760_v48 = vadd.f32 0.5, %v1757_v30  ;;  %v276_v60 = vmul.f32 %v5247_v12, %v184_v55  ;;  %v361_v59 = vadd.f32 %v4011_v23, %v275_v10 }
 0x768   :  { %v278_v30 = vmul.f32 %v5248_v3, %v184_v55  ;;  %v277_v12 = vmul.f32 %v4020_v34, %v184_v55 }
 0x769   :  { %v4532_v46 = vadd.f32 %v1763_v29, %v1762_v15  ;;  %v362_v29 = vadd.f32 %v5239_v62, %v276_v60 }
 0x76b   :  { %3665 = vtanh.f32 %v4532_v46 }
 0x778   :  { %v3666_v14 = vpop.eup %3665 }
 0x779   :  { %v1766_v61 = vmul.f32 %v3666_v14, %v1760_v48 }
 0x77b   :  { %v1767_v32 = vpack.c.bf16 %v1766_v61, %v1766_v61 }
 0x77d   :  { %1809 = vmatmul.mubr.bf16.vlgmr.msra.gmra.mxu0 %v1767_v32  ;;  %1850 = vmatmul.mubr.bf16.vlgmr.msra.gmra.mxu1 %v1767_v32  ;;  %v1768_v36 = vunpack.c.l.bf16 %v1767_v32 }
 0x77e   :  { %1863 = vmatpush1.bf16.msra.mxu0 %v3844_v9  ;;  %1904 = vmatpush1.bf16.msra.mxu1 %v3847_v13 }
 0x77f   :  { %1864 = vmatprep.subr.bf16.mxu0 %v3851_v17  ;;  %1905 = vmatprep.subr.bf16.mxu1 %v3853_v18  ;;  %v1769_v58 = vsub.f32 %v1766_v61, %v1768_v36 }
 0x780   :  { %1894 = vmatprep.mubr.bf16.mxu0 %v5236_v5  ;;  %1935 = vmatprep.mubr.bf16.mxu1 %v5236_v5 }
 0x781   :  { %v1770_v42 = vpack.c.bf16 %v1769_v58, %v1769_v58 }
 0x782   :  { %1865 = vmatpush1.bf16.msra.mxu0 %v3856_v22  ;;  %1906 = vmatpush1.bf16.msra.mxu1 %v3860_v26 }
 0x783   :  { %1866 = vmatprep.subr.bf16.mxu0 %v3862_v27  ;;  %1907 = vmatprep.subr.bf16.mxu1 %v3864_v31 }
 0x786   :  { %1867 = vmatpush1.bf16.msra.mxu0 %v3867_v35  ;;  %1908 = vmatpush1.bf16.msra.mxu1 %v3871_v39 }
 0x787   :  { %1868 = vmatprep.subr.bf16.mxu0 %v3873_v40  ;;  %1909 = vmatprep.subr.bf16.mxu1 %v3876_v44 }
 0x78a   :  { %1869 = vmatpush1.bf16.msra.mxu0 %v3879_v51  ;;  %1910 = vmatpush1.bf16.msra.mxu1 %v3883_v52 }
 0x78b   :  { %1870 = vmatprep.subr.bf16.mxu0 %v3885_v53  ;;  %1911 = vmatprep.subr.bf16.mxu1 %v3888_v57 }
 0x78e   :  { %1871 = vmatpush1.bf16.msra.mxu0 %v3891_v63  ;;  %1912 = vmatpush1.bf16.msra.mxu1 %v3895_v1 }
 0x78f   :  { %1872 = vmatprep.subr.bf16.mxu0 %v3897_v2  ;;  %1913 = vmatprep.subr.bf16.mxu1 %v3900_v7 }
 0x792   :  { %1873 = vmatpush1.bf16.msra.mxu0 %v3903_v16  ;;  %1914 = vmatpush1.bf16.msra.mxu1 %v3907_v20 }
 0x793   :  { %1874 = vmatprep.subr.bf16.mxu0 %v3909_v21  ;;  %1915 = vmatprep.subr.bf16.mxu1 %v3915_v28 }
 0x796   :  { %1875 = vmatpush1.bf16.msra.mxu0 %v3921_v37  ;;  %1916 = vmatpush1.bf16.msra.mxu1 %v3925_v38 }
 0x797   :  { %1876 = vmatprep.subr.bf16.mxu0 %v3927_v41  ;;  %1917 = vmatprep.subr.bf16.mxu1 %v3930_v45 }
 0x79a   :  { %1877 = vmatpush1.bf16.msra.mxu0 %v3936_v49  ;;  %1918 = vmatpush1.bf16.msra.mxu1 %v3940_v50 }
 0x79b   :  { %1975 = vmatprep.subr.bf16.mxu0 %v3840_v4  ;;  %2016 = vmatprep.subr.bf16.mxu1 %v3842_v8 }
 0x79d   :  { %1895 = vmatmul.mubr.bf16.vlgmr.msra.gmra.mxu0 %v1770_v42  ;;  %1936 = vmatmul.mubr.bf16.vlgmr.msra.gmra.mxu1 %v1770_v42  ;;  %v364_v42 = vadd.f32 %v4018_v33, %v278_v30 }
 0x79e   :  { %1976 = vmatpush1.bf16.msra.mxu0 %v3844_v9  ;;  %2017 = vmatpush1.bf16.msra.mxu1 %v3847_v13 }
 0x79f   :  { %1977 = vmatprep.subr.bf16.mxu0 %v3851_v17  ;;  %2018 = vmatprep.subr.bf16.mxu1 %v3853_v18 }
 0x7a0   :  { %2007 = vmatprep.mubr.bf16.mxu0 %v5236_v5  ;;  %2048 = vmatprep.mubr.bf16.mxu1 %v5236_v5 }
 0x7a2   :  { %1978 = vmatpush1.bf16.msra.mxu0 %v3856_v22  ;;  %2019 = vmatpush1.bf16.msra.mxu1 %v3860_v26 }
 0x7a3   :  { %1979 = vmatprep.subr.bf16.mxu0 %v3862_v27  ;;  %2020 = vmatprep.subr.bf16.mxu1 %v3864_v31 }
 0x7a6   :  { %1980 = vmatpush1.bf16.msra.mxu0 %v3867_v35  ;;  %2021 = vmatpush1.bf16.msra.mxu1 %v3871_v39 }
 0x7a7   :  { %1981 = vmatprep.subr.bf16.mxu0 %v3873_v40  ;;  %2022 = vmatprep.subr.bf16.mxu1 %v3876_v44 }
 0x7aa   :  { %1982 = vmatpush1.bf16.msra.mxu0 %v3879_v51  ;;  %2023 = vmatpush1.bf16.msra.mxu1 %v3883_v52 }
 0x7ab   :  { %1983 = vmatprep.subr.bf16.mxu0 %v3885_v53  ;;  %2024 = vmatprep.subr.bf16.mxu1 %v3888_v57 }
 0x7ae   :  { %1984 = vmatpush1.bf16.msra.mxu0 %v3891_v63  ;;  %2025 = vmatpush1.bf16.msra.mxu1 %v3895_v1 }
 0x7af   :  { %1985 = vmatprep.subr.bf16.mxu0 %v3897_v2  ;;  %2026 = vmatprep.subr.bf16.mxu1 %v3900_v7 }
 0x7b2   :  { %1986 = vmatpush1.bf16.msra.mxu0 %v3903_v16  ;;  %2027 = vmatpush1.bf16.msra.mxu1 %v3907_v20 }
 0x7b3   :  { %1987 = vmatprep.subr.bf16.mxu0 %v3909_v21  ;;  %2028 = vmatprep.subr.bf16.mxu1 %v3915_v28 }
 0x7b6   :  { %1988 = vmatpush1.bf16.msra.mxu0 %v3921_v37  ;;  %2029 = vmatpush1.bf16.msra.mxu1 %v3925_v38 }
 0x7b7   :  { %1989 = vmatprep.subr.bf16.mxu0 %v3927_v41  ;;  %2030 = vmatprep.subr.bf16.mxu1 %v3930_v45 }
 0x7ba   :  { %1990 = vmatpush1.bf16.msra.mxu0 %v3936_v49  ;;  %2031 = vmatpush1.bf16.msra.mxu1 %v3940_v50 }
 0x7bb   :  { %2061 = vmatprep.subr.bf16.mxu0 %v3840_v4  ;;  %2102 = vmatprep.subr.bf16.mxu1 %v3842_v8 }
 0x83d   :  { %v1810_v24 = vpop.f32.mrf.mxu0  ;;  %v1851_v11 = vpop.f32.mrf.mxu1 }
 0x83e   :  { %v1858_v15 = vadd.f32 %v1810_v24, %v361_v59 }
 0x83f   :  { %v1812_v19 = vpop.f32.mrf.mxu0  ;;  %v1853_v54 = vpop.f32.mrf.mxu1 }
 0x840   :  { %v1859_v61 = vadd.f32 %v1812_v19, %v362_v29  ;;  %v1861_v10 = vadd.f32 %v1853_v54, %v364_v42  ;;  %v363_v19 = vadd.f32 %v4025_v56, %v277_v12 }
 0x841   :  { %v1814_v47 = vpop.f32.mrf.mxu0  ;;  %v1855_v0 = vpop.f32.mrf.mxu1 }
 0x843   :  { %v1815_v25 = vpop.f32.mrf.mxu0  ;;  %v1856_v43 = vpop.f32.mrf.mxu1 }
 0x85d   :  { %v1896_v48 = vpop.f32.mrf.mxu0  ;;  %v1937_v14 = vpop.f32.mrf.mxu1 }
 0x85e   :  { %v1944_v32 = vadd.f32 %v1896_v48, %v1858_v15  ;;  %v1860_v15 = vadd.f32 %v1851_v11, %v363_v19 }
 0x85f   :  { %v1898_v36 = vpop.f32.mrf.mxu0  ;;  %v1939_v58 = vpop.f32.mrf.mxu1 }
 0x860   :  { %v1948_v47 = vmul.f32 0.5, %v1944_v32  ;;  %v1945_v0 = vadd.f32 %v1898_v36, %v1859_v61  ;;  %v1947_v3 = vadd.f32 %v1939_v58, %v1861_v10  ;;  %v1946_v29 = vadd.f32 %v1937_v14, %v1860_v15 }
 0x861   :  { %v1900_v25 = vpop.f32.mrf.mxu0  ;;  %v1941_v43 = vpop.f32.mrf.mxu1 }
 0x862   :  { %3667 = vtanh.f32 %v1948_v47  ;;  %v1949_v24 = vmul.f32 0.5, %v1945_v0  ;;  %v1950_v48 = vmul.f32 0.5, %v1946_v29 }
 0x863   :  { %v1901_v60 = vpop.f32.mrf.mxu0  ;;  %v1942_v59 = vpop.f32.mrf.mxu1 }
 0x864   :  { %3669 = vtanh.f32 %v1949_v24 }
 0x865   :  { %3671 = vtanh.f32 %v1947_v3 }
 0x866   :  { %3673 = vtanh.f32 %v1950_v48 }
 0x86f   :  { %v3668_v30 = vpop.eup %3667 }
 0x870   :  { %v1954_v32 = vmul.f32 0.5, %v3668_v30 }
 0x871   :  { %v3670_v61 = vpop.eup %3669 }
 0x872   :  { %v1957_v36 = vadd.f32 0.5, %v1954_v32  ;;  %v1955_v25 = vmul.f32 0.5, %v3670_v61  ;;  %v3672_v54 = vpop.eup %3671  ;;  %v189_v61 = vpop.permute.xlu0 %188 }
 0x873   :  { %v3674_v12 = vpop.eup %3673 }
 0x874   :  { %v1958_v55 = vadd.f32 0.5, %v1955_v25  ;;  %v1962_v47 = vmul.f32 %v3672_v54, %v1957_v36  ;;  %v1956_v11 = vmul.f32 0.5, %v3674_v12  ;;  %v279_v36 = vmul.f32 %v4001_v6, %v189_v61  ;;  %v5249_v25 = vld [vmem:[#allocation9_spill] sm:$0xff]  ;;  %v5250_v12 = vld [vmem:[#allocation10_spill] sm:$0xff] }
 0x876   :  { %v1961_v42 = vmul.f32 %v1958_v55, %v4532_v46  ;;  %v1959_v3 = vadd.f32 0.5, %v1956_v11  ;;  %v280_v55 = vmul.f32 %v5249_v25, %v189_v61  ;;  %v365_v54 = vadd.f32 %v4011_v23, %v279_v36 }
 0x877   :  { %v282_v11 = vmul.f32 %v5250_v12, %v189_v61  ;;  %v281_v25 = vmul.f32 %v4020_v34, %v189_v61 }
 0x878   :  { %v4612_v0 = vadd.f32 %v1962_v47, %v1961_v42  ;;  %v366_v47 = vadd.f32 %v5239_v62, %v280_v55 }
 0x87a   :  { %3675 = vtanh.f32 %v4612_v0 }
 0x887   :  { %v3676_v14 = vpop.eup %3675 }
 0x888   :  { %v1965_v58 = vmul.f32 %v3676_v14, %v1959_v3 }
 0x88a   :  { %v1966_v43 = vpack.c.bf16 %v1965_v58, %v1965_v58 }
 0x88c   :  { %2008 = vmatmul.mubr.bf16.vlgmr.msra.gmra.mxu0 %v1966_v43  ;;  %2049 = vmatmul.mubr.bf16.vlgmr.msra.gmra.mxu1 %v1966_v43  ;;  %v1967_v46 = vunpack.c.l.bf16 %v1966_v43 }
 0x88d   :  { %2062 = vmatpush1.bf16.msra.mxu0 %v3844_v9  ;;  %2103 = vmatpush1.bf16.msra.mxu1 %v3847_v13 }
 0x88e   :  { %2063 = vmatprep.subr.bf16.mxu0 %v3851_v17  ;;  %2104 = vmatprep.subr.bf16.mxu1 %v3853_v18  ;;  %v1968_v10 = vsub.f32 %v1965_v58, %v1967_v46 }
 0x88f   :  { %2093 = vmatprep.mubr.bf16.mxu0 %v5236_v5  ;;  %2134 = vmatprep.mubr.bf16.mxu1 %v5236_v5 }
 0x890   :  { %v1969_v24 = vpack.c.bf16 %v1968_v10, %v1968_v10 }
 0x891   :  { %2064 = vmatpush1.bf16.msra.mxu0 %v3856_v22  ;;  %2105 = vmatpush1.bf16.msra.mxu1 %v3860_v26 }
 0x892   :  { %2065 = vmatprep.subr.bf16.mxu0 %v3862_v27  ;;  %2106 = vmatprep.subr.bf16.mxu1 %v3864_v31 }
 0x895   :  { %2066 = vmatpush1.bf16.msra.mxu0 %v3867_v35  ;;  %2107 = vmatpush1.bf16.msra.mxu1 %v3871_v39 }
 0x896   :  { %2067 = vmatprep.subr.bf16.mxu0 %v3873_v40  ;;  %2108 = vmatprep.subr.bf16.mxu1 %v3876_v44 }
 0x899   :  { %2068 = vmatpush1.bf16.msra.mxu0 %v3879_v51  ;;  %2109 = vmatpush1.bf16.msra.mxu1 %v3883_v52 }
 0x89a   :  { %2069 = vmatprep.subr.bf16.mxu0 %v3885_v53  ;;  %2110 = vmatprep.subr.bf16.mxu1 %v3888_v57 }
 0x89d   :  { %2070 = vmatpush1.bf16.msra.mxu0 %v3891_v63  ;;  %2111 = vmatpush1.bf16.msra.mxu1 %v3895_v1 }
 0x89e   :  { %2071 = vmatprep.subr.bf16.mxu0 %v3897_v2  ;;  %2112 = vmatprep.subr.bf16.mxu1 %v3900_v7 }
 0x8a1   :  { %2072 = vmatpush1.bf16.msra.mxu0 %v3903_v16  ;;  %2113 = vmatpush1.bf16.msra.mxu1 %v3907_v20 }
 0x8a2   :  { %2073 = vmatprep.subr.bf16.mxu0 %v3909_v21  ;;  %2114 = vmatprep.subr.bf16.mxu1 %v3915_v28 }
 0x8a5   :  { %2074 = vmatpush1.bf16.msra.mxu0 %v3921_v37  ;;  %2115 = vmatpush1.bf16.msra.mxu1 %v3925_v38 }
 0x8a6   :  { %2075 = vmatprep.subr.bf16.mxu0 %v3927_v41  ;;  %2116 = vmatprep.subr.bf16.mxu1 %v3930_v45 }
 0x8a9   :  { %2076 = vmatpush1.bf16.msra.mxu0 %v3936_v49  ;;  %2117 = vmatpush1.bf16.msra.mxu1 %v3940_v50 }
 0x8aa   :  { %2174 = vmatprep.subr.bf16.mxu0 %v3840_v4  ;;  %2215 = vmatprep.subr.bf16.mxu1 %v3842_v8 }
 0x8ac   :  { %2094 = vmatmul.mubr.bf16.vlgmr.msra.gmra.mxu0 %v1969_v24  ;;  %2135 = vmatmul.mubr.bf16.vlgmr.msra.gmra.mxu1 %v1969_v24  ;;  %v368_v24 = vadd.f32 %v4018_v33, %v282_v11 }
 0x8ad   :  { %2175 = vmatpush1.bf16.msra.mxu0 %v3844_v9  ;;  %2216 = vmatpush1.bf16.msra.mxu1 %v3847_v13 }
 0x8ae   :  { %2176 = vmatprep.subr.bf16.mxu0 %v3851_v17  ;;  %2217 = vmatprep.subr.bf16.mxu1 %v3853_v18 }
 0x8af   :  { %2206 = vmatprep.mubr.bf16.mxu0 %v5236_v5  ;;  %2247 = vmatprep.mubr.bf16.mxu1 %v5236_v5 }
 0x8b1   :  { %2177 = vmatpush1.bf16.msra.mxu0 %v3856_v22  ;;  %2218 = vmatpush1.bf16.msra.mxu1 %v3860_v26 }
 0x8b2   :  { %2178 = vmatprep.subr.bf16.mxu0 %v3862_v27  ;;  %2219 = vmatprep.subr.bf16.mxu1 %v3864_v31 }
 0x8b5   :  { %2179 = vmatpush1.bf16.msra.mxu0 %v3867_v35  ;;  %2220 = vmatpush1.bf16.msra.mxu1 %v3871_v39 }
 0x8b6   :  { %2180 = vmatprep.subr.bf16.mxu0 %v3873_v40  ;;  %2221 = vmatprep.subr.bf16.mxu1 %v3876_v44 }
 0x8b9   :  { %2181 = vmatpush1.bf16.msra.mxu0 %v3879_v51  ;;  %2222 = vmatpush1.bf16.msra.mxu1 %v3883_v52 }
 0x8ba   :  { %2182 = vmatprep.subr.bf16.mxu0 %v3885_v53  ;;  %2223 = vmatprep.subr.bf16.mxu1 %v3888_v57 }
 0x8bd   :  { %2183 = vmatpush1.bf16.msra.mxu0 %v3891_v63  ;;  %2224 = vmatpush1.bf16.msra.mxu1 %v3895_v1 }
 0x8be   :  { %2184 = vmatprep.subr.bf16.mxu0 %v3897_v2  ;;  %2225 = vmatprep.subr.bf16.mxu1 %v3900_v7 }
 0x8c1   :  { %2185 = vmatpush1.bf16.msra.mxu0 %v3903_v16  ;;  %2226 = vmatpush1.bf16.msra.mxu1 %v3907_v20 }
 0x8c2   :  { %2186 = vmatprep.subr.bf16.mxu0 %v3909_v21  ;;  %2227 = vmatprep.subr.bf16.mxu1 %v3915_v28 }
 0x8c5   :  { %2187 = vmatpush1.bf16.msra.mxu0 %v3921_v37  ;;  %2228 = vmatpush1.bf16.msra.mxu1 %v3925_v38 }
 0x8c6   :  { %2188 = vmatprep.subr.bf16.mxu0 %v3927_v41  ;;  %2229 = vmatprep.subr.bf16.mxu1 %v3930_v45 }
 0x8c9   :  { %2189 = vmatpush1.bf16.msra.mxu0 %v3936_v49  ;;  %2230 = vmatpush1.bf16.msra.mxu1 %v3940_v50 }
 0x8ca   :  { %2260 = vmatprep.subr.bf16.mxu0 %v3840_v4  ;;  %2301 = vmatprep.subr.bf16.mxu1 %v3842_v8 }
 0x94c   :  { %v2009_v60 = vpop.f32.mrf.mxu0  ;;  %v2050_v59 = vpop.f32.mrf.mxu1 }
 0x94d   :  { %v2057_v42 = vadd.f32 %v2009_v60, %v365_v54 }
 0x94e   :  { %v2011_v19 = vpop.f32.mrf.mxu0  ;;  %v2052_v15 = vpop.f32.mrf.mxu1 }
 0x94f   :  { %v2058_v58 = vadd.f32 %v2011_v19, %v366_v47  ;;  %v2060_v36 = vadd.f32 %v2052_v15, %v368_v24  ;;  %v367_v19 = vadd.f32 %v4025_v56, %v281_v25 }
 0x950   :  { %v2013_v29 = vpop.f32.mrf.mxu0  ;;  %v2054_v48 = vpop.f32.mrf.mxu1 }
 0x952   :  { %v2014_v30 = vpop.f32.mrf.mxu0  ;;  %v2055_v32 = vpop.f32.mrf.mxu1 }
 0x96c   :  { %v2095_v3 = vpop.f32.mrf.mxu0  ;;  %v2136_v14 = vpop.f32.mrf.mxu1 }
 0x96d   :  { %v2143_v43 = vadd.f32 %v2095_v3, %v2057_v42  ;;  %v2059_v42 = vadd.f32 %v2050_v59, %v367_v19 }
 0x96e   :  { %v2097_v46 = vpop.f32.mrf.mxu0  ;;  %v2138_v10 = vpop.f32.mrf.mxu1 }
 0x96f   :  { %v2147_v29 = vmul.f32 0.5, %v2143_v43  ;;  %v2144_v48 = vadd.f32 %v2097_v46, %v2058_v58  ;;  %v2146_v12 = vadd.f32 %v2138_v10, %v2060_v36  ;;  %v2145_v47 = vadd.f32 %v2136_v14, %v2059_v42 }
 0x970   :  { %v2099_v30 = vpop.f32.mrf.mxu0  ;;  %v2140_v32 = vpop.f32.mrf.mxu1 }
 0x971   :  { %3677 = vtanh.f32 %v2147_v29  ;;  %v2148_v60 = vmul.f32 0.5, %v2144_v48  ;;  %v2149_v3 = vmul.f32 0.5, %v2145_v47 }
 0x972   :  { %v2100_v55 = vpop.f32.mrf.mxu0  ;;  %v2141_v54 = vpop.f32.mrf.mxu1 }
 0x973   :  { %3679 = vtanh.f32 %v2148_v60 }
 0x974   :  { %3681 = vtanh.f32 %v2146_v12 }
 0x975   :  { %3683 = vtanh.f32 %v2149_v3 }
 0x97e   :  { %v3678_v11 = vpop.eup %3677 }
 0x97f   :  { %v2153_v43 = vmul.f32 0.5, %v3678_v11 }
 0x980   :  { %v3680_v58 = vpop.eup %3679 }
 0x981   :  { %v2156_v46 = vadd.f32 0.5, %v2153_v43  ;;  %v2154_v30 = vmul.f32 0.5, %v3680_v58  ;;  %v3682_v15 = vpop.eup %3681  ;;  %v194_v58 = vpop.permute.xlu1 %193 }
 0x982   :  { %v3684_v25 = vpop.eup %3683 }
 0x983   :  { %v2157_v61 = vadd.f32 0.5, %v2154_v30  ;;  %v2161_v29 = vmul.f32 %v3682_v15, %v2156_v46  ;;  %v2155_v59 = vmul.f32 0.5, %v3684_v25  ;;  %v283_v46 = vmul.f32 %v4001_v6, %v194_v58  ;;  %v5251_v30 = vld [vmem:[#allocation9_spill] sm:$0xff]  ;;  %v5252_v25 = vld [vmem:[#allocation10_spill] sm:$0xff] }
 0x985   :  { %v2160_v24 = vmul.f32 %v2157_v61, %v4612_v0  ;;  %v2158_v12 = vadd.f32 0.5, %v2155_v59  ;;  %v284_v61 = vmul.f32 %v5251_v30, %v194_v58  ;;  %v369_v15 = vadd.f32 %v4011_v23, %v283_v46 }
 0x986   :  { %v286_v59 = vmul.f32 %v5252_v25, %v194_v58  ;;  %v285_v30 = vmul.f32 %v4020_v34, %v194_v58 }
 0x987   :  { %v4692_v48 = vadd.f32 %v2161_v29, %v2160_v24  ;;  %v370_v29 = vadd.f32 %v5239_v62, %v284_v61 }
 0x989   :  { %3685 = vtanh.f32 %v4692_v48 }
 0x996   :  { %v3686_v14 = vpop.eup %3685 }
 0x997   :  { %v2164_v10 = vmul.f32 %v3686_v14, %v2158_v12 }
 0x999   :  { %v2165_v32 = vpack.c.bf16 %v2164_v10, %v2164_v10 }
 0x99b   :  { %2207 = vmatmul.mubr.bf16.vlgmr.msra.gmra.mxu0 %v2165_v32  ;;  %2248 = vmatmul.mubr.bf16.vlgmr.msra.gmra.mxu1 %v2165_v32  ;;  %v2166_v0 = vunpack.c.l.bf16 %v2165_v32 }
 0x99c   :  { %2261 = vmatpush1.bf16.msra.mxu0 %v3844_v9  ;;  %2302 = vmatpush1.bf16.msra.mxu1 %v3847_v13 }
 0x99d   :  { %2262 = vmatprep.subr.bf16.mxu0 %v3851_v17  ;;  %2303 = vmatprep.subr.bf16.mxu1 %v3853_v18  ;;  %v2167_v36 = vsub.f32 %v2164_v10, %v2166_v0 }
 0x99e   :  { %2292 = vmatprep.mubr.bf16.mxu0 %v5236_v5  ;;  %2333 = vmatprep.mubr.bf16.mxu1 %v5236_v5 }
 0x99f   :  { %v2168_v60 = vpack.c.bf16 %v2167_v36, %v2167_v36 }
 0x9a0   :  { %2263 = vmatpush1.bf16.msra.mxu0 %v3856_v22  ;;  %2304 = vmatpush1.bf16.msra.mxu1 %v3860_v26 }
 0x9a1   :  { %2264 = vmatprep.subr.bf16.mxu0 %v3862_v27  ;;  %2305 = vmatprep.subr.bf16.mxu1 %v3864_v31 }
 0x9a4   :  { %2265 = vmatpush1.bf16.msra.mxu0 %v3867_v35  ;;  %2306 = vmatpush1.bf16.msra.mxu1 %v3871_v39 }
 0x9a5   :  { %2266 = vmatprep.subr.bf16.mxu0 %v3873_v40  ;;  %2307 = vmatprep.subr.bf16.mxu1 %v3876_v44 }
 0x9a8   :  { %2267 = vmatpush1.bf16.msra.mxu0 %v3879_v51  ;;  %2308 = vmatpush1.bf16.msra.mxu1 %v3883_v52 }
 0x9a9   :  { %2268 = vmatprep.subr.bf16.mxu0 %v3885_v53  ;;  %2309 = vmatprep.subr.bf16.mxu1 %v3888_v57 }
 0x9ac   :  { %2269 = vmatpush1.bf16.msra.mxu0 %v3891_v63  ;;  %2310 = vmatpush1.bf16.msra.mxu1 %v3895_v1 }
 0x9ad   :  { %2270 = vmatprep.subr.bf16.mxu0 %v3897_v2  ;;  %2311 = vmatprep.subr.bf16.mxu1 %v3900_v7 }
 0x9b0   :  { %2271 = vmatpush1.bf16.msra.mxu0 %v3903_v16  ;;  %2312 = vmatpush1.bf16.msra.mxu1 %v3907_v20 }
 0x9b1   :  { %2272 = vmatprep.subr.bf16.mxu0 %v3909_v21  ;;  %2313 = vmatprep.subr.bf16.mxu1 %v3915_v28 }
 0x9b4   :  { %2273 = vmatpush1.bf16.msra.mxu0 %v3921_v37  ;;  %2314 = vmatpush1.bf16.msra.mxu1 %v3925_v38 }
 0x9b5   :  { %2274 = vmatprep.subr.bf16.mxu0 %v3927_v41  ;;  %2315 = vmatprep.subr.bf16.mxu1 %v3930_v45 }
 0x9b8   :  { %2275 = vmatpush1.bf16.msra.mxu0 %v3936_v49  ;;  %2316 = vmatpush1.bf16.msra.mxu1 %v3940_v50 }
 0x9b9   :  { %2374 = vmatprep.subr.bf16.mxu0 %v3840_v4  ;;  %2415 = vmatprep.subr.bf16.mxu1 %v3842_v8 }
 0x9bb   :  { %2293 = vmatmul.mubr.bf16.vlgmr.msra.gmra.mxu0 %v2168_v60  ;;  %2334 = vmatmul.mubr.bf16.vlgmr.msra.gmra.mxu1 %v2168_v60  ;;  %v372_v60 = vadd.f32 %v4018_v33, %v286_v59 }
 0x9bc   :  { %2375 = vmatpush1.bf16.msra.mxu0 %v3844_v9  ;;  %2416 = vmatpush1.bf16.msra.mxu1 %v3847_v13 }
 0x9bd   :  { %2376 = vmatprep.subr.bf16.mxu0 %v3851_v17  ;;  %2417 = vmatprep.subr.bf16.mxu1 %v3853_v18 }
 0x9be   :  { %2406 = vmatprep.mubr.bf16.mxu0 %v5236_v5  ;;  %2447 = vmatprep.mubr.bf16.mxu1 %v5236_v5 }
 0x9c0   :  { %2377 = vmatpush1.bf16.msra.mxu0 %v3856_v22  ;;  %2418 = vmatpush1.bf16.msra.mxu1 %v3860_v26 }
 0x9c1   :  { %2378 = vmatprep.subr.bf16.mxu0 %v3862_v27  ;;  %2419 = vmatprep.subr.bf16.mxu1 %v3864_v31 }
 0x9c4   :  { %2379 = vmatpush1.bf16.msra.mxu0 %v3867_v35  ;;  %2420 = vmatpush1.bf16.msra.mxu1 %v3871_v39 }
 0x9c5   :  { %2380 = vmatprep.subr.bf16.mxu0 %v3873_v40  ;;  %2421 = vmatprep.subr.bf16.mxu1 %v3876_v44 }
 0x9c8   :  { %2381 = vmatpush1.bf16.msra.mxu0 %v3879_v51  ;;  %2422 = vmatpush1.bf16.msra.mxu1 %v3883_v52 }
 0x9c9   :  { %2382 = vmatprep.subr.bf16.mxu0 %v3885_v53  ;;  %2423 = vmatprep.subr.bf16.mxu1 %v3888_v57 }
 0x9cc   :  { %2383 = vmatpush1.bf16.msra.mxu0 %v3891_v63  ;;  %2424 = vmatpush1.bf16.msra.mxu1 %v3895_v1 }
 0x9cd   :  { %2384 = vmatprep.subr.bf16.mxu0 %v3897_v2  ;;  %2425 = vmatprep.subr.bf16.mxu1 %v3900_v7 }
 0x9d0   :  { %2385 = vmatpush1.bf16.msra.mxu0 %v3903_v16  ;;  %2426 = vmatpush1.bf16.msra.mxu1 %v3907_v20 }
 0x9d1   :  { %2386 = vmatprep.subr.bf16.mxu0 %v3909_v21  ;;  %2427 = vmatprep.subr.bf16.mxu1 %v3915_v28 }
 0x9d4   :  { %2387 = vmatpush1.bf16.msra.mxu0 %v3921_v37  ;;  %2428 = vmatpush1.bf16.msra.mxu1 %v3925_v38 }
 0x9d5   :  { %2388 = vmatprep.subr.bf16.mxu0 %v3927_v41  ;;  %2429 = vmatprep.subr.bf16.mxu1 %v3930_v45 }
 0x9d8   :  { %2389 = vmatpush1.bf16.msra.mxu0 %v3936_v49  ;;  %2430 = vmatpush1.bf16.msra.mxu1 %v3940_v50 }
 0x9d9   :  { %2460 = vmatprep.subr.bf16.mxu0 %v3840_v4  ;;  %2501 = vmatprep.subr.bf16.mxu1 %v3842_v8 }
 0xa5b   :  { %v2208_v55 = vpop.f32.mrf.mxu0  ;;  %v2249_v54 = vpop.f32.mrf.mxu1 }
 0xa5c   :  { %v2256_v24 = vadd.f32 %v2208_v55, %v369_v15 }
 0xa5d   :  { %v2210_v19 = vpop.f32.mrf.mxu0  ;;  %v2251_v42 = vpop.f32.mrf.mxu1 }
 0xa5e   :  { %v2257_v10 = vadd.f32 %v2210_v19, %v370_v29  ;;  %v2259_v46 = vadd.f32 %v2251_v42, %v372_v60  ;;  %v371_v19 = vadd.f32 %v4025_v56, %v285_v30 }
 0xa5f   :  { %v2212_v47 = vpop.f32.mrf.mxu0  ;;  %v2253_v3 = vpop.f32.mrf.mxu1 }
 0xa61   :  { %v2213_v11 = vpop.f32.mrf.mxu0  ;;  %v2254_v43 = vpop.f32.mrf.mxu1 }
 0xa7b   :  { %v2294_v12 = vpop.f32.mrf.mxu0  ;;  %v2335_v14 = vpop.f32.mrf.mxu1 }
 0xa7c   :  { %v2342_v32 = vadd.f32 %v2294_v12, %v2256_v24  ;;  %v2258_v24 = vadd.f32 %v2249_v54, %v371_v19 }
 0xa7d   :  { %v2296_v0 = vpop.f32.mrf.mxu0  ;;  %v2337_v36 = vpop.f32.mrf.mxu1 }
 0xa7e   :  { %v2346_v47 = vmul.f32 0.5, %v2342_v32  ;;  %v2343_v3 = vadd.f32 %v2296_v0, %v2257_v10  ;;  %v2345_v25 = vadd.f32 %v2337_v36, %v2259_v46  ;;  %v2344_v29 = vadd.f32 %v2335_v14, %v2258_v24 }
 0xa7f   :  { %v2298_v11 = vpop.f32.mrf.mxu0  ;;  %v2339_v43 = vpop.f32.mrf.mxu1 }
 0xa80   :  { %3687 = vtanh.f32 %v2346_v47  ;;  %v2347_v55 = vmul.f32 0.5, %v2343_v3  ;;  %v2348_v12 = vmul.f32 0.5, %v2344_v29 }
 0xa81   :  { %v2299_v61 = vpop.f32.mrf.mxu0  ;;  %v2340_v15 = vpop.f32.mrf.mxu1 }
 0xa82   :  { %3689 = vtanh.f32 %v2347_v55 }
 0xa83   :  { %3691 = vtanh.f32 %v2345_v25 }
 0xa84   :  { %3693 = vtanh.f32 %v2348_v12 }
 0xa8d   :  { %v3688_v59 = vpop.eup %3687 }
 0xa8e   :  { %v2352_v32 = vmul.f32 0.5, %v3688_v59 }
 0xa8f   :  { %v3690_v10 = vpop.eup %3689 }
 0xa90   :  { %v2355_v0 = vadd.f32 0.5, %v2352_v32  ;;  %v2353_v11 = vmul.f32 0.5, %v3690_v10  ;;  %v3692_v42 = vpop.eup %3691  ;;  %v199_v10 = vpop.permute.xlu0 %198 }
 0xa91   :  { %v3694_v30 = vpop.eup %3693 }
 0xa92   :  { %v2356_v58 = vadd.f32 0.5, %v2353_v11  ;;  %v2360_v47 = vmul.f32 %v3692_v42, %v2355_v0  ;;  %v2354_v54 = vmul.f32 0.5, %v3694_v30  ;;  %v287_v0 = vmul.f32 %v4001_v6, %v199_v10  ;;  %v5253_v11 = vld [vmem:[#allocation9_spill] sm:$0xff]  ;;  %v5254_v30 = vld [vmem:[#allocation10_spill] sm:$0xff] }
 0xa94   :  { %v2359_v60 = vmul.f32 %v2356_v58, %v4692_v48  ;;  %v2357_v25 = vadd.f32 0.5, %v2354_v54  ;;  %v288_v58 = vmul.f32 %v5253_v11, %v199_v10  ;;  %v373_v42 = vadd.f32 %v4011_v23, %v287_v0 }
 0xa95   :  { %v290_v54 = vmul.f32 %v5254_v30, %v199_v10  ;;  %v289_v11 = vmul.f32 %v4020_v34, %v199_v10 }
 0xa96   :  { %v4772_v3 = vadd.f32 %v2360_v47, %v2359_v60  ;;  %v374_v47 = vadd.f32 %v5239_v62, %v288_v58 }
 0xa98   :  { %3695 = vtanh.f32 %v4772_v3 }
 0xaa5   :  { %v3696_v14 = vpop.eup %3695 }
 0xaa6   :  { %v2363_v36 = vmul.f32 %v3696_v14, %v2357_v25 }
 0xaa8   :  { %2364 = vst [vmem:[#allocation6] sm:$0xff] %v2363_v36  ;;  %v2365_v43 = vpack.c.bf16 %v2363_v36, %v2363_v36 }
 0xaaa   :  { %2407 = vmatmul.mubr.bf16.vlgmr.msra.gmra.mxu0 %v2365_v43  ;;  %2448 = vmatmul.mubr.bf16.vlgmr.msra.gmra.mxu1 %v2365_v43  ;;  %v2366_v48 = vunpack.c.l.bf16 %v2365_v43 }
 0xaab   :  { %2461 = vmatpush1.bf16.msra.mxu0 %v3844_v9  ;;  %2502 = vmatpush1.bf16.msra.mxu1 %v3847_v13 }
 0xaac   :  { %2462 = vmatprep.subr.bf16.mxu0 %v3851_v17  ;;  %2503 = vmatprep.subr.bf16.mxu1 %v3853_v18  ;;  %v2367_v46 = vsub.f32 %v2363_v36, %v2366_v48 }
 0xaad   :  { %2492 = vmatprep.mubr.bf16.mxu0 %v5236_v5  ;;  %2533 = vmatprep.mubr.bf16.mxu1 %v5236_v5 }
 0xaae   :  { %v2368_v55 = vpack.c.bf16 %v2367_v46, %v2367_v46 }
 0xaaf   :  { %2463 = vmatpush1.bf16.msra.mxu0 %v3856_v22  ;;  %2504 = vmatpush1.bf16.msra.mxu1 %v3860_v26 }
 0xab0   :  { %2464 = vmatprep.subr.bf16.mxu0 %v3862_v27  ;;  %2505 = vmatprep.subr.bf16.mxu1 %v3864_v31 }
 0xab3   :  { %2465 = vmatpush1.bf16.msra.mxu0 %v3867_v35  ;;  %2506 = vmatpush1.bf16.msra.mxu1 %v3871_v39 }
 0xab4   :  { %2466 = vmatprep.subr.bf16.mxu0 %v3873_v40  ;;  %2507 = vmatprep.subr.bf16.mxu1 %v3876_v44 }
 0xab7   :  { %2467 = vmatpush1.bf16.msra.mxu0 %v3879_v51  ;;  %2508 = vmatpush1.bf16.msra.mxu1 %v3883_v52 }
 0xab8   :  { %2468 = vmatprep.subr.bf16.mxu0 %v3885_v53  ;;  %2509 = vmatprep.subr.bf16.mxu1 %v3888_v57 }
 0xabb   :  { %2469 = vmatpush1.bf16.msra.mxu0 %v3891_v63  ;;  %2510 = vmatpush1.bf16.msra.mxu1 %v3895_v1 }
 0xabc   :  { %2470 = vmatprep.subr.bf16.mxu0 %v3897_v2  ;;  %2511 = vmatprep.subr.bf16.mxu1 %v3900_v7 }
 0xabf   :  { %2471 = vmatpush1.bf16.msra.mxu0 %v3903_v16  ;;  %2512 = vmatpush1.bf16.msra.mxu1 %v3907_v20 }
 0xac0   :  { %2472 = vmatprep.subr.bf16.mxu0 %v3909_v21  ;;  %2513 = vmatprep.subr.bf16.mxu1 %v3915_v28 }
 0xac3   :  { %2473 = vmatpush1.bf16.msra.mxu0 %v3921_v37  ;;  %2514 = vmatpush1.bf16.msra.mxu1 %v3925_v38 }
 0xac4   :  { %2474 = vmatprep.subr.bf16.mxu0 %v3927_v41  ;;  %2515 = vmatprep.subr.bf16.mxu1 %v3930_v45 }
 0xac7   :  { %2475 = vmatpush1.bf16.msra.mxu0 %v3936_v49  ;;  %2516 = vmatpush1.bf16.msra.mxu1 %v3940_v50 }
 0xac8   :  { %2575 = vmatprep.subr.bf16.mxu0 %v3840_v4  ;;  %2616 = vmatprep.subr.bf16.mxu1 %v3842_v8 }
 0xaca   :  { %2493 = vmatmul.mubr.bf16.vlgmr.msra.gmra.mxu0 %v2368_v55  ;;  %2534 = vmatmul.mubr.bf16.vlgmr.msra.gmra.mxu1 %v2368_v55  ;;  %v376_v55 = vadd.f32 %v4018_v33, %v290_v54 }
 0xacb   :  { %2576 = vmatpush1.bf16.msra.mxu0 %v3844_v9  ;;  %2617 = vmatpush1.bf16.msra.mxu1 %v3847_v13 }
 0xacc   :  { %2577 = vmatprep.subr.bf16.mxu0 %v3851_v17  ;;  %2618 = vmatprep.subr.bf16.mxu1 %v3853_v18 }
 0xacd   :  { %2607 = vmatprep.mubr.bf16.mxu0 %v5236_v5  ;;  %2648 = vmatprep.mubr.bf16.mxu1 %v5236_v5 }
 0xacf   :  { %2578 = vmatpush1.bf16.msra.mxu0 %v3856_v22  ;;  %2619 = vmatpush1.bf16.msra.mxu1 %v3860_v26 }
 0xad0   :  { %2579 = vmatprep.subr.bf16.mxu0 %v3862_v27  ;;  %2620 = vmatprep.subr.bf16.mxu1 %v3864_v31 }
 0xad3   :  { %2580 = vmatpush1.bf16.msra.mxu0 %v3867_v35  ;;  %2621 = vmatpush1.bf16.msra.mxu1 %v3871_v39 }
 0xad4   :  { %2581 = vmatprep.subr.bf16.mxu0 %v3873_v40  ;;  %2622 = vmatprep.subr.bf16.mxu1 %v3876_v44 }
 0xad7   :  { %2582 = vmatpush1.bf16.msra.mxu0 %v3879_v51  ;;  %2623 = vmatpush1.bf16.msra.mxu1 %v3883_v52 }
 0xad8   :  { %2583 = vmatprep.subr.bf16.mxu0 %v3885_v53  ;;  %2624 = vmatprep.subr.bf16.mxu1 %v3888_v57 }
 0xadb   :  { %2584 = vmatpush1.bf16.msra.mxu0 %v3891_v63  ;;  %2625 = vmatpush1.bf16.msra.mxu1 %v3895_v1 }
 0xadc   :  { %2585 = vmatprep.subr.bf16.mxu0 %v3897_v2  ;;  %2626 = vmatprep.subr.bf16.mxu1 %v3900_v7 }
 0xadf   :  { %2586 = vmatpush1.bf16.msra.mxu0 %v3903_v16  ;;  %2627 = vmatpush1.bf16.msra.mxu1 %v3907_v20 }
 0xae0   :  { %2587 = vmatprep.subr.bf16.mxu0 %v3909_v21  ;;  %2628 = vmatprep.subr.bf16.mxu1 %v3915_v28 }
 0xae3   :  { %2588 = vmatpush1.bf16.msra.mxu0 %v3921_v37  ;;  %2629 = vmatpush1.bf16.msra.mxu1 %v3925_v38 }
 0xae4   :  { %2589 = vmatprep.subr.bf16.mxu0 %v3927_v41  ;;  %2630 = vmatprep.subr.bf16.mxu1 %v3930_v45 }
 0xae7   :  { %2590 = vmatpush1.bf16.msra.mxu0 %v3936_v49  ;;  %2631 = vmatpush1.bf16.msra.mxu1 %v3940_v50 }
 0xae8   :  { %2661 = vmatprep.subr.bf16.mxu0 %v3840_v4  ;;  %2702 = vmatprep.subr.bf16.mxu1 %v3842_v8 }
 0xb6a   :  { %v2408_v61 = vpop.f32.mrf.mxu0  ;;  %v2449_v15 = vpop.f32.mrf.mxu1 }
 0xb6b   :  { %v2456_v60 = vadd.f32 %v2408_v61, %v373_v42 }
 0xb6c   :  { %v2410_v19 = vpop.f32.mrf.mxu0  ;;  %v2451_v24 = vpop.f32.mrf.mxu1 }
 0xb6d   :  { %v2457_v36 = vadd.f32 %v2410_v19, %v374_v47  ;;  %v2459_v0 = vadd.f32 %v2451_v24, %v376_v55  ;;  %v375_v19 = vadd.f32 %v4025_v56, %v289_v11 }
 0xb6e   :  { %v2412_v29 = vpop.f32.mrf.mxu0  ;;  %v2453_v12 = vpop.f32.mrf.mxu1 }
 0xb70   :  { %v2413_v59 = vpop.f32.mrf.mxu0  ;;  %v2454_v32 = vpop.f32.mrf.mxu1 }
 0xb8a   :  { %v2494_v25 = vpop.f32.mrf.mxu0  ;;  %v2535_v14 = vpop.f32.mrf.mxu1 }
 0xb8b   :  { %v2542_v43 = vadd.f32 %v2494_v25, %v2456_v60  ;;  %v2458_v60 = vadd.f32 %v2449_v15, %v375_v19 }
 0xb8c   :  { %v2496_v48 = vpop.f32.mrf.mxu0  ;;  %v2537_v46 = vpop.f32.mrf.mxu1 }
 0xb8d   :  { %v2546_v29 = vmul.f32 0.5, %v2542_v43  ;;  %v2543_v12 = vadd.f32 %v2496_v48, %v2457_v36  ;;  %v2545_v30 = vadd.f32 %v2537_v46, %v2459_v0  ;;  %v2544_v47 = vadd.f32 %v2535_v14, %v2458_v60 }
 0xb8e   :  { %v2498_v59 = vpop.f32.mrf.mxu0  ;;  %v2539_v32 = vpop.f32.mrf.mxu1 }
 0xb8f   :  { %3697 = vtanh.f32 %v2546_v29  ;;  %v2547_v61 = vmul.f32 0.5, %v2543_v12  ;;  %v2548_v25 = vmul.f32 0.5, %v2544_v47 }
 0xb90   :  { %v2499_v58 = vpop.f32.mrf.mxu0  ;;  %v2540_v42 = vpop.f32.mrf.mxu1 }
 0xb91   :  { %3699 = vtanh.f32 %v2547_v61 }
 0xb92   :  { %3701 = vtanh.f32 %v2545_v30 }
 0xb93   :  { %3703 = vtanh.f32 %v2548_v25 }
 0xb9c   :  { %v3698_v54 = vpop.eup %3697 }
 0xb9d   :  { %v2552_v43 = vmul.f32 0.5, %v3698_v54 }
 0xb9e   :  { %v3700_v36 = vpop.eup %3699 }
 0xb9f   :  { %v2555_v48 = vadd.f32 0.5, %v2552_v43  ;;  %v2553_v59 = vmul.f32 0.5, %v3700_v36  ;;  %v3702_v24 = vpop.eup %3701  ;;  %v204_v36 = vpop.permute.xlu1 %203 }
 0xba0   :  { %v3704_v11 = vpop.eup %3703 }
 0xba1   :  { %v2556_v10 = vadd.f32 0.5, %v2553_v59  ;;  %v2560_v29 = vmul.f32 %v3702_v24, %v2555_v48  ;;  %v2554_v15 = vmul.f32 0.5, %v3704_v11  ;;  %v291_v48 = vmul.f32 %v4001_v6, %v204_v36  ;;  %v5255_v59 = vld [vmem:[#allocation9_spill] sm:$0xff]  ;;  %v5256_v11 = vld [vmem:[#allocation10_spill] sm:$0xff] }
 0xba3   :  { %v2559_v55 = vmul.f32 %v2556_v10, %v4772_v3  ;;  %v2557_v30 = vadd.f32 0.5, %v2554_v15  ;;  %v292_v10 = vmul.f32 %v5255_v59, %v204_v36  ;;  %v377_v24 = vadd.f32 %v4011_v23, %v291_v48 }
 0xba4   :  { %v294_v15 = vmul.f32 %v5256_v11, %v204_v36  ;;  %v293_v59 = vmul.f32 %v4020_v34, %v204_v36 }
 0xba5   :  { %v4852_v12 = vadd.f32 %v2560_v29, %v2559_v55  ;;  %v378_v29 = vadd.f32 %v5239_v62, %v292_v10 }
 0xba7   :  { %3705 = vtanh.f32 %v4852_v12 }
 0xbb4   :  { %v3706_v14 = vpop.eup %3705 }
 0xbb5   :  { %v2563_v46 = vmul.f32 %v3706_v14, %v2557_v30 }
 0xbb7   :  { %2565 = vst [vmem:[#allocation6 + $0x8] sm:$0xff] %v2563_v46  ;;  %v2566_v32 = vpack.c.bf16 %v2563_v46, %v2563_v46 }
 0xbb9   :  { %2608 = vmatmul.mubr.bf16.vlgmr.msra.gmra.mxu0 %v2566_v32  ;;  %2649 = vmatmul.mubr.bf16.vlgmr.msra.gmra.mxu1 %v2566_v32  ;;  %v2567_v3 = vunpack.c.l.bf16 %v2566_v32 }
 0xbba   :  { %2662 = vmatpush1.bf16.msra.mxu0 %v3844_v9  ;;  %2703 = vmatpush1.bf16.msra.mxu1 %v3847_v13 }
 0xbbb   :  { %2663 = vmatprep.subr.bf16.mxu0 %v3851_v17  ;;  %2704 = vmatprep.subr.bf16.mxu1 %v3853_v18  ;;  %v2568_v0 = vsub.f32 %v2563_v46, %v2567_v3 }
 0xbbc   :  { %2693 = vmatprep.mubr.bf16.mxu0 %v5236_v5  ;;  %2734 = vmatprep.mubr.bf16.mxu1 %v5236_v5 }
 0xbbd   :  { %v2569_v61 = vpack.c.bf16 %v2568_v0, %v2568_v0 }
 0xbbe   :  { %2664 = vmatpush1.bf16.msra.mxu0 %v3856_v22  ;;  %2705 = vmatpush1.bf16.msra.mxu1 %v3860_v26 }
 0xbbf   :  { %2665 = vmatprep.subr.bf16.mxu0 %v3862_v27  ;;  %2706 = vmatprep.subr.bf16.mxu1 %v3864_v31 }
 0xbc2   :  { %2666 = vmatpush1.bf16.msra.mxu0 %v3867_v35  ;;  %2707 = vmatpush1.bf16.msra.mxu1 %v3871_v39 }
 0xbc3   :  { %2667 = vmatprep.subr.bf16.mxu0 %v3873_v40  ;;  %2708 = vmatprep.subr.bf16.mxu1 %v3876_v44 }
 0xbc6   :  { %2668 = vmatpush1.bf16.msra.mxu0 %v3879_v51  ;;  %2709 = vmatpush1.bf16.msra.mxu1 %v3883_v52 }
 0xbc7   :  { %2669 = vmatprep.subr.bf16.mxu0 %v3885_v53  ;;  %2710 = vmatprep.subr.bf16.mxu1 %v3888_v57 }
 0xbca   :  { %2670 = vmatpush1.bf16.msra.mxu0 %v3891_v63  ;;  %2711 = vmatpush1.bf16.msra.mxu1 %v3895_v1 }
 0xbcb   :  { %2671 = vmatprep.subr.bf16.mxu0 %v3897_v2  ;;  %2712 = vmatprep.subr.bf16.mxu1 %v3900_v7 }
 0xbce   :  { %2672 = vmatpush1.bf16.msra.mxu0 %v3903_v16  ;;  %2713 = vmatpush1.bf16.msra.mxu1 %v3907_v20 }
 0xbcf   :  { %2673 = vmatprep.subr.bf16.mxu0 %v3909_v21  ;;  %2714 = vmatprep.subr.bf16.mxu1 %v3915_v28 }
 0xbd2   :  { %2674 = vmatpush1.bf16.msra.mxu0 %v3921_v37  ;;  %2715 = vmatpush1.bf16.msra.mxu1 %v3925_v38 }
 0xbd3   :  { %2675 = vmatprep.subr.bf16.mxu0 %v3927_v41  ;;  %2716 = vmatprep.subr.bf16.mxu1 %v3930_v45 }
 0xbd6   :  { %2676 = vmatpush1.bf16.msra.mxu0 %v3936_v49  ;;  %2717 = vmatpush1.bf16.msra.mxu1 %v3940_v50 }
 0xbd7   :  { %2776 = vmatprep.subr.bf16.mxu0 %v3840_v4  ;;  %2817 = vmatprep.subr.bf16.mxu1 %v3842_v8 }
 0xbd9   :  { %2694 = vmatmul.mubr.bf16.vlgmr.msra.gmra.mxu0 %v2569_v61  ;;  %2735 = vmatmul.mubr.bf16.vlgmr.msra.gmra.mxu1 %v2569_v61  ;;  %v380_v61 = vadd.f32 %v4018_v33, %v294_v15 }
 0xbda   :  { %2777 = vmatpush1.bf16.msra.mxu0 %v3844_v9  ;;  %2818 = vmatpush1.bf16.msra.mxu1 %v3847_v13 }
 0xbdb   :  { %2778 = vmatprep.subr.bf16.mxu0 %v3851_v17  ;;  %2819 = vmatprep.subr.bf16.mxu1 %v3853_v18 }
 0xbdc   :  { %2808 = vmatprep.mubr.bf16.mxu0 %v5236_v5  ;;  %2849 = vmatprep.mubr.bf16.mxu1 %v5236_v5 }
 0xbde   :  { %2779 = vmatpush1.bf16.msra.mxu0 %v3856_v22  ;;  %2820 = vmatpush1.bf16.msra.mxu1 %v3860_v26 }
 0xbdf   :  { %2780 = vmatprep.subr.bf16.mxu0 %v3862_v27  ;;  %2821 = vmatprep.subr.bf16.mxu1 %v3864_v31 }
 0xbe2   :  { %2781 = vmatpush1.bf16.msra.mxu0 %v3867_v35  ;;  %2822 = vmatpush1.bf16.msra.mxu1 %v3871_v39 }
 0xbe3   :  { %2782 = vmatprep.subr.bf16.mxu0 %v3873_v40  ;;  %2823 = vmatprep.subr.bf16.mxu1 %v3876_v44 }
 0xbe6   :  { %2783 = vmatpush1.bf16.msra.mxu0 %v3879_v51  ;;  %2824 = vmatpush1.bf16.msra.mxu1 %v3883_v52 }
 0xbe7   :  { %2784 = vmatprep.subr.bf16.mxu0 %v3885_v53  ;;  %2825 = vmatprep.subr.bf16.mxu1 %v3888_v57 }
 0xbea   :  { %2785 = vmatpush1.bf16.msra.mxu0 %v3891_v63  ;;  %2826 = vmatpush1.bf16.msra.mxu1 %v3895_v1 }
 0xbeb   :  { %2786 = vmatprep.subr.bf16.mxu0 %v3897_v2  ;;  %2827 = vmatprep.subr.bf16.mxu1 %v3900_v7 }
 0xbee   :  { %2787 = vmatpush1.bf16.msra.mxu0 %v3903_v16  ;;  %2828 = vmatpush1.bf16.msra.mxu1 %v3907_v20 }
 0xbef   :  { %2788 = vmatprep.subr.bf16.mxu0 %v3909_v21  ;;  %2829 = vmatprep.subr.bf16.mxu1 %v3915_v28 }
 0xbf2   :  { %2789 = vmatpush1.bf16.msra.mxu0 %v3921_v37  ;;  %2830 = vmatpush1.bf16.msra.mxu1 %v3925_v38 }
 0xbf3   :  { %2790 = vmatprep.subr.bf16.mxu0 %v3927_v41  ;;  %2831 = vmatprep.subr.bf16.mxu1 %v3930_v45 }
 0xbf6   :  { %2791 = vmatpush1.bf16.msra.mxu0 %v3936_v49  ;;  %2832 = vmatpush1.bf16.msra.mxu1 %v3940_v50 }
 0xbf7   :  { %2862 = vmatprep.subr.bf16.mxu0 %v3840_v4  ;;  %2903 = vmatprep.subr.bf16.mxu1 %v3842_v8 }
 0xc79   :  { %v2609_v58 = vpop.f32.mrf.mxu0  ;;  %v2650_v42 = vpop.f32.mrf.mxu1 }
 0xc7a   :  { %v2657_v55 = vadd.f32 %v2609_v58, %v377_v24 }
 0xc7b   :  { %v2611_v19 = vpop.f32.mrf.mxu0  ;;  %v2652_v60 = vpop.f32.mrf.mxu1 }
 0xc7c   :  { %v2658_v46 = vadd.f32 %v2611_v19, %v378_v29  ;;  %v2660_v48 = vadd.f32 %v2652_v60, %v380_v61  ;;  %v379_v19 = vadd.f32 %v4025_v56, %v293_v59 }
 0xc7d   :  { %v2613_v47 = vpop.f32.mrf.mxu0  ;;  %v2654_v25 = vpop.f32.mrf.mxu1 }
 0xc7f   :  { %v2614_v54 = vpop.f32.mrf.mxu0  ;;  %v2655_v43 = vpop.f32.mrf.mxu1 }
 0xc99   :  { %v2695_v30 = vpop.f32.mrf.mxu0  ;;  %v2736_v14 = vpop.f32.mrf.mxu1 }
 0xc9a   :  { %v2743_v32 = vadd.f32 %v2695_v30, %v2657_v55  ;;  %v2659_v55 = vadd.f32 %v2650_v42, %v379_v19 }
 0xc9b   :  { %v2697_v3 = vpop.f32.mrf.mxu0  ;;  %v2738_v0 = vpop.f32.mrf.mxu1 }
 0xc9c   :  { %v2747_v47 = vmul.f32 0.5, %v2743_v32  ;;  %v2744_v25 = vadd.f32 %v2697_v3, %v2658_v46  ;;  %v2746_v11 = vadd.f32 %v2738_v0, %v2660_v48  ;;  %v2745_v29 = vadd.f32 %v2736_v14, %v2659_v55 }
 0xc9d   :  { %v2699_v54 = vpop.f32.mrf.mxu0  ;;  %v2740_v43 = vpop.f32.mrf.mxu1 }
 0xc9e   :  { %3707 = vtanh.f32 %v2747_v47  ;;  %v2748_v58 = vmul.f32 0.5, %v2744_v25  ;;  %v2749_v30 = vmul.f32 0.5, %v2745_v29 }
 0xc9f   :  { %v2700_v10 = vpop.f32.mrf.mxu0  ;;  %v2741_v24 = vpop.f32.mrf.mxu1 }
 0xca0   :  { %3709 = vtanh.f32 %v2748_v58 }
 0xca1   :  { %3711 = vtanh.f32 %v2746_v11 }
 0xca2   :  { %3713 = vtanh.f32 %v2749_v30 }
 0xcab   :  { %v3708_v15 = vpop.eup %3707 }
 0xcac   :  { %v2753_v32 = vmul.f32 0.5, %v3708_v15 }
 0xcad   :  { %v3710_v46 = vpop.eup %3709 }
 0xcae   :  { %v2756_v3 = vadd.f32 0.5, %v2753_v32  ;;  %v2754_v54 = vmul.f32 0.5, %v3710_v46  ;;  %v3712_v60 = vpop.eup %3711  ;;  %v209_v46 = vpop.permute.xlu0 %208 }
 0xcaf   :  { %v3714_v59 = vpop.eup %3713 }
 0xcb0   :  { %v2757_v36 = vadd.f32 0.5, %v2754_v54  ;;  %v2761_v47 = vmul.f32 %v3712_v60, %v2756_v3  ;;  %v2755_v42 = vmul.f32 0.5, %v3714_v59  ;;  %v295_v3 = vmul.f32 %v4001_v6, %v209_v46  ;;  %v5257_v54 = vld [vmem:[#allocation9_spill] sm:$0xff]  ;;  %v5258_v59 = vld [vmem:[#allocation10_spill] sm:$0xff] }
 0xcb2   :  { %v2760_v61 = vmul.f32 %v2757_v36, %v4852_v12  ;;  %v2758_v11 = vadd.f32 0.5, %v2755_v42  ;;  %v296_v36 = vmul.f32 %v5257_v54, %v209_v46  ;;  %v381_v60 = vadd.f32 %v4011_v23, %v295_v3 }
 0xcb3   :  { %v298_v42 = vmul.f32 %v5258_v59, %v209_v46  ;;  %v297_v54 = vmul.f32 %v4020_v34, %v209_v46 }
 0xcb4   :  { %v4932_v25 = vadd.f32 %v2761_v47, %v2760_v61  ;;  %v382_v47 = vadd.f32 %v5239_v62, %v296_v36 }
 0xcb6   :  { %3715 = vtanh.f32 %v4932_v25 }
 0xcc3   :  { %v3716_v14 = vpop.eup %3715 }
 0xcc4   :  { %v2764_v0 = vmul.f32 %v3716_v14, %v2758_v11 }
 0xcc6   :  { %2766 = vst [vmem:[#allocation6 + $0x10] sm:$0xff] %v2764_v0  ;;  %v2767_v43 = vpack.c.bf16 %v2764_v0, %v2764_v0 }
 0xcc8   :  { %2809 = vmatmul.mubr.bf16.vlgmr.msra.gmra.mxu0 %v2767_v43  ;;  %2850 = vmatmul.mubr.bf16.vlgmr.msra.gmra.mxu1 %v2767_v43  ;;  %v2768_v12 = vunpack.c.l.bf16 %v2767_v43 }
 0xcc9   :  { %2863 = vmatpush1.bf16.msra.mxu0 %v3844_v9  ;;  %2904 = vmatpush1.bf16.msra.mxu1 %v3847_v13 }
 0xcca   :  { %2864 = vmatprep.subr.bf16.mxu0 %v3851_v17  ;;  %2905 = vmatprep.subr.bf16.mxu1 %v3853_v18  ;;  %v2769_v48 = vsub.f32 %v2764_v0, %v2768_v12 }
 0xccb   :  { %2894 = vmatprep.mubr.bf16.mxu0 %v5236_v5  ;;  %2935 = vmatprep.mubr.bf16.mxu1 %v5236_v5 }
 0xccc   :  { %v2770_v58 = vpack.c.bf16 %v2769_v48, %v2769_v48 }
 0xccd   :  { %2865 = vmatpush1.bf16.msra.mxu0 %v3856_v22  ;;  %2906 = vmatpush1.bf16.msra.mxu1 %v3860_v26 }
 0xcce   :  { %2866 = vmatprep.subr.bf16.mxu0 %v3862_v27  ;;  %2907 = vmatprep.subr.bf16.mxu1 %v3864_v31 }
 0xcd1   :  { %2867 = vmatpush1.bf16.msra.mxu0 %v3867_v35  ;;  %2908 = vmatpush1.bf16.msra.mxu1 %v3871_v39 }
 0xcd2   :  { %2868 = vmatprep.subr.bf16.mxu0 %v3873_v40  ;;  %2909 = vmatprep.subr.bf16.mxu1 %v3876_v44 }
 0xcd5   :  { %2869 = vmatpush1.bf16.msra.mxu0 %v3879_v51  ;;  %2910 = vmatpush1.bf16.msra.mxu1 %v3883_v52 }
 0xcd6   :  { %2870 = vmatprep.subr.bf16.mxu0 %v3885_v53  ;;  %2911 = vmatprep.subr.bf16.mxu1 %v3888_v57 }
 0xcd9   :  { %2871 = vmatpush1.bf16.msra.mxu0 %v3891_v63  ;;  %2912 = vmatpush1.bf16.msra.mxu1 %v3895_v1 }
 0xcda   :  { %2872 = vmatprep.subr.bf16.mxu0 %v3897_v2  ;;  %2913 = vmatprep.subr.bf16.mxu1 %v3900_v7 }
 0xcdd   :  { %2873 = vmatpush1.bf16.msra.mxu0 %v3903_v16  ;;  %2914 = vmatpush1.bf16.msra.mxu1 %v3907_v20 }
 0xcde   :  { %2874 = vmatprep.subr.bf16.mxu0 %v3909_v21  ;;  %2915 = vmatprep.subr.bf16.mxu1 %v3915_v28 }
 0xce1   :  { %2875 = vmatpush1.bf16.msra.mxu0 %v3921_v37  ;;  %2916 = vmatpush1.bf16.msra.mxu1 %v3925_v38 }
 0xce2   :  { %2876 = vmatprep.subr.bf16.mxu0 %v3927_v41  ;;  %2917 = vmatprep.subr.bf16.mxu1 %v3930_v45 }
 0xce5   :  { %2877 = vmatpush1.bf16.msra.mxu0 %v3936_v49  ;;  %2918 = vmatpush1.bf16.msra.mxu1 %v3940_v50 }
 0xce6   :  { %2977 = vmatprep.subr.bf16.mxu0 %v3840_v4  ;;  %3018 = vmatprep.subr.bf16.mxu1 %v3842_v8 }
 0xce8   :  { %2895 = vmatmul.mubr.bf16.vlgmr.msra.gmra.mxu0 %v2770_v58  ;;  %2936 = vmatmul.mubr.bf16.vlgmr.msra.gmra.mxu1 %v2770_v58  ;;  %v384_v58 = vadd.f32 %v4018_v33, %v298_v42 }
 0xce9   :  { %2978 = vmatpush1.bf16.msra.mxu0 %v3844_v9  ;;  %3019 = vmatpush1.bf16.msra.mxu1 %v3847_v13 }
 0xcea   :  { %2979 = vmatprep.subr.bf16.mxu0 %v3851_v17  ;;  %3020 = vmatprep.subr.bf16.mxu1 %v3853_v18 }
 0xceb   :  { %3009 = vmatprep.mubr.bf16.mxu0 %v5236_v5  ;;  %3050 = vmatprep.mubr.bf16.mxu1 %v5236_v5 }
 0xced   :  { %2980 = vmatpush1.bf16.msra.mxu0 %v3856_v22  ;;  %3021 = vmatpush1.bf16.msra.mxu1 %v3860_v26 }
 0xcee   :  { %2981 = vmatprep.subr.bf16.mxu0 %v3862_v27  ;;  %3022 = vmatprep.subr.bf16.mxu1 %v3864_v31 }
 0xcf1   :  { %2982 = vmatpush1.bf16.msra.mxu0 %v3867_v35  ;;  %3023 = vmatpush1.bf16.msra.mxu1 %v3871_v39 }
 0xcf2   :  { %2983 = vmatprep.subr.bf16.mxu0 %v3873_v40  ;;  %3024 = vmatprep.subr.bf16.mxu1 %v3876_v44 }
 0xcf5   :  { %2984 = vmatpush1.bf16.msra.mxu0 %v3879_v51  ;;  %3025 = vmatpush1.bf16.msra.mxu1 %v3883_v52 }
 0xcf6   :  { %2985 = vmatprep.subr.bf16.mxu0 %v3885_v53  ;;  %3026 = vmatprep.subr.bf16.mxu1 %v3888_v57 }
 0xcf9   :  { %2986 = vmatpush1.bf16.msra.mxu0 %v3891_v63  ;;  %3027 = vmatpush1.bf16.msra.mxu1 %v3895_v1 }
 0xcfa   :  { %2987 = vmatprep.subr.bf16.mxu0 %v3897_v2  ;;  %3028 = vmatprep.subr.bf16.mxu1 %v3900_v7 }
 0xcfd   :  { %2988 = vmatpush1.bf16.msra.mxu0 %v3903_v16  ;;  %3029 = vmatpush1.bf16.msra.mxu1 %v3907_v20 }
 0xcfe   :  { %2989 = vmatprep.subr.bf16.mxu0 %v3909_v21  ;;  %3030 = vmatprep.subr.bf16.mxu1 %v3915_v28 }
 0xd01   :  { %2990 = vmatpush1.bf16.msra.mxu0 %v3921_v37  ;;  %3031 = vmatpush1.bf16.msra.mxu1 %v3925_v38 }
 0xd02   :  { %2991 = vmatprep.subr.bf16.mxu0 %v3927_v41  ;;  %3032 = vmatprep.subr.bf16.mxu1 %v3930_v45 }
 0xd05   :  { %2992 = vmatpush1.bf16.msra.mxu0 %v3936_v49  ;;  %3033 = vmatpush1.bf16.msra.mxu1 %v3940_v50 }
 0xd06   :  { %3063 = vmatprep.subr.bf16.mxu0 %v3840_v4  ;;  %3104 = vmatprep.subr.bf16.mxu1 %v3842_v8 }
 0xd88   :  { %v2810_v10 = vpop.f32.mrf.mxu0  ;;  %v2851_v24 = vpop.f32.mrf.mxu1 }
 0xd89   :  { %v2858_v61 = vadd.f32 %v2810_v10, %v381_v60 }
 0xd8a   :  { %v2812_v19 = vpop.f32.mrf.mxu0  ;;  %v2853_v55 = vpop.f32.mrf.mxu1 }
 0xd8b   :  { %v2859_v0 = vadd.f32 %v2812_v19, %v382_v47  ;;  %v2861_v3 = vadd.f32 %v2853_v55, %v384_v58  ;;  %v383_v19 = vadd.f32 %v4025_v56, %v297_v54 }
 0xd8c   :  { %v2814_v29 = vpop.f32.mrf.mxu0  ;;  %v2855_v30 = vpop.f32.mrf.mxu1 }
 0xd8e   :  { %v2815_v15 = vpop.f32.mrf.mxu0  ;;  %v2856_v32 = vpop.f32.mrf.mxu1 }
 0xda8   :  { %v2896_v11 = vpop.f32.mrf.mxu0  ;;  %v2937_v14 = vpop.f32.mrf.mxu1 }
 0xda9   :  { %v2944_v43 = vadd.f32 %v2896_v11, %v2858_v61  ;;  %v2860_v61 = vadd.f32 %v2851_v24, %v383_v19 }
 0xdaa   :  { %v2898_v12 = vpop.f32.mrf.mxu0  ;;  %v2939_v48 = vpop.f32.mrf.mxu1 }
 0xdab   :  { %v2948_v29 = vmul.f32 0.5, %v2944_v43  ;;  %v2945_v30 = vadd.f32 %v2898_v12, %v2859_v0  ;;  %v2947_v59 = vadd.f32 %v2939_v48, %v2861_v3  ;;  %v2946_v47 = vadd.f32 %v2937_v14, %v2860_v61 }
 0xdac   :  { %v2900_v15 = vpop.f32.mrf.mxu0  ;;  %v2941_v32 = vpop.f32.mrf.mxu1 }
 0xdad   :  { %3717 = vtanh.f32 %v2948_v29  ;;  %v2949_v10 = vmul.f32 0.5, %v2945_v30  ;;  %v2950_v11 = vmul.f32 0.5, %v2946_v47 }
 0xdae   :  { %v2901_v36 = vpop.f32.mrf.mxu0  ;;  %v2942_v60 = vpop.f32.mrf.mxu1 }
 0xdaf   :  { %3719 = vtanh.f32 %v2949_v10 }
 0xdb0   :  { %3721 = vtanh.f32 %v2947_v59 }
 0xdb1   :  { %3723 = vtanh.f32 %v2950_v11 }
 0xdba   :  { %v3718_v42 = vpop.eup %3717 }
 0xdbb   :  { %v2954_v43 = vmul.f32 0.5, %v3718_v42 }
 0xdbc   :  { %v3720_v0 = vpop.eup %3719 }
 0xdbd   :  { %v2957_v12 = vadd.f32 0.5, %v2954_v43  ;;  %v2955_v15 = vmul.f32 0.5, %v3720_v0  ;;  %v3722_v55 = vpop.eup %3721  ;;  %v214_v0 = vpop.permute.xlu1 %213 }
 0xdbe   :  { %v3724_v54 = vpop.eup %3723 }
 0xdbf   :  { %v2958_v46 = vadd.f32 0.5, %v2955_v15  ;;  %v2962_v29 = vmul.f32 %v3722_v55, %v2957_v12  ;;  %v2956_v24 = vmul.f32 0.5, %v3724_v54  ;;  %v299_v12 = vmul.f32 %v4001_v6, %v214_v0  ;;  %v5259_v15 = vld [vmem:[#allocation9_spill] sm:$0xff]  ;;  %v5260_v54 = vld [vmem:[#allocation10_spill] sm:$0xff] }
 0xdc1   :  { %v2961_v58 = vmul.f32 %v2958_v46, %v4932_v25  ;;  %v2959_v59 = vadd.f32 0.5, %v2956_v24  ;;  %v300_v46 = vmul.f32 %v5259_v15, %v214_v0  ;;  %v385_v55 = vadd.f32 %v4011_v23, %v299_v12 }
 0xdc2   :  { %v302_v24 = vmul.f32 %v5260_v54, %v214_v0  ;;  %v301_v15 = vmul.f32 %v4020_v34, %v214_v0 }
 0xdc3   :  { %v5012_v30 = vadd.f32 %v2962_v29, %v2961_v58  ;;  %v386_v29 = vadd.f32 %v5239_v62, %v300_v46 }
 0xdc5   :  { %3725 = vtanh.f32 %v5012_v30 }
 0xdd2   :  { %v3726_v14 = vpop.eup %3725 }
 0xdd3   :  { %v2965_v48 = vmul.f32 %v3726_v14, %v2959_v59 }
 0xdd5   :  { %2967 = vst [vmem:[#allocation6 + $0x18] sm:$0xff] %v2965_v48  ;;  %v2968_v32 = vpack.c.bf16 %v2965_v48, %v2965_v48 }
 0xdd7   :  { %3010 = vmatmul.mubr.bf16.vlgmr.msra.gmra.mxu0 %v2968_v32  ;;  %3051 = vmatmul.mubr.bf16.vlgmr.msra.gmra.mxu1 %v2968_v32  ;;  %v2969_v25 = vunpack.c.l.bf16 %v2968_v32 }
 0xdd8   :  { %3064 = vmatpush1.bf16.msra.mxu0 %v3844_v9  ;;  %3105 = vmatpush1.bf16.msra.mxu1 %v3847_v13 }
 0xdd9   :  { %3065 = vmatprep.subr.bf16.mxu0 %v3851_v17  ;;  %3106 = vmatprep.subr.bf16.mxu1 %v3853_v18  ;;  %v2970_v3 = vsub.f32 %v2965_v48, %v2969_v25 }
 0xdda   :  { %3095 = vmatprep.mubr.bf16.mxu0 %v5236_v5  ;;  %3136 = vmatprep.mubr.bf16.mxu1 %v5236_v5 }
 0xddb   :  { %v2971_v10 = vpack.c.bf16 %v2970_v3, %v2970_v3 }
 0xddc   :  { %3066 = vmatpush1.bf16.msra.mxu0 %v3856_v22  ;;  %3107 = vmatpush1.bf16.msra.mxu1 %v3860_v26 }
 0xddd   :  { %3067 = vmatprep.subr.bf16.mxu0 %v3862_v27  ;;  %3108 = vmatprep.subr.bf16.mxu1 %v3864_v31 }
 0xde0   :  { %3068 = vmatpush1.bf16.msra.mxu0 %v3867_v35  ;;  %3109 = vmatpush1.bf16.msra.mxu1 %v3871_v39 }
 0xde1   :  { %3069 = vmatprep.subr.bf16.mxu0 %v3873_v40  ;;  %3110 = vmatprep.subr.bf16.mxu1 %v3876_v44 }
 0xde4   :  { %3070 = vmatpush1.bf16.msra.mxu0 %v3879_v51  ;;  %3111 = vmatpush1.bf16.msra.mxu1 %v3883_v52 }
 0xde5   :  { %3071 = vmatprep.subr.bf16.mxu0 %v3885_v53  ;;  %3112 = vmatprep.subr.bf16.mxu1 %v3888_v57 }
 0xde8   :  { %3072 = vmatpush1.bf16.msra.mxu0 %v3891_v63  ;;  %3113 = vmatpush1.bf16.msra.mxu1 %v3895_v1 }
 0xde9   :  { %3073 = vmatprep.subr.bf16.mxu0 %v3897_v2  ;;  %3114 = vmatprep.subr.bf16.mxu1 %v3900_v7 }
 0xdec   :  { %3074 = vmatpush1.bf16.msra.mxu0 %v3903_v16  ;;  %3115 = vmatpush1.bf16.msra.mxu1 %v3907_v20 }
 0xded   :  { %3075 = vmatprep.subr.bf16.mxu0 %v3909_v21  ;;  %3116 = vmatprep.subr.bf16.mxu1 %v3915_v28 }
 0xdf0   :  { %3076 = vmatpush1.bf16.msra.mxu0 %v3921_v37  ;;  %3117 = vmatpush1.bf16.msra.mxu1 %v3925_v38 }
 0xdf1   :  { %3077 = vmatprep.subr.bf16.mxu0 %v3927_v41  ;;  %3118 = vmatprep.subr.bf16.mxu1 %v3930_v45 }
 0xdf4   :  { %3078 = vmatpush1.bf16.msra.mxu0 %v3936_v49  ;;  %3119 = vmatpush1.bf16.msra.mxu1 %v3940_v50 }
 0xdf5   :  { %3178 = vmatprep.subr.bf16.mxu0 %v3840_v4  ;;  %3219 = vmatprep.subr.bf16.mxu1 %v3842_v8 }
 0xdf7   :  { %3096 = vmatmul.mubr.bf16.vlgmr.msra.gmra.mxu0 %v2971_v10  ;;  %3137 = vmatmul.mubr.bf16.vlgmr.msra.gmra.mxu1 %v2971_v10  ;;  %v388_v10 = vadd.f32 %v4018_v33, %v302_v24 }
 0xdf8   :  { %3179 = vmatpush1.bf16.msra.mxu0 %v3844_v9  ;;  %3220 = vmatpush1.bf16.msra.mxu1 %v3847_v13 }
 0xdf9   :  { %3180 = vmatprep.subr.bf16.mxu0 %v3851_v17  ;;  %3221 = vmatprep.subr.bf16.mxu1 %v3853_v18 }
 0xdfa   :  { %3210 = vmatprep.mubr.bf16.mxu0 %v5236_v5  ;;  %3251 = vmatprep.mubr.bf16.mxu1 %v5236_v5 }
 0xdfc   :  { %3181 = vmatpush1.bf16.msra.mxu0 %v3856_v22  ;;  %3222 = vmatpush1.bf16.msra.mxu1 %v3860_v26 }
 0xdfd   :  { %3182 = vmatprep.subr.bf16.mxu0 %v3862_v27  ;;  %3223 = vmatprep.subr.bf16.mxu1 %v3864_v31 }
 0xe00   :  { %3183 = vmatpush1.bf16.msra.mxu0 %v3867_v35  ;;  %3224 = vmatpush1.bf16.msra.mxu1 %v3871_v39 }
 0xe01   :  { %3184 = vmatprep.subr.bf16.mxu0 %v3873_v40  ;;  %3225 = vmatprep.subr.bf16.mxu1 %v3876_v44 }
 0xe04   :  { %3185 = vmatpush1.bf16.msra.mxu0 %v3879_v51  ;;  %3226 = vmatpush1.bf16.msra.mxu1 %v3883_v52 }
 0xe05   :  { %3186 = vmatprep.subr.bf16.mxu0 %v3885_v53  ;;  %3227 = vmatprep.subr.bf16.mxu1 %v3888_v57 }
 0xe08   :  { %3187 = vmatpush1.bf16.msra.mxu0 %v3891_v63  ;;  %3228 = vmatpush1.bf16.msra.mxu1 %v3895_v1 }
 0xe09   :  { %3188 = vmatprep.subr.bf16.mxu0 %v3897_v2  ;;  %3229 = vmatprep.subr.bf16.mxu1 %v3900_v7 }
 0xe0c   :  { %3189 = vmatpush1.bf16.msra.mxu0 %v3903_v16  ;;  %3230 = vmatpush1.bf16.msra.mxu1 %v3907_v20 }
 0xe0d   :  { %3190 = vmatprep.subr.bf16.mxu0 %v3909_v21  ;;  %3231 = vmatprep.subr.bf16.mxu1 %v3915_v28 }
 0xe10   :  { %3191 = vmatpush1.bf16.msra.mxu0 %v3921_v37  ;;  %3232 = vmatpush1.bf16.msra.mxu1 %v3925_v38 }
 0xe11   :  { %3192 = vmatprep.subr.bf16.mxu0 %v3927_v41  ;;  %3233 = vmatprep.subr.bf16.mxu1 %v3930_v45 }
 0xe14   :  { %3193 = vmatpush1.bf16.msra.mxu0 %v3936_v49  ;;  %3234 = vmatpush1.bf16.msra.mxu1 %v3940_v50 }
 0xe15   :  { %3264 = vmatprep.subr.bf16.mxu0 %v3840_v4  ;;  %3305 = vmatprep.subr.bf16.mxu1 %v3842_v8 }
 0xe97   :  { %v3011_v36 = vpop.f32.mrf.mxu0  ;;  %v3052_v60 = vpop.f32.mrf.mxu1 }
 0xe98   :  { %v3059_v58 = vadd.f32 %v3011_v36, %v385_v55 }
 0xe99   :  { %v3013_v19 = vpop.f32.mrf.mxu0  ;;  %v3054_v61 = vpop.f32.mrf.mxu1 }
 0xe9a   :  { %v3060_v48 = vadd.f32 %v3013_v19, %v386_v29  ;;  %v3062_v12 = vadd.f32 %v3054_v61, %v388_v10  ;;  %v387_v19 = vadd.f32 %v4025_v56, %v301_v15 }
 0xe9b   :  { %v3015_v47 = vpop.f32.mrf.mxu0  ;;  %v3056_v11 = vpop.f32.mrf.mxu1 }
 0xe9d   :  { %v3016_v42 = vpop.f32.mrf.mxu0  ;;  %v3057_v43 = vpop.f32.mrf.mxu1 }
 0xeb7   :  { %v3097_v59 = vpop.f32.mrf.mxu0  ;;  %v3138_v14 = vpop.f32.mrf.mxu1 }
 0xeb8   :  { %v3145_v32 = vadd.f32 %v3097_v59, %v3059_v58  ;;  %v3061_v58 = vadd.f32 %v3052_v60, %v387_v19 }
 0xeb9   :  { %v3099_v25 = vpop.f32.mrf.mxu0  ;;  %v3140_v3 = vpop.f32.mrf.mxu1 }
 0xeba   :  { %v3149_v47 = vmul.f32 0.5, %v3145_v32  ;;  %v3146_v11 = vadd.f32 %v3099_v25, %v3060_v48  ;;  %v3148_v62 = vadd.f32 %v3140_v3, %v3062_v12  ;;  %v3147_v29 = vadd.f32 %v3138_v14, %v3061_v58 }
 0xebb   :  { %v3101_v42 = vpop.f32.mrf.mxu0  ;;  %v3142_v43 = vpop.f32.mrf.mxu1 }
 0xebc   :  { %3727 = vtanh.f32 %v3149_v47  ;;  %v3150_v36 = vmul.f32 0.5, %v3146_v11  ;;  %v3151_v59 = vmul.f32 0.5, %v3147_v29 }
 0xebd   :  { %v3102_v46 = vpop.f32.mrf.mxu0  ;;  %v3143_v55 = vpop.f32.mrf.mxu1 }
 0xebe   :  { %3729 = vtanh.f32 %v3150_v36 }
 0xebf   :  { %3731 = vtanh.f32 %v3148_v62 }
 0xec0   :  { %3733 = vtanh.f32 %v3151_v59 }
 0xec9   :  { %v3728_v24 = vpop.eup %3727 }
 0xeca   :  { %v3155_v32 = vmul.f32 0.5, %v3728_v24 }
 0xecb   :  { %v3730_v48 = vpop.eup %3729 }
 0xecc   :  { %v3158_v25 = vadd.f32 0.5, %v3155_v32  ;;  %v3156_v42 = vmul.f32 0.5, %v3730_v48  ;;  %v3732_v61 = vpop.eup %3731  ;;  %v219_v48 = vpop.permute.xlu0 %218 }
 0xecd   :  { %v3734_v15 = vpop.eup %3733 }
 0xece   :  { %v3159_v0 = vadd.f32 0.5, %v3156_v42  ;;  %v3163_v47 = vmul.f32 %v3732_v61, %v3158_v25  ;;  %v3157_v60 = vmul.f32 0.5, %v3734_v15  ;;  %v303_v25 = vmul.f32 %v4001_v6, %v219_v48  ;;  %v5261_v42 = vld [vmem:[#allocation9_spill] sm:$0xff] }
 0xed0   :  { %v3162_v10 = vmul.f32 %v3159_v0, %v5012_v30  ;;  %v3160_v62 = vadd.f32 0.5, %v3157_v60  ;;  %v304_v0 = vmul.f32 %v5261_v42, %v219_v48  ;;  %v389_v61 = vadd.f32 %v4011_v23, %v303_v25 }
 0xed2   :  { %v5092_v11 = vadd.f32 %v3163_v47, %v3162_v10  ;;  %v306_v10 = vmul.f32 %v5260_v54, %v219_v48  ;;  %v5262_v47 = vld [vmem:[#allocation11_spill] sm:$0xff] }
 0xed4   :  { %3735 = vtanh.f32 %v5092_v11 }
 0xee1   :  { %v3736_v14 = vpop.eup %3735 }
 0xee2   :  { %v3166_v3 = vmul.f32 %v3736_v14, %v3160_v62 }
 0xee4   :  { %3168 = vst [vmem:[#allocation6 + $0x20] sm:$0xff] %v3166_v3  ;;  %v3169_v43 = vpack.c.bf16 %v3166_v3, %v3166_v3 }
 0xee6   :  { %3211 = vmatmul.mubr.bf16.vlgmr.msra.gmra.mxu0 %v3169_v43  ;;  %3252 = vmatmul.mubr.bf16.vlgmr.msra.gmra.mxu1 %v3169_v43  ;;  %v3170_v30 = vunpack.c.l.bf16 %v3169_v43 }
 0xee7   :  { %3265 = vmatpush1.bf16.msra.mxu0 %v3844_v9  ;;  %3306 = vmatpush1.bf16.msra.mxu1 %v3847_v13 }
 0xee8   :  { %3266 = vmatprep.subr.bf16.mxu0 %v3851_v17  ;;  %3307 = vmatprep.subr.bf16.mxu1 %v3853_v18  ;;  %v3171_v12 = vsub.f32 %v3166_v3, %v3170_v30  ;;  %v392_v30 = vadd.f32 %v4018_v33, %v306_v10 }
 0xee9   :  { %3296 = vmatprep.mubr.bf16.mxu0 %v5236_v5  ;;  %3337 = vmatprep.mubr.bf16.mxu1 %v5236_v5 }
 0xeea   :  { %v3172_v36 = vpack.c.bf16 %v3171_v12, %v3171_v12 }
 0xeeb   :  { %3267 = vmatpush1.bf16.msra.mxu0 %v3856_v22  ;;  %3308 = vmatpush1.bf16.msra.mxu1 %v3860_v26 }
 0xeec   :  { %3268 = vmatprep.subr.bf16.mxu0 %v3862_v27  ;;  %3309 = vmatprep.subr.bf16.mxu1 %v3864_v31 }
 0xeef   :  { %3269 = vmatpush1.bf16.msra.mxu0 %v3867_v35  ;;  %3310 = vmatpush1.bf16.msra.mxu1 %v3871_v39 }
 0xef0   :  { %3270 = vmatprep.subr.bf16.mxu0 %v3873_v40  ;;  %3311 = vmatprep.subr.bf16.mxu1 %v3876_v44 }
 0xef3   :  { %3271 = vmatpush1.bf16.msra.mxu0 %v3879_v51  ;;  %3312 = vmatpush1.bf16.msra.mxu1 %v3883_v52 }
 0xef4   :  { %3272 = vmatprep.subr.bf16.mxu0 %v3885_v53  ;;  %3313 = vmatprep.subr.bf16.mxu1 %v3888_v57 }
 0xef7   :  { %3273 = vmatpush1.bf16.msra.mxu0 %v3891_v63  ;;  %3314 = vmatpush1.bf16.msra.mxu1 %v3895_v1 }
 0xef8   :  { %3274 = vmatprep.subr.bf16.mxu0 %v3897_v2  ;;  %3315 = vmatprep.subr.bf16.mxu1 %v3900_v7 }
 0xefb   :  { %3275 = vmatpush1.bf16.msra.mxu0 %v3903_v16  ;;  %3316 = vmatpush1.bf16.msra.mxu1 %v3907_v20 }
 0xefc   :  { %3276 = vmatprep.subr.bf16.mxu0 %v3909_v21  ;;  %3317 = vmatprep.subr.bf16.mxu1 %v3915_v28 }
 0xeff   :  { %3277 = vmatpush1.bf16.msra.mxu0 %v3921_v37  ;;  %3318 = vmatpush1.bf16.msra.mxu1 %v3925_v38 }
 0xf00   :  { %3278 = vmatprep.subr.bf16.mxu0 %v3927_v41  ;;  %3319 = vmatprep.subr.bf16.mxu1 %v3930_v45 }
 0xf03   :  { %3279 = vmatpush1.bf16.msra.mxu0 %v3936_v49  ;;  %3320 = vmatpush1.bf16.msra.mxu1 %v3940_v50 }
 0xf04   :  { %3379 = vmatprep.subr.bf16.mxu0 %v3840_v4  ;;  %3420 = vmatprep.subr.bf16.mxu1 %v3842_v8 }
 0xf06   :  { %3297 = vmatmul.mubr.bf16.vlgmr.msra.gmra.mxu0 %v3172_v36  ;;  %3338 = vmatmul.mubr.bf16.vlgmr.msra.gmra.mxu1 %v3172_v36 }
 0xf07   :  { %3380 = vmatpush1.bf16.msra.mxu0 %v3844_v9  ;;  %3421 = vmatpush1.bf16.msra.mxu1 %v3847_v13 }
 0xf08   :  { %3381 = vmatprep.subr.bf16.mxu0 %v3851_v17  ;;  %3422 = vmatprep.subr.bf16.mxu1 %v3853_v18 }
 0xf09   :  { %3411 = vmatprep.mubr.bf16.mxu0 %v5236_v5  ;;  %3452 = vmatprep.mubr.bf16.mxu1 %v5236_v5 }
 0xf0b   :  { %3382 = vmatpush1.bf16.msra.mxu0 %v3856_v22  ;;  %3423 = vmatpush1.bf16.msra.mxu1 %v3860_v26 }
 0xf0c   :  { %3383 = vmatprep.subr.bf16.mxu0 %v3862_v27  ;;  %3424 = vmatprep.subr.bf16.mxu1 %v3864_v31 }
 0xf0f   :  { %3384 = vmatpush1.bf16.msra.mxu0 %v3867_v35  ;;  %3425 = vmatpush1.bf16.msra.mxu1 %v3871_v39 }
 0xf10   :  { %3385 = vmatprep.subr.bf16.mxu0 %v3873_v40  ;;  %3426 = vmatprep.subr.bf16.mxu1 %v3876_v44 }
 0xf13   :  { %3386 = vmatpush1.bf16.msra.mxu0 %v3879_v51  ;;  %3427 = vmatpush1.bf16.msra.mxu1 %v3883_v52 }
 0xf14   :  { %3387 = vmatprep.subr.bf16.mxu0 %v3885_v53  ;;  %3428 = vmatprep.subr.bf16.mxu1 %v3888_v57 }
 0xf17   :  { %3388 = vmatpush1.bf16.msra.mxu0 %v3891_v63  ;;  %3429 = vmatpush1.bf16.msra.mxu1 %v3895_v1 }
 0xf18   :  { %3389 = vmatprep.subr.bf16.mxu0 %v3897_v2  ;;  %3430 = vmatprep.subr.bf16.mxu1 %v3900_v7 }
 0xf1b   :  { %3390 = vmatpush1.bf16.msra.mxu0 %v3903_v16  ;;  %3431 = vmatpush1.bf16.msra.mxu1 %v3907_v20 }
 0xf1c   :  { %3391 = vmatprep.subr.bf16.mxu0 %v3909_v21  ;;  %3432 = vmatprep.subr.bf16.mxu1 %v3915_v28 }
 0xf1f   :  { %3392 = vmatpush1.bf16.msra.mxu0 %v3921_v37  ;;  %3433 = vmatpush1.bf16.msra.mxu1 %v3925_v38 }
 0xf20   :  { %3393 = vmatprep.subr.bf16.mxu0 %v3927_v41  ;;  %3434 = vmatprep.subr.bf16.mxu1 %v3930_v45 }
 0xf23   :  { %3394 = vmatpush1.bf16.msra.mxu0 %v3936_v49  ;;  %3435 = vmatpush1.bf16.msra.mxu1 %v3940_v50 }
 0xf24   :  { %3465 = vmatprep.subr.bf16.mxu0 %v3840_v4  ;;  %3506 = vmatprep.subr.bf16.mxu1 %v3842_v8  ;;  %v390_v8 = vadd.f32 %v5262_v47, %v304_v0 }
 0xfa6   :  { %v3212_v46 = vpop.f32.mrf.mxu0  ;;  %v3253_v55 = vpop.f32.mrf.mxu1 }
 0xfa7   :  { %v3260_v4 = vadd.f32 %v3212_v46, %v389_v61 }
 0xfa8   :  { %v3214_v19 = vpop.f32.mrf.mxu0  ;;  %v3255_v58 = vpop.f32.mrf.mxu1 }
 0xfa9   :  { %v3261_v62 = vadd.f32 %v3214_v19, %v390_v8 }
 0xfaa   :  { %v3216_v29 = vpop.f32.mrf.mxu0  ;;  %v3257_v59 = vpop.f32.mrf.mxu1 }
 0xfac   :  { %v3217_v24 = vpop.f32.mrf.mxu0  ;;  %v3258_v32 = vpop.f32.mrf.mxu1 }
 0xfad   :  { %v305_v24 = vmul.f32 %v4020_v34, %v219_v48  ;;  %v3263_v32 = vadd.f32 %v3255_v58, %v392_v30 }
 0xfaf   :  { %v391_v19 = vadd.f32 %v4025_v56, %v305_v24 }
 0xfc6   :  { %v3298_v15 = vpop.f32.mrf.mxu0  ;;  %v3339_v60 = vpop.f32.mrf.mxu1 }
 0xfc7   :  { %v3346_v14 = vadd.f32 %v3298_v15, %v3260_v4  ;;  %v3262_v4 = vadd.f32 %v3253_v55, %v391_v19 }
 0xfc8   :  { %v3300_v3 = vpop.f32.mrf.mxu0  ;;  %v3341_v43 = vpop.f32.mrf.mxu1 }
 0xfc9   :  { %v3350_v12 = vmul.f32 0.5, %v3346_v14  ;;  %v3347_v36 = vadd.f32 %v3300_v3, %v3261_v62  ;;  %v3349_v0 = vadd.f32 %v3341_v43, %v3263_v32  ;;  %v3348_v8 = vadd.f32 %v3339_v60, %v3262_v4 }
 0xfca   :  { %v3302_v29 = vpop.f32.mrf.mxu0  ;;  %v3343_v59 = vpop.f32.mrf.mxu1 }
 0xfcb   :  { %3737 = vtanh.f32 %v3350_v12  ;;  %v3351_v25 = vmul.f32 0.5, %v3347_v36  ;;  %v3352_v15 = vmul.f32 0.5, %v3348_v8 }
 0xfcc   :  { %v3303_v46 = vpop.f32.mrf.mxu0  ;;  %v3344_v61 = vpop.f32.mrf.mxu1 }
 0xfcd   :  { %3739 = vtanh.f32 %v3351_v25 }
 0xfce   :  { %3741 = vtanh.f32 %v3349_v0 }
 0xfcf   :  { %3743 = vtanh.f32 %v3352_v15 }
 0xfd8   :  { %v3738_v10 = vpop.eup %3737 }
 0xfd9   :  { %v3356_v14 = vmul.f32 0.5, %v3738_v10 }
 0xfda   :  { %v3740_v62 = vpop.eup %3739 }
 0xfdb   :  { %v3359_v3 = vadd.f32 0.5, %v3356_v14  ;;  %v3357_v29 = vmul.f32 0.5, %v3740_v62  ;;  %v3742_v58 = vpop.eup %3741 }
 0xfdc   :  { %v3744_v43 = vpop.eup %3743 }
 0xfdd   :  { %v3360_v48 = vadd.f32 0.5, %v3357_v29  ;;  %v3364_v12 = vmul.f32 %v3742_v58, %v3359_v3  ;;  %v3358_v55 = vmul.f32 0.5, %v3744_v43 }
 0xfdf   :  { %v3363_v30 = vmul.f32 %v3360_v48, %v5092_v11  ;;  %v3361_v59 = vadd.f32 0.5, %v3358_v55 }
 0xfe1   :  { %v5172_v36 = vadd.f32 %v3364_v12, %v3363_v30 }
 0xfe3   :  { %3745 = vtanh.f32 %v5172_v36 }
 0xff0   :  { %v3746_v60 = vpop.eup %3745 }
 0xff1   :  { %v3367_v24 = vmul.f32 %v3746_v60, %v3361_v59 }
 0xff3   :  { %3369 = vst [vmem:[#allocation6 + $0x28] sm:$0xff] %v3367_v24  ;;  %v3370_v32 = vpack.c.bf16 %v3367_v24, %v3367_v24 }
 0xff5   :  { %3412 = vmatmul.mubr.bf16.vlgmr.msra.gmra.mxu0 %v3370_v32  ;;  %3453 = vmatmul.mubr.bf16.vlgmr.msra.gmra.mxu1 %v3370_v32 }
 0xff6   :  { %3466 = vmatpush1.bf16.msra.mxu0 %v3844_v9  ;;  %3507 = vmatpush1.bf16.msra.mxu1 %v3847_v13  ;;  %v3371_v9 = vunpack.c.l.bf16 %v3370_v32 }
 0xff7   :  { %3467 = vmatprep.subr.bf16.mxu0 %v3851_v17  ;;  %3508 = vmatprep.subr.bf16.mxu1 %v3853_v18 }
 0xff8   :  { %3497 = vmatprep.mubr.bf16.mxu0 %v5236_v5  ;;  %3538 = vmatprep.mubr.bf16.mxu1 %v5236_v5  ;;  %v3372_v13 = vsub.f32 %v3367_v24, %v3371_v9 }
 0xffa   :  { %3468 = vmatpush1.bf16.msra.mxu0 %v3856_v22  ;;  %3509 = vmatpush1.bf16.msra.mxu1 %v3860_v26  ;;  %v3373_v17 = vpack.c.bf16 %v3372_v13, %v3372_v13 }
 0xffb   :  { %3469 = vmatprep.subr.bf16.mxu0 %v3862_v27  ;;  %3510 = vmatprep.subr.bf16.mxu1 %v3864_v31 }
 0xffe   :  { %3470 = vmatpush1.bf16.msra.mxu0 %v3867_v35  ;;  %3511 = vmatpush1.bf16.msra.mxu1 %v3871_v39 }
 0xfff   :  { %3471 = vmatprep.subr.bf16.mxu0 %v3873_v40  ;;  %3512 = vmatprep.subr.bf16.mxu1 %v3876_v44  ;;  %v224_v44 = vpop.permute.xlu1 %223 }
0x1002   :  { %3472 = vmatpush1.bf16.msra.mxu0 %v3879_v51  ;;  %3513 = vmatpush1.bf16.msra.mxu1 %v3883_v52  ;;  %v307_v51 = vmul.f32 %v4001_v6, %v224_v44  ;;  %v308_v52 = vmul.f32 %v5261_v42, %v224_v44 }
0x1003   :  { %3473 = vmatprep.subr.bf16.mxu0 %v3885_v53  ;;  %3514 = vmatprep.subr.bf16.mxu1 %v3888_v57  ;;  %v310_v57 = vmul.f32 %v5260_v54, %v224_v44 }
0x1004   :  { %v393_v53 = vadd.f32 %v4011_v23, %v307_v51 }
0x1006   :  { %3474 = vmatpush1.bf16.msra.mxu0 %v3891_v63  ;;  %3515 = vmatpush1.bf16.msra.mxu1 %v3895_v1  ;;  %v394_v1 = vadd.f32 %v5262_v47, %v308_v52 }
0x1007   :  { %3475 = vmatprep.subr.bf16.mxu0 %v3897_v2  ;;  %3516 = vmatprep.subr.bf16.mxu1 %v3900_v7 }
0x100a   :  { %3476 = vmatpush1.bf16.msra.mxu0 %v3903_v16  ;;  %3517 = vmatpush1.bf16.msra.mxu1 %v3907_v20 }
0x100b   :  { %3477 = vmatprep.subr.bf16.mxu0 %v3909_v21  ;;  %3518 = vmatprep.subr.bf16.mxu1 %v3915_v28 }
0x100e   :  { %3478 = vmatpush1.bf16.msra.mxu0 %v3921_v37  ;;  %3519 = vmatpush1.bf16.msra.mxu1 %v3925_v38  ;;  %v396_v37 = vadd.f32 %v4018_v33, %v310_v57 }
0x100f   :  { %3479 = vmatprep.subr.bf16.mxu0 %v3927_v41  ;;  %3520 = vmatprep.subr.bf16.mxu1 %v3930_v45 }
0x1012   :  { %3480 = vmatpush1.bf16.msra.mxu0 %v3936_v49  ;;  %3521 = vmatpush1.bf16.msra.mxu1 %v3940_v50  ;;  %v309_v50 = vmul.f32 %v4020_v34, %v224_v44 }
0x1014   :  { %v395_v42 = vadd.f32 %v4025_v56, %v309_v50 }
0x1015   :  { %3498 = vmatmul.mubr.bf16.vlgmr.msra.gmra.mxu0 %v3373_v17  ;;  %3539 = vmatmul.mubr.bf16.vlgmr.msra.gmra.mxu1 %v3373_v17 }
0x10b5   :  { %v3413_v18 = vpop.f32.mrf.mxu0  ;;  %v3454_v22 = vpop.f32.mrf.mxu1 }
0x10b6   :  { %v3461_v63 = vadd.f32 %v3413_v18, %v393_v53  ;;  %v3463_v47 = vadd.f32 %v3454_v22, %v395_v42 }
0x10b7   :  { %v3415_v26 = vpop.f32.mrf.mxu0  ;;  %v3456_v27 = vpop.f32.mrf.mxu1 }
0x10b8   :  { %v3462_v16 = vadd.f32 %v3415_v26, %v394_v1  ;;  %v3464_v6 = vadd.f32 %v3456_v27, %v396_v37 }
0x10b9   :  { %v3417_v31 = vpop.f32.mrf.mxu0  ;;  %v3458_v35 = vpop.f32.mrf.mxu1 }
0x10bb   :  { %v3418_v39 = vpop.f32.mrf.mxu0  ;;  %v3459_v40 = vpop.f32.mrf.mxu1 }
0x10d5   :  { %v3499_v2 = vpop.f32.mrf.mxu0  ;;  %v3540_v7 = vpop.f32.mrf.mxu1 }
0x10d6   :  { %v3547_v20 = vadd.f32 %v3499_v2, %v3461_v63  ;;  %v3549_v25 = vadd.f32 %v3540_v7, %v3463_v47 }
0x10d7   :  { %v3501_v21 = vpop.f32.mrf.mxu0  ;;  %v3542_v28 = vpop.f32.mrf.mxu1 }
0x10d8   :  { %v3551_v38 = vmul.f32 0.5, %v3547_v20  ;;  %v3548_v41 = vadd.f32 %v3501_v21, %v3462_v16  ;;  %v3550_v11 = vadd.f32 %v3542_v28, %v3464_v6  ;;  %v3553_v46 = vmul.f32 0.5, %v3549_v25 }
0x10d9   :  { %v3503_v45 = vpop.f32.mrf.mxu0  ;;  %v3544_v49 = vpop.f32.mrf.mxu1 }
0x10da   :  { %3747 = vtanh.f32 %v3551_v38  ;;  %v3552_v23 = vmul.f32 0.5, %v3548_v41 }
0x10db   :  { %v3504_v5 = vpop.f32.mrf.mxu0  ;;  %v3545_v54 = vpop.f32.mrf.mxu1 }
0x10dc   :  { %3749 = vtanh.f32 %v3552_v23 }
0x10dd   :  { %3751 = vtanh.f32 %v3550_v11 }
0x10de   :  { %3753 = vtanh.f32 %v3553_v46 }
0x10e7   :  { %v3748_v33 = vpop.eup %3747 }
0x10e8   :  { %v3557_v61 = vmul.f32 0.5, %v3748_v33 }
0x10e9   :  { %v3750_v0 = vpop.eup %3749 }
0x10ea   :  { %v3560_v19 = vadd.f32 0.5, %v3557_v61  ;;  %v3558_v4 = vmul.f32 0.5, %v3750_v0  ;;  %v3752_v8 = vpop.eup %3751 }
0x10eb   :  { %v3754_v62 = vpop.eup %3753 }
0x10ec   :  { %v3561_v34 = vadd.f32 0.5, %v3558_v4  ;;  %v3565_v10 = vmul.f32 %v3752_v8, %v3560_v19  ;;  %v3559_v3 = vmul.f32 0.5, %v3754_v62 }
0x10ee   :  { %v3564_v15 = vmul.f32 %v3561_v34, %v5172_v36  ;;  %v3562_v56 = vadd.f32 0.5, %v3559_v3 }
0x10f0   :  { %v3566_v14 = vadd.f32 %v3565_v10, %v3564_v15 }
0x10f2   :  { %3755 = vtanh.f32 %v3566_v14 }
0x10ff   :  { %v3756_v29 = vpop.eup %3755 }
0x1100   :  { %v3568_v48 = vmul.f32 %v3756_v29, %v3562_v56 }
0x1102   :  { %3570 = vst [vmem:[#allocation6 + $0x30] sm:$0xff] %v3568_v48 }
0x1103   :  { %3788 = shalt.err (!%p3785_p9)
}
0x1104   :  { %s3806_s30 = smov 128   ;;  %s3807_s5 = smov 8  }
0x1105   :  { %3582 = dma.vmem_to_hbm [thread:$0]  %s3577_s28, 896, %s5223_s4, [#allocation5], %s3806_s30, %s3806_s30, %s3807_s5  }
0x1106   :  { %3799 = dma.done.wait [#allocation5], 896  }
0x1107   :  { %3800 = vsyncadd [#allocation5], 4294966400 }
0x1108   :  { %3586 = vsyncpa [#allocation4], 1 }
0x1109   :  { %3587 = vsyncpa [#allocation5], 1 }

</bundles_post_ra>
